<compile_context>
chip_gen: v7x
topology: tpu7x:2x2x1
jax: 0.10.0
libtpu: 0.0.40
codegen_flags: <defaults>
</compile_context>

<pallas_src>
import functools

import numpy as np
import jax
import jax.numpy as jnp
from jax import lax
from jax.experimental import pallas as pl
from jax.experimental.pallas import tpu as pltpu


# ----------------------------- small helpers ------------------------------- #

def _round_up(x, m):
    return ((x + m - 1) // m) * m


def _ceil_chain(n, times=3):
    for _ in range(times):
        n = (n + 1) // 2
    return n


def _pick_row_tile(ho, wo_p, max_rows=1024):
    """Largest divisor of `ho` whose output tile (th * wo_p rows) fits the budget."""
    th = 1
    for d in range(1, ho + 1):
        if ho % d == 0 and d * wo_p <= max_rows:
            th = d
    return th


# ----------------------------- Pallas kernels ------------------------------ #

def _conv_block_kernel(ee_ref, eo_ref, oe_ref, oo_ref, w_ref, b_ref, sc_ref,
                       sh_ref, o_ref, *, th, wo_p):
    """Fused discriminator block for one (batch, row-tile) grid point.

    Strided 3x3 conv as 9 tap matmuls over de-interleaved phases:
      out[i, j, :] = sum_{kh,kw} phase[kh%2, kw%2][i + kh//2, j + kw//2, :] @ W[kh, kw]
    followed by bias + LeakyReLU(0.2) + folded eval-mode BatchNorm.
    """
    cin_p = w_ref.shape[1]
    cout_p = w_ref.shape[2]
    i0 = pl.multiple_of(pl.program_id(1) * th, th)

    phases = {(0, 0): ee_ref, (0, 1): eo_ref, (1, 0): oe_ref, (1, 1): oo_ref}
    acc = jnp.zeros((th * wo_p, cout_p), jnp.float32)
    for k, (kh, kw) in enumerate([(a, b) for a in range(3) for b in range(3)]):
        pr = phases[(kh % 2, kw % 2)]
        xt = pr[0, pl.ds(i0 + kh // 2, th), pl.ds(kw // 2, wo_p), :]
        acc += jnp.dot(xt.reshape(th * wo_p, cin_p), w_ref[k],
                       preferred_element_type=jnp.float32)

    acc = acc + b_ref[...]
    acc = jnp.where(acc >= 0.0, acc, 0.2 * acc)   # LeakyReLU(0.2); Dropout2d eval = id
    acc = acc * sc_ref[...] + sh_ref[...]         # folded BatchNorm (identity for block 1)
    o_ref[0] = acc


def _conv_block_forward(x, w9, bias, scale, shift):
    """One discriminator_block.  x: [B, H, W, Cin_p] f32 (channel-padded NHWC).

    Returns [B, Ho, Wo_p, Cout_p] f32 with Ho = ceil(H/2) and Wo_p = ceil(W/2)
    rounded up to a multiple of 8 (extra columns are garbage, sliced by caller).
    """
    B, H, W, cin_p = x.shape
    assert w9.shape[1] == cin_p, (w9.shape, x.shape)
    cout_p = w9.shape[2]
    ho, wo = (H + 1) // 2, (W + 1) // 2
    wo_p = _round_up(wo, 8)

    # Zero-pad (conv pad 1 plus slack for the rounded-up width), cast to bf16 and
    # de-interleave into even/odd-H x even/odd-W phases (pure relayout, ~1x data).
    xb = x.astype(jnp.bfloat16)
    xp = jnp.pad(xb, ((0, 0),
                      (1, 2 * (ho + 1) - (H + 1)),
                      (1, 2 * (wo_p + 1) - (W + 1)),
                      (0, 0)))
    ee = xp[:, 0::2, 0::2, :]                       # [B, ho+1, wo_p+1, C]
    eo = xp[:, 0::2, 1::2, :][:, :, :wo_p, :]       # [B, ho+1, wo_p,   C]
    oe = xp[:, 1::2, 0::2, :][:, :ho, :, :]         # [B, ho,   wo_p+1, C]
    oo = xp[:, 1::2, 1::2, :][:, :ho, :wo_p, :]     # [B, ho,   wo_p,   C]

    th = _pick_row_tile(ho, wo_p)
    grid = (B, ho // th)
    kernel = functools.partial(_conv_block_kernel, th=th, wo_p=wo_p)
    out = pl.pallas_call(
        kernel,
        out_shape=jax.ShapeDtypeStruct((B, ho * wo_p, cout_p), jnp.float32),
        grid=grid,
        in_specs=[
            pl.BlockSpec((1, ho + 1, wo_p + 1, cin_p), lambda b, t: (b, 0, 0, 0)),
            pl.BlockSpec((1, ho + 1, wo_p, cin_p), lambda b, t: (b, 0, 0, 0)),
            pl.BlockSpec((1, ho, wo_p + 1, cin_p), lambda b, t: (b, 0, 0, 0)),
            pl.BlockSpec((1, ho, wo_p, cin_p), lambda b, t: (b, 0, 0, 0)),
            pl.BlockSpec((9, cin_p, cout_p), lambda b, t: (0, 0, 0)),
            pl.BlockSpec((1, cout_p), lambda b, t: (0, 0)),
            pl.BlockSpec((1, cout_p), lambda b, t: (0, 0)),
            pl.BlockSpec((1, cout_p), lambda b, t: (0, 0)),
        ],
        out_specs=pl.BlockSpec((1, th * wo_p, cout_p), lambda b, t: (b, t, 0)),
        compiler_params=pltpu.CompilerParams(
            dimension_semantics=("parallel", "parallel")),
    )(ee, eo, oe, oo, w9, bias, scale, shift)
    return out.reshape(B, ho, wo_p, cout_p)


def _adv_head_kernel(x_ref, w_ref, b_ref, o_ref):
    """Adversarial Linear (out_features=1) as a VPU multiply + reduce."""
    prod = x_ref[...] * w_ref[...]                  # [B, M, Cp] * [1, M, Cp]
    s = jnp.sum(prod, axis=-1)                      # lane reduce -> [B, M]
    s = jnp.sum(s, axis=-1, keepdims=True)          # -> [B, 1]
    o_ref[...] = s + b_ref[...]


def _adv_head(flat, w, b):
    B, M, cp = flat.shape
    return pl.pallas_call(
        _adv_head_kernel,
        out_shape=jax.ShapeDtypeStruct((B, 1), jnp.float32),
        grid=(1,),
        in_specs=[
            pl.BlockSpec((B, M, cp), lambda i: (0, 0, 0)),
            pl.BlockSpec((1, M, cp), lambda i: (0, 0, 0)),
            pl.BlockSpec((1, 1), lambda i: (0, 0)),
        ],
        out_specs=pl.BlockSpec((B, 1), lambda i: (0, 0)),
    )(flat, w, b)


# --------------------------- params (one-time prep) ------------------------- #

def init_raw_params(key, time_length, freq_length, c_in=1, hidden=32):
    """PyTorch-layout parameters of Discriminator2DFactory (norm_type='bn')."""
    ks = jax.random.split(key, 16)
    n = lambda k, s, sc=0.1: sc * jax.random.normal(k, s, dtype=jnp.float32)
    bn = lambda k0, k1, k2, k3: dict(
        gamma=1.0 + n(k0, (hidden,)), beta=n(k1, (hidden,)),
        mean=n(k2, (hidden,)), var=1.0 + 0.1 * jnp.abs(jax.random.normal(k3, (hidden,))),
        eps=jnp.float32(0.8))  # nn.BatchNorm2d(hidden, 0.8) -> eps=0.8
    h3, w3 = time_length // 8, (freq_length + 7) // 8
    adv_in = hidden * h3 * w3
    return {
        "w1": n(ks[0], (hidden, c_in, 3, 3)), "b1": n(ks[1], (hidden,)),
        "w2": n(ks[2], (hidden, hidden, 3, 3)), "b2": n(ks[3], (hidden,)),
        "bn2": bn(ks[4], ks[5], ks[6], ks[7]),
        "w3": n(ks[8], (hidden, hidden, 3, 3)), "b3": n(ks[9], (hidden,)),
        "bn3": bn(ks[10], ks[11], ks[12], ks[13]),
        "adv_w": n(ks[14], (1, adv_in)), "adv_b": n(ks[15], (1,)),
    }


def prepare_params(raw, time_length, freq_length, c_in, hidden):
    """Hoisted one-time prep: weight relayout, lane padding, eval-BN folding."""
    cp = _round_up(hidden, 128)
    cin1_p = _round_up(max(c_in, 1), 8)

    def conv_prep(w_t, b, cin_p, bn):
        cout, cin = w_t.shape[0], w_t.shape[1]
        w = jnp.transpose(w_t, (2, 3, 1, 0)).reshape(9, cin, cout)          # tap-major
        w = jnp.pad(w, ((0, 0), (0, cin_p - cin), (0, cp - cout))).astype(jnp.bfloat16)
        bias = jnp.pad(b, (0, cp - cout)).astype(jnp.float32)[None, :]
        if bn is None:
            scale = jnp.pad(jnp.ones((cout,), jnp.float32), (0, cp - cout))
            shift = jnp.zeros((cp,), jnp.float32)
        else:
            s = bn["gamma"] / jnp.sqrt(bn["var"] + bn["eps"])
            scale = jnp.pad(s, (0, cp - cout))
            shift = jnp.pad(bn["beta"] - bn["mean"] * s, (0, cp - cout))
        return {"w": w, "b": bias, "scale": scale[None, :], "shift": shift[None, :]}

    blocks = [
        conv_prep(raw["w1"], raw["b1"], cin1_p, None),
        conv_prep(raw["w2"], raw["b2"], cp, raw["bn2"]),
        conv_prep(raw["w3"], raw["b3"], cp, raw["bn3"]),
    ]

    # adv head weight: NCHW-flatten order -> NHWC / channel-padded layout.
    h3, w3 = _ceil_chain(time_length), _ceil_chain(freq_length)
    assert (time_length // 8, (freq_length + 7) // 8) == (h3, w3), \
        "time/freq lengths incompatible with the module's adv_layer sizing"
    aw = raw["adv_w"].reshape(hidden, h3, w3)
    aw = jnp.transpose(aw, (1, 2, 0))
    aw = jnp.pad(aw, ((0, 0), (0, 0), (0, cp - hidden)))
    aw = aw.reshape(1, h3 * w3, cp).astype(jnp.float32)
    ab = raw["adv_b"].reshape(1, 1).astype(jnp.float32)
    return {"blocks": blocks, "adv_w": aw, "adv_b": ab}


# --------------------------------- forward ---------------------------------- #

@functools.partial(jax.jit, static_argnames=("hidden",))
def disc2d_forward(params, x, *, hidden):
    """Discriminator2DFactory.forward (norm_type='bn', reduction='sum', eval mode).

    x: [B, c_in, T, n_bins] (NCHW, like PyTorch).  Returns (validity [B, 1],
    h = list of 3 NCHW hidden activations).
    """
    B, c_in, _, _ = x.shape
    cin1_p = params["blocks"][0]["w"].shape[1]

    cur = jnp.transpose(x, (0, 2, 3, 1)).astype(jnp.float32)          # NHWC
    cur = jnp.pad(cur, ((0, 0), (0, 0), (0, 0), (0, cin1_p - c_in)))  # pad channels

    h = []
    for blk in params["blocks"]:
        wo = (cur.shape[2] + 1) // 2
        y = _conv_block_forward(cur, blk["w"], blk["b"], blk["scale"], blk["shift"])
        y = y[:, :, :wo, :]                                           # drop width padding
        h.append(jnp.transpose(y[..., :hidden], (0, 3, 1, 2)))        # NCHW hidden
        cur = y                                                       # channel-padded NHWC

    Bc, h3, w3, cp = cur.shape
    flat = cur.reshape(Bc, h3 * w3, cp)
    validity = _adv_head(flat, params["adv_w"], params["adv_b"])
    return validity, h


# ------------------------ pure-JAX reference (f32) --------------------------- #

def reference_forward(raw, x):
    def block(z, w, b, bn):
        y = lax.conv_general_dilated(z, w, (2, 2), ((1, 1), (1, 1)),
                                     dimension_numbers=("NCHW", "OIHW", "NCHW"))
        y = y + b[None, :, None, None]
        y = jnp.where(y >= 0, y, 0.2 * y)
        if bn is not None:
            s = bn["gamma"] / jnp.sqrt(bn["var"] + bn["eps"])
            y = y * s[None, :, None, None] + (bn["beta"] - bn["mean"] * s)[None, :, None, None]
        return y

    h = []
    y = block(x, raw["w1"], raw["b1"], None); h.append(y)
    y = block(y, raw["w2"], raw["b2"], raw["bn2"]); h.append(y)
    y = block(y, raw["w3"], raw["b3"], raw["bn3"]); h.append(y)
    flat = y.reshape(y.shape[0], -1)
    validity = flat @ raw["adv_w"].T + raw["adv_b"][None, :]
    return validity, h


# ----------------------------------- main ------------------------------------ #

if __name__ == "__main__":
    B, C_IN, T, FREQ = 2, 1, 16, 16
    HIDDEN = 32

    key = jax.random.PRNGKey(0)
    kx, kp = jax.random.split(key)
    x = jax.random.normal(kx, (B, C_IN, T, FREQ), dtype=jnp.float32)

    raw = init_raw_params(kp, T, FREQ, c_in=C_IN, hidden=HIDDEN)
    params = prepare_params(raw, T, FREQ, c_in=C_IN, hidden=HIDDEN)

    validity, h = disc2d_forward(params, x, hidden=HIDDEN)
    validity = jax.block_until_ready(validity)

    assert validity.shape == (B, 1), validity.shape
    assert len(h) == 3
    assert bool(jnp.all(jnp.isfinite(validity)))

    # Numerical check against a pure-JAX f32 reference (bf16 matmuls -> loose tol).
    ref_v, ref_h = reference_forward(raw, x)
    np.testing.assert_allclose(np.asarray(validity), np.asarray(ref_v),
                               rtol=5e-2, atol=5e-2)
    for a, r in zip(h, ref_h):
        np.testing.assert_allclose(np.asarray(a), np.asarray(r),
                                   rtol=5e-2, atol=5e-2)

    print("KERNEL_OK")
</pallas_src>

<mosaic_0001>
module attributes {stable_mosaic.version = 11 : i64} {
  func.func @_conv_block_kernel(%arg0: i32, %arg1: i32, %arg2: memref<1x9x9x8xbf16, #tpu.memory_space<vmem>>, %arg3: memref<1x9x8x8xbf16, #tpu.memory_space<vmem>>, %arg4: memref<1x8x9x8xbf16, #tpu.memory_space<vmem>>, %arg5: memref<1x8x8x8xbf16, #tpu.memory_space<vmem>>, %arg6: memref<9x8x128xbf16, #tpu.memory_space<vmem>>, %arg7: memref<1x128xf32, #tpu.memory_space<vmem>>, %arg8: memref<1x128xf32, #tpu.memory_space<vmem>>, %arg9: memref<1x128xf32, #tpu.memory_space<vmem>>, %arg10: memref<1x64x128xf32, #tpu.memory_space<vmem>>) attributes {dimension_semantics = [#tpu.dimension_semantics<parallel>, #tpu.dimension_semantics<parallel>], iteration_bounds = array<i64: 2, 1>, scalar_prefetch = 0 : i64, scratch_operands = 0 : i64, tpu.core_type = #tpu.core_type<tc>, window_params = [{transform_indices = @transform_0, window_bounds = array<i64: 1, 9, 9, 8>}, {transform_indices = @transform_1, window_bounds = array<i64: 1, 9, 8, 8>}, {transform_indices = @transform_2, window_bounds = array<i64: 1, 8, 9, 8>}, {transform_indices = @transform_3, window_bounds = array<i64: 1, 8, 8, 8>}, {pipeline_mode = #tpu.pipeline_mode<synchronous>, transform_indices = @transform_4, window_bounds = array<i64: 9, 8, 128>}, {pipeline_mode = #tpu.pipeline_mode<synchronous>, transform_indices = @transform_5, window_bounds = array<i64: 1, 128>}, {pipeline_mode = #tpu.pipeline_mode<synchronous>, transform_indices = @transform_6, window_bounds = array<i64: 1, 128>}, {pipeline_mode = #tpu.pipeline_mode<synchronous>, transform_indices = @transform_7, window_bounds = array<i64: 1, 128>}, {transform_indices = @transform_8, window_bounds = array<i64: 1, 64, 128>}]} {
    %c8_i32 = arith.constant 8 : i32
    %0 = arith.muli %arg1, %c8_i32 : i32
    %1 = tpu.assume_multiple %0, 8 : i32
    %cst = arith.constant 0.000000e+00 : f32
    %2 = vector.broadcast %cst : f32 to vector<64x128xf32>
    %c0_i32 = arith.constant 0 : i32
    %3 = arith.addi %1, %c0_i32 : i32
    %c0 = arith.constant 0 : index
    %4 = arith.index_cast %3 : i32 to index
    %c0_0 = arith.constant 0 : index
    %c0_1 = arith.constant 0 : index
    %5 = vector.load %arg2[%c0, %4, %c0_0, %c0_1] : memref<1x9x9x8xbf16, #tpu.memory_space<vmem>>, vector<1x8x8x8xbf16>
    %6 = vector.shape_cast %5 : vector<1x8x8x8xbf16> to vector<8x8x8xbf16>
    %7 = vector.shape_cast %6 : vector<8x8x8xbf16> to vector<64x8xbf16>
    %c0_2 = arith.constant 0 : index
    %c0_3 = arith.constant 0 : index
    %c0_4 = arith.constant 0 : index
    %8 = vector.load %arg6[%c0_2, %c0_3, %c0_4] : memref<9x8x128xbf16, #tpu.memory_space<vmem>>, vector<1x8x128xbf16>
    %9 = vector.shape_cast %8 : vector<1x8x128xbf16> to vector<8x128xbf16>
    %cst_5 = arith.constant dense<0.000000e+00> : vector<64x128xf32>
    %10 = tpu.matmul %7, %9, %cst_5 {dimension_numbers = #tpu.dot_dimension_numbers<[1], [0], [0], [1], [0, 0, 1, 1], [], []>} : vector<64x8xbf16>, vector<8x128xbf16>, vector<64x128xf32> -> vector<64x128xf32>
    %11 = arith.addf %2, %10 : vector<64x128xf32>
    %c0_i32_6 = arith.constant 0 : i32
    %12 = arith.addi %1, %c0_i32_6 : i32
    %c0_7 = arith.constant 0 : index
    %13 = arith.index_cast %12 : i32 to index
    %c0_8 = arith.constant 0 : index
    %c0_9 = arith.constant 0 : index
    %14 = vector.load %arg3[%c0_7, %13, %c0_8, %c0_9] : memref<1x9x8x8xbf16, #tpu.memory_space<vmem>>, vector<1x8x8x8xbf16>
    %15 = vector.shape_cast %14 : vector<1x8x8x8xbf16> to vector<8x8x8xbf16>
    %16 = vector.shape_cast %15 : vector<8x8x8xbf16> to vector<64x8xbf16>
    %c1 = arith.constant 1 : index
    %c0_10 = arith.constant 0 : index
    %c0_11 = arith.constant 0 : index
    %17 = vector.load %arg6[%c1, %c0_10, %c0_11] : memref<9x8x128xbf16, #tpu.memory_space<vmem>>, vector<1x8x128xbf16>
    %18 = vector.shape_cast %17 : vector<1x8x128xbf16> to vector<8x128xbf16>
    %cst_12 = arith.constant dense<0.000000e+00> : vector<64x128xf32>
    %19 = tpu.matmul %16, %18, %cst_12 {dimension_numbers = #tpu.dot_dimension_numbers<[1], [0], [0], [1], [0, 0, 1, 1], [], []>} : vector<64x8xbf16>, vector<8x128xbf16>, vector<64x128xf32> -> vector<64x128xf32>
    %20 = arith.addf %11, %19 : vector<64x128xf32>
    %c0_i32_13 = arith.constant 0 : i32
    %21 = arith.addi %1, %c0_i32_13 : i32
    %c0_14 = arith.constant 0 : index
    %22 = arith.index_cast %21 : i32 to index
    %c1_15 = arith.constant 1 : index
    %c0_16 = arith.constant 0 : index
    %23 = vector.load %arg2[%c0_14, %22, %c1_15, %c0_16] : memref<1x9x9x8xbf16, #tpu.memory_space<vmem>>, vector<1x8x8x8xbf16>
    %24 = vector.shape_cast %23 : vector<1x8x8x8xbf16> to vector<8x8x8xbf16>
    %25 = vector.shape_cast %24 : vector<8x8x8xbf16> to vector<64x8xbf16>
    %c2 = arith.constant 2 : index
    %c0_17 = arith.constant 0 : index
    %c0_18 = arith.constant 0 : index
    %26 = vector.load %arg6[%c2, %c0_17, %c0_18] : memref<9x8x128xbf16, #tpu.memory_space<vmem>>, vector<1x8x128xbf16>
    %27 = vector.shape_cast %26 : vector<1x8x128xbf16> to vector<8x128xbf16>
    %cst_19 = arith.constant dense<0.000000e+00> : vector<64x128xf32>
    %28 = tpu.matmul %25, %27, %cst_19 {dimension_numbers = #tpu.dot_dimension_numbers<[1], [0], [0], [1], [0, 0, 1, 1], [], []>} : vector<64x8xbf16>, vector<8x128xbf16>, vector<64x128xf32> -> vector<64x128xf32>
    %29 = arith.addf %20, %28 : vector<64x128xf32>
    %c0_i32_20 = arith.constant 0 : i32
    %30 = arith.addi %1, %c0_i32_20 : i32
    %c0_21 = arith.constant 0 : index
    %31 = arith.index_cast %30 : i32 to index
    %c0_22 = arith.constant 0 : index
    %c0_23 = arith.constant 0 : index
    %32 = vector.load %arg4[%c0_21, %31, %c0_22, %c0_23] : memref<1x8x9x8xbf16, #tpu.memory_space<vmem>>, vector<1x8x8x8xbf16>
    %33 = vector.shape_cast %32 : vector<1x8x8x8xbf16> to vector<8x8x8xbf16>
    %34 = vector.shape_cast %33 : vector<8x8x8xbf16> to vector<64x8xbf16>
    %c3 = arith.constant 3 : index
    %c0_24 = arith.constant 0 : index
    %c0_25 = arith.constant 0 : index
    %35 = vector.load %arg6[%c3, %c0_24, %c0_25] : memref<9x8x128xbf16, #tpu.memory_space<vmem>>, vector<1x8x128xbf16>
    %36 = vector.shape_cast %35 : vector<1x8x128xbf16> to vector<8x128xbf16>
    %cst_26 = arith.constant dense<0.000000e+00> : vector<64x128xf32>
    %37 = tpu.matmul %34, %36, %cst_26 {dimension_numbers = #tpu.dot_dimension_numbers<[1], [0], [0], [1], [0, 0, 1, 1], [], []>} : vector<64x8xbf16>, vector<8x128xbf16>, vector<64x128xf32> -> vector<64x128xf32>
    %38 = arith.addf %29, %37 : vector<64x128xf32>
    %c0_i32_27 = arith.constant 0 : i32
    %39 = arith.addi %1, %c0_i32_27 : i32
    %c0_28 = arith.constant 0 : index
    %40 = arith.index_cast %39 : i32 to index
    %c0_29 = arith.constant 0 : index
    %c0_30 = arith.constant 0 : index
    %41 = vector.load %arg5[%c0_28, %40, %c0_29, %c0_30] : memref<1x8x8x8xbf16, #tpu.memory_space<vmem>>, vector<1x8x8x8xbf16>
    %42 = vector.shape_cast %41 : vector<1x8x8x8xbf16> to vector<8x8x8xbf16>
    %43 = vector.shape_cast %42 : vector<8x8x8xbf16> to vector<64x8xbf16>
    %c4 = arith.constant 4 : index
    %c0_31 = arith.constant 0 : index
    %c0_32 = arith.constant 0 : index
    %44 = vector.load %arg6[%c4, %c0_31, %c0_32] : memref<9x8x128xbf16, #tpu.memory_space<vmem>>, vector<1x8x128xbf16>
    %45 = vector.shape_cast %44 : vector<1x8x128xbf16> to vector<8x128xbf16>
    %cst_33 = arith.constant dense<0.000000e+00> : vector<64x128xf32>
    %46 = tpu.matmul %43, %45, %cst_33 {dimension_numbers = #tpu.dot_dimension_numbers<[1], [0], [0], [1], [0, 0, 1, 1], [], []>} : vector<64x8xbf16>, vector<8x128xbf16>, vector<64x128xf32> -> vector<64x128xf32>
    %47 = arith.addf %38, %46 : vector<64x128xf32>
    %c0_i32_34 = arith.constant 0 : i32
    %48 = arith.addi %1, %c0_i32_34 : i32
    %c0_35 = arith.constant 0 : index
    %49 = arith.index_cast %48 : i32 to index
    %c1_36 = arith.constant 1 : index
    %c0_37 = arith.constant 0 : index
    %50 = vector.load %arg4[%c0_35, %49, %c1_36, %c0_37] : memref<1x8x9x8xbf16, #tpu.memory_space<vmem>>, vector<1x8x8x8xbf16>
    %51 = vector.shape_cast %50 : vector<1x8x8x8xbf16> to vector<8x8x8xbf16>
    %52 = vector.shape_cast %51 : vector<8x8x8xbf16> to vector<64x8xbf16>
    %c5 = arith.constant 5 : index
    %c0_38 = arith.constant 0 : index
    %c0_39 = arith.constant 0 : index
    %53 = vector.load %arg6[%c5, %c0_38, %c0_39] : memref<9x8x128xbf16, #tpu.memory_space<vmem>>, vector<1x8x128xbf16>
    %54 = vector.shape_cast %53 : vector<1x8x128xbf16> to vector<8x128xbf16>
    %cst_40 = arith.constant dense<0.000000e+00> : vector<64x128xf32>
    %55 = tpu.matmul %52, %54, %cst_40 {dimension_numbers = #tpu.dot_dimension_numbers<[1], [0], [0], [1], [0, 0, 1, 1], [], []>} : vector<64x8xbf16>, vector<8x128xbf16>, vector<64x128xf32> -> vector<64x128xf32>
    %56 = arith.addf %47, %55 : vector<64x128xf32>
    %c1_i32 = arith.constant 1 : i32
    %57 = arith.addi %1, %c1_i32 : i32
    %c0_41 = arith.constant 0 : index
    %58 = arith.index_cast %57 : i32 to index
    %c0_42 = arith.constant 0 : index
    %c0_43 = arith.constant 0 : index
    %59 = vector.load %arg2[%c0_41, %58, %c0_42, %c0_43] : memref<1x9x9x8xbf16, #tpu.memory_space<vmem>>, vector<1x8x8x8xbf16>
    %60 = vector.shape_cast %59 : vector<1x8x8x8xbf16> to vector<8x8x8xbf16>
    %61 = vector.shape_cast %60 : vector<8x8x8xbf16> to vector<64x8xbf16>
    %c6 = arith.constant 6 : index
    %c0_44 = arith.constant 0 : index
    %c0_45 = arith.constant 0 : index
    %62 = vector.load %arg6[%c6, %c0_44, %c0_45] : memref<9x8x128xbf16, #tpu.memory_space<vmem>>, vector<1x8x128xbf16>
    %63 = vector.shape_cast %62 : vector<1x8x128xbf16> to vector<8x128xbf16>
    %cst_46 = arith.constant dense<0.000000e+00> : vector<64x128xf32>
    %64 = tpu.matmul %61, %63, %cst_46 {dimension_numbers = #tpu.dot_dimension_numbers<[1], [0], [0], [1], [0, 0, 1, 1], [], []>} : vector<64x8xbf16>, vector<8x128xbf16>, vector<64x128xf32> -> vector<64x128xf32>
    %65 = arith.addf %56, %64 : vector<64x128xf32>
    %c1_i32_47 = arith.constant 1 : i32
    %66 = arith.addi %1, %c1_i32_47 : i32
    %c0_48 = arith.constant 0 : index
    %67 = arith.index_cast %66 : i32 to index
    %c0_49 = arith.constant 0 : index
    %c0_50 = arith.constant 0 : index
    %68 = vector.load %arg3[%c0_48, %67, %c0_49, %c0_50] : memref<1x9x8x8xbf16, #tpu.memory_space<vmem>>, vector<1x8x8x8xbf16>
    %69 = vector.shape_cast %68 : vector<1x8x8x8xbf16> to vector<8x8x8xbf16>
    %70 = vector.shape_cast %69 : vector<8x8x8xbf16> to vector<64x8xbf16>
    %c7 = arith.constant 7 : index
    %c0_51 = arith.constant 0 : index
    %c0_52 = arith.constant 0 : index
    %71 = vector.load %arg6[%c7, %c0_51, %c0_52] : memref<9x8x128xbf16, #tpu.memory_space<vmem>>, vector<1x8x128xbf16>
    %72 = vector.shape_cast %71 : vector<1x8x128xbf16> to vector<8x128xbf16>
    %cst_53 = arith.constant dense<0.000000e+00> : vector<64x128xf32>
    %73 = tpu.matmul %70, %72, %cst_53 {dimension_numbers = #tpu.dot_dimension_numbers<[1], [0], [0], [1], [0, 0, 1, 1], [], []>} : vector<64x8xbf16>, vector<8x128xbf16>, vector<64x128xf32> -> vector<64x128xf32>
    %74 = arith.addf %65, %73 : vector<64x128xf32>
    %c1_i32_54 = arith.constant 1 : i32
    %75 = arith.addi %1, %c1_i32_54 : i32
    %c0_55 = arith.constant 0 : index
    %76 = arith.index_cast %75 : i32 to index
    %c1_56 = arith.constant 1 : index
    %c0_57 = arith.constant 0 : index
    %77 = vector.load %arg2[%c0_55, %76, %c1_56, %c0_57] : memref<1x9x9x8xbf16, #tpu.memory_space<vmem>>, vector<1x8x8x8xbf16>
    %78 = vector.shape_cast %77 : vector<1x8x8x8xbf16> to vector<8x8x8xbf16>
    %79 = vector.shape_cast %78 : vector<8x8x8xbf16> to vector<64x8xbf16>
    %c8 = arith.constant 8 : index
    %c0_58 = arith.constant 0 : index
    %c0_59 = arith.constant 0 : index
    %80 = vector.load %arg6[%c8, %c0_58, %c0_59] : memref<9x8x128xbf16, #tpu.memory_space<vmem>>, vector<1x8x128xbf16>
    %81 = vector.shape_cast %80 : vector<1x8x128xbf16> to vector<8x128xbf16>
    %cst_60 = arith.constant dense<0.000000e+00> : vector<64x128xf32>
    %82 = tpu.matmul %79, %81, %cst_60 {dimension_numbers = #tpu.dot_dimension_numbers<[1], [0], [0], [1], [0, 0, 1, 1], [], []>} : vector<64x8xbf16>, vector<8x128xbf16>, vector<64x128xf32> -> vector<64x128xf32>
    %83 = arith.addf %74, %82 : vector<64x128xf32>
    %c0_61 = arith.constant 0 : index
    %c0_62 = arith.constant 0 : index
    %84 = vector.load %arg7[%c0_61, %c0_62] : memref<1x128xf32, #tpu.memory_space<vmem>>, vector<1x128xf32>
    %85 = vector.broadcast %84 : vector<1x128xf32> to vector<64x128xf32>
    %86 = arith.addf %83, %85 : vector<64x128xf32>
    %cst_63 = arith.constant 0.000000e+00 : f32
    %87 = vector.broadcast %cst_63 : f32 to vector<64x128xf32>
    %88 = arith.cmpf oge, %86, %87 : vector<64x128xf32>
    %cst_64 = arith.constant 2.000000e-01 : f32
    %89 = vector.broadcast %cst_64 : f32 to vector<64x128xf32>
    %90 = arith.mulf %89, %86 : vector<64x128xf32>
    %91 = arith.select %88, %86, %90 : vector<64x128xi1>, vector<64x128xf32>
    %c0_65 = arith.constant 0 : index
    %c0_66 = arith.constant 0 : index
    %92 = vector.load %arg8[%c0_65, %c0_66] : memref<1x128xf32, #tpu.memory_space<vmem>>, vector<1x128xf32>
    %93 = vector.broadcast %92 : vector<1x128xf32> to vector<64x128xf32>
    %94 = arith.mulf %91, %93 : vector<64x128xf32>
    %c0_67 = arith.constant 0 : index
    %c0_68 = arith.constant 0 : index
    %95 = vector.load %arg9[%c0_67, %c0_68] : memref<1x128xf32, #tpu.memory_space<vmem>>, vector<1x128xf32>
    %96 = vector.broadcast %95 : vector<1x128xf32> to vector<64x128xf32>
    %97 = arith.addf %94, %96 : vector<64x128xf32>
    %c0_69 = arith.constant 0 : index
    %c0_70 = arith.constant 0 : index
    %c0_71 = arith.constant 0 : index
    %98 = vector.load %arg10[%c0_69, %c0_70, %c0_71] : memref<1x64x128xf32, #tpu.memory_space<vmem>>, vector<1x64x128xf32>
    %99 = vector.shape_cast %98 : vector<1x64x128xf32> to vector<64x128xf32>
    %100 = vector.shape_cast %97 : vector<64x128xf32> to vector<1x64x128xf32>
    tpu.vector_store %arg10[%c0_69, %c0_70, %c0_71], %100 {strides = array<i32>} : memref<1x64x128xf32, #tpu.memory_space<vmem>>, vector<1x64x128xf32>,
    return
  }
  func.func @transform_0(%arg0: i32, %arg1: i32) -> (i32, i32, i32, i32) {
    %c0_i32 = arith.constant 0 : i32
    %c0_i32_0 = arith.constant 0 : i32
    %c0_i32_1 = arith.constant 0 : i32
    %c0_i32_2 = arith.constant 0 : i32
    return %arg0, %c0_i32, %c0_i32_0, %c0_i32_1 : i32, i32, i32, i32
  }
  func.func @transform_1(%arg0: i32, %arg1: i32) -> (i32, i32, i32, i32) {
    %c0_i32 = arith.constant 0 : i32
    %c0_i32_0 = arith.constant 0 : i32
    %c0_i32_1 = arith.constant 0 : i32
    %c0_i32_2 = arith.constant 0 : i32
    return %arg0, %c0_i32, %c0_i32_0, %c0_i32_1 : i32, i32, i32, i32
  }
  func.func @transform_2(%arg0: i32, %arg1: i32) -> (i32, i32, i32, i32) {
    %c0_i32 = arith.constant 0 : i32
    %c0_i32_0 = arith.constant 0 : i32
    %c0_i32_1 = arith.constant 0 : i32
    %c0_i32_2 = arith.constant 0 : i32
    return %arg0, %c0_i32, %c0_i32_0, %c0_i32_1 : i32, i32, i32, i32
  }
  func.func @transform_3(%arg0: i32, %arg1: i32) -> (i32, i32, i32, i32) {
    %c0_i32 = arith.constant 0 : i32
    %c0_i32_0 = arith.constant 0 : i32
    %c0_i32_1 = arith.constant 0 : i32
    %c0_i32_2 = arith.constant 0 : i32
    return %arg0, %c0_i32, %c0_i32_0, %c0_i32_1 : i32, i32, i32, i32
  }
  func.func @transform_4(%arg0: i32, %arg1: i32) -> (i32, i32, i32) {
    %c0_i32 = arith.constant 0 : i32
    %c0_i32_0 = arith.constant 0 : i32
    %c0_i32_1 = arith.constant 0 : i32
    %c0_i32_2 = arith.constant 0 : i32
    return %c0_i32, %c0_i32_0, %c0_i32_1 : i32, i32, i32
  }
  func.func @transform_5(%arg0: i32, %arg1: i32) -> (i32, i32) {
    %c0_i32 = arith.constant 0 : i32
    %c0_i32_0 = arith.constant 0 : i32
    %c0_i32_1 = arith.constant 0 : i32
    return %c0_i32, %c0_i32_0 : i32, i32
  }
  func.func @transform_6(%arg0: i32, %arg1: i32) -> (i32, i32) {
    %c0_i32 = arith.constant 0 : i32
    %c0_i32_0 = arith.constant 0 : i32
    %c0_i32_1 = arith.constant 0 : i32
    return %c0_i32, %c0_i32_0 : i32, i32
  }
  func.func @transform_7(%arg0: i32, %arg1: i32) -> (i32, i32) {
    %c0_i32 = arith.constant 0 : i32
    %c0_i32_0 = arith.constant 0 : i32
    %c0_i32_1 = arith.constant 0 : i32
    return %c0_i32, %c0_i32_0 : i32, i32
  }
  func.func @transform_8(%arg0: i32, %arg1: i32) -> (i32, i32, i32) {
    %c0_i32 = arith.constant 0 : i32
    %c0_i32_0 = arith.constant 0 : i32
    return %arg0, %arg1, %c0_i32 : i32, i32, i32
  }
}

module attributes {stable_mosaic.version = 11 : i64} {
  func.func @_conv_block_kernel(%arg0: i32, %arg1: i32, %arg2: memref<1x5x9x128xbf16, #tpu.memory_space<vmem>>, %arg3: memref<1x5x8x128xbf16, #tpu.memory_space<vmem>>, %arg4: memref<1x4x9x128xbf16, #tpu.memory_space<vmem>>, %arg5: memref<1x4x8x128xbf16, #tpu.memory_space<vmem>>, %arg6: memref<9x128x128xbf16, #tpu.memory_space<vmem>>, %arg7: memref<1x128xf32, #tpu.memory_space<vmem>>, %arg8: memref<1x128xf32, #tpu.memory_space<vmem>>, %arg9: memref<1x128xf32, #tpu.memory_space<vmem>>, %arg10: memref<1x32x128xf32, #tpu.memory_space<vmem>>) attributes {dimension_semantics = [#tpu.dimension_semantics<parallel>, #tpu.dimension_semantics<parallel>], iteration_bounds = array<i64: 2, 1>, scalar_prefetch = 0 : i64, scratch_operands = 0 : i64, tpu.core_type = #tpu.core_type<tc>, window_params = [{transform_indices = @transform_0, window_bounds = array<i64: 1, 5, 9, 128>}, {transform_indices = @transform_1, window_bounds = array<i64: 1, 5, 8, 128>}, {transform_indices = @transform_2, window_bounds = array<i64: 1, 4, 9, 128>}, {transform_indices = @transform_3, window_bounds = array<i64: 1, 4, 8, 128>}, {pipeline_mode = #tpu.pipeline_mode<synchronous>, transform_indices = @transform_4, window_bounds = array<i64: 9, 128, 128>}, {pipeline_mode = #tpu.pipeline_mode<synchronous>, transform_indices = @transform_5, window_bounds = array<i64: 1, 128>}, {pipeline_mode = #tpu.pipeline_mode<synchronous>, transform_indices = @transform_6, window_bounds = array<i64: 1, 128>}, {pipeline_mode = #tpu.pipeline_mode<synchronous>, transform_indices = @transform_7, window_bounds = array<i64: 1, 128>}, {transform_indices = @transform_8, window_bounds = array<i64: 1, 32, 128>}]} {
    %c4_i32 = arith.constant 4 : i32
    %0 = arith.muli %arg1, %c4_i32 : i32
    %1 = tpu.assume_multiple %0, 4 : i32
    %cst = arith.constant 0.000000e+00 : f32
    %2 = vector.broadcast %cst : f32 to vector<32x128xf32>
    %c0_i32 = arith.constant 0 : i32
    %3 = arith.addi %1, %c0_i32 : i32
    %c0 = arith.constant 0 : index
    %4 = arith.index_cast %3 : i32 to index
    %c0_0 = arith.constant 0 : index
    %c0_1 = arith.constant 0 : index
    %5 = vector.load %arg2[%c0, %4, %c0_0, %c0_1] : memref<1x5x9x128xbf16, #tpu.memory_space<vmem>>, vector<1x4x8x128xbf16>
    %6 = vector.shape_cast %5 : vector<1x4x8x128xbf16> to vector<4x8x128xbf16>
    %7 = vector.shape_cast %6 : vector<4x8x128xbf16> to vector<32x128xbf16>
    %c0_2 = arith.constant 0 : index
    %c0_3 = arith.constant 0 : index
    %c0_4 = arith.constant 0 : index
    %8 = vector.load %arg6[%c0_2, %c0_3, %c0_4] : memref<9x128x128xbf16, #tpu.memory_space<vmem>>, vector<1x128x128xbf16>
    %9 = vector.shape_cast %8 : vector<1x128x128xbf16> to vector<128x128xbf16>
    %cst_5 = arith.constant dense<0.000000e+00> : vector<32x128xf32>
    %10 = tpu.matmul %7, %9, %cst_5 {dimension_numbers = #tpu.dot_dimension_numbers<[1], [0], [0], [1], [0, 0, 1, 1], [], []>} : vector<32x128xbf16>, vector<128x128xbf16>, vector<32x128xf32> -> vector<32x128xf32>
    %11 = arith.addf %2, %10 : vector<32x128xf32>
    %c0_i32_6 = arith.constant 0 : i32
    %12 = arith.addi %1, %c0_i32_6 : i32
    %c0_7 = arith.constant 0 : index
    %13 = arith.index_cast %12 : i32 to index
    %c0_8 = arith.constant 0 : index
    %c0_9 = arith.constant 0 : index
    %14 = vector.load %arg3[%c0_7, %13, %c0_8, %c0_9] : memref<1x5x8x128xbf16, #tpu.memory_space<vmem>>, vector<1x4x8x128xbf16>
    %15 = vector.shape_cast %14 : vector<1x4x8x128xbf16> to vector<4x8x128xbf16>
    %16 = vector.shape_cast %15 : vector<4x8x128xbf16> to vector<32x128xbf16>
    %c1 = arith.constant 1 : index
    %c0_10 = arith.constant 0 : index
    %c0_11 = arith.constant 0 : index
    %17 = vector.load %arg6[%c1, %c0_10, %c0_11] : memref<9x128x128xbf16, #tpu.memory_space<vmem>>, vector<1x128x128xbf16>
    %18 = vector.shape_cast %17 : vector<1x128x128xbf16> to vector<128x128xbf16>
    %cst_12 = arith.constant dense<0.000000e+00> : vector<32x128xf32>
    %19 = tpu.matmul %16, %18, %cst_12 {dimension_numbers = #tpu.dot_dimension_numbers<[1], [0], [0], [1], [0, 0, 1, 1], [], []>} : vector<32x128xbf16>, vector<128x128xbf16>, vector<32x128xf32> -> vector<32x128xf32>
    %20 = arith.addf %11, %19 : vector<32x128xf32>
    %c0_i32_13 = arith.constant 0 : i32
    %21 = arith.addi %1, %c0_i32_13 : i32
    %c0_14 = arith.constant 0 : index
    %22 = arith.index_cast %21 : i32 to index
    %c1_15 = arith.constant 1 : index
    %c0_16 = arith.constant 0 : index
    %23 = vector.load %arg2[%c0_14, %22, %c1_15, %c0_16] : memref<1x5x9x128xbf16, #tpu.memory_space<vmem>>, vector<1x4x8x128xbf16>
    %24 = vector.shape_cast %23 : vector<1x4x8x128xbf16> to vector<4x8x128xbf16>
    %25 = vector.shape_cast %24 : vector<4x8x128xbf16> to vector<32x128xbf16>
    %c2 = arith.constant 2 : index
    %c0_17 = arith.constant 0 : index
    %c0_18 = arith.constant 0 : index
    %26 = vector.load %arg6[%c2, %c0_17, %c0_18] : memref<9x128x128xbf16, #tpu.memory_space<vmem>>, vector<1x128x128xbf16>
    %27 = vector.shape_cast %26 : vector<1x128x128xbf16> to vector<128x128xbf16>
    %cst_19 = arith.constant dense<0.000000e+00> : vector<32x128xf32>
    %28 = tpu.matmul %25, %27, %cst_19 {dimension_numbers = #tpu.dot_dimension_numbers<[1], [0], [0], [1], [0, 0, 1, 1], [], []>} : vector<32x128xbf16>, vector<128x128xbf16>, vector<32x128xf32> -> vector<32x128xf32>
    %29 = arith.addf %20, %28 : vector<32x128xf32>
    %c0_i32_20 = arith.constant 0 : i32
    %30 = arith.addi %1, %c0_i32_20 : i32
    %c0_21 = arith.constant 0 : index
    %31 = arith.index_cast %30 : i32 to index
    %c0_22 = arith.constant 0 : index
    %c0_23 = arith.constant 0 : index
    %32 = vector.load %arg4[%c0_21, %31, %c0_22, %c0_23] : memref<1x4x9x128xbf16, #tpu.memory_space<vmem>>, vector<1x4x8x128xbf16>
    %33 = vector.shape_cast %32 : vector<1x4x8x128xbf16> to vector<4x8x128xbf16>
    %34 = vector.shape_cast %33 : vector<4x8x128xbf16> to vector<32x128xbf16>
    %c3 = arith.constant 3 : index
    %c0_24 = arith.constant 0 : index
    %c0_25 = arith.constant 0 : index
    %35 = vector.load %arg6[%c3, %c0_24, %c0_25] : memref<9x128x128xbf16, #tpu.memory_space<vmem>>, vector<1x128x128xbf16>
    %36 = vector.shape_cast %35 : vector<1x128x128xbf16> to vector<128x128xbf16>
    %cst_26 = arith.constant dense<0.000000e+00> : vector<32x128xf32>
    %37 = tpu.matmul %34, %36, %cst_26 {dimension_numbers = #tpu.dot_dimension_numbers<[1], [0], [0], [1], [0, 0, 1, 1], [], []>} : vector<32x128xbf16>, vector<128x128xbf16>, vector<32x128xf32> -> vector<32x128xf32>
    %38 = arith.addf %29, %37 : vector<32x128xf32>
    %c0_i32_27 = arith.constant 0 : i32
    %39 = arith.addi %1, %c0_i32_27 : i32
    %c0_28 = arith.constant 0 : index
    %40 = arith.index_cast %39 : i32 to index
    %c0_29 = arith.constant 0 : index
    %c0_30 = arith.constant 0 : index
    %41 = vector.load %arg5[%c0_28, %40, %c0_29, %c0_30] : memref<1x4x8x128xbf16, #tpu.memory_space<vmem>>, vector<1x4x8x128xbf16>
    %42 = vector.shape_cast %41 : vector<1x4x8x128xbf16> to vector<4x8x128xbf16>
    %43 = vector.shape_cast %42 : vector<4x8x128xbf16> to vector<32x128xbf16>
    %c4 = arith.constant 4 : index
    %c0_31 = arith.constant 0 : index
    %c0_32 = arith.constant 0 : index
    %44 = vector.load %arg6[%c4, %c0_31, %c0_32] : memref<9x128x128xbf16, #tpu.memory_space<vmem>>, vector<1x128x128xbf16>
    %45 = vector.shape_cast %44 : vector<1x128x128xbf16> to vector<128x128xbf16>
    %cst_33 = arith.constant dense<0.000000e+00> : vector<32x128xf32>
    %46 = tpu.matmul %43, %45, %cst_33 {dimension_numbers = #tpu.dot_dimension_numbers<[1], [0], [0], [1], [0, 0, 1, 1], [], []>} : vector<32x128xbf16>, vector<128x128xbf16>, vector<32x128xf32> -> vector<32x128xf32>
    %47 = arith.addf %38, %46 : vector<32x128xf32>
    %c0_i32_34 = arith.constant 0 : i32
    %48 = arith.addi %1, %c0_i32_34 : i32
    %c0_35 = arith.constant 0 : index
    %49 = arith.index_cast %48 : i32 to index
    %c1_36 = arith.constant 1 : index
    %c0_37 = arith.constant 0 : index
    %50 = vector.load %arg4[%c0_35, %49, %c1_36, %c0_37] : memref<1x4x9x128xbf16, #tpu.memory_space<vmem>>, vector<1x4x8x128xbf16>
    %51 = vector.shape_cast %50 : vector<1x4x8x128xbf16> to vector<4x8x128xbf16>
    %52 = vector.shape_cast %51 : vector<4x8x128xbf16> to vector<32x128xbf16>
    %c5 = arith.constant 5 : index
    %c0_38 = arith.constant 0 : index
    %c0_39 = arith.constant 0 : index
    %53 = vector.load %arg6[%c5, %c0_38, %c0_39] : memref<9x128x128xbf16, #tpu.memory_space<vmem>>, vector<1x128x128xbf16>
    %54 = vector.shape_cast %53 : vector<1x128x128xbf16> to vector<128x128xbf16>
    %cst_40 = arith.constant dense<0.000000e+00> : vector<32x128xf32>
    %55 = tpu.matmul %52, %54, %cst_40 {dimension_numbers = #tpu.dot_dimension_numbers<[1], [0], [0], [1], [0, 0, 1, 1], [], []>} : vector<32x128xbf16>, vector<128x128xbf16>, vector<32x128xf32> -> vector<32x128xf32>
    %56 = arith.addf %47, %55 : vector<32x128xf32>
    %c1_i32 = arith.constant 1 : i32
    %57 = arith.addi %1, %c1_i32 : i32
    %c0_41 = arith.constant 0 : index
    %58 = arith.index_cast %57 : i32 to index
    %c0_42 = arith.constant 0 : index
    %c0_43 = arith.constant 0 : index
    %59 = vector.load %arg2[%c0_41, %58, %c0_42, %c0_43] : memref<1x5x9x128xbf16, #tpu.memory_space<vmem>>, vector<1x4x8x128xbf16>
    %60 = vector.shape_cast %59 : vector<1x4x8x128xbf16> to vector<4x8x128xbf16>
    %61 = vector.shape_cast %60 : vector<4x8x128xbf16> to vector<32x128xbf16>
    %c6 = arith.constant 6 : index
    %c0_44 = arith.constant 0 : index
    %c0_45 = arith.constant 0 : index
    %62 = vector.load %arg6[%c6, %c0_44, %c0_45] : memref<9x128x128xbf16, #tpu.memory_space<vmem>>, vector<1x128x128xbf16>
    %63 = vector.shape_cast %62 : vector<1x128x128xbf16> to vector<128x128xbf16>
    %cst_46 = arith.constant dense<0.000000e+00> : vector<32x128xf32>
    %64 = tpu.matmul %61, %63, %cst_46 {dimension_numbers = #tpu.dot_dimension_numbers<[1], [0], [0], [1], [0, 0, 1, 1], [], []>} : vector<32x128xbf16>, vector<128x128xbf16>, vector<32x128xf32> -> vector<32x128xf32>
    %65 = arith.addf %56, %64 : vector<32x128xf32>
    %c1_i32_47 = arith.constant 1 : i32
    %66 = arith.addi %1, %c1_i32_47 : i32
    %c0_48 = arith.constant 0 : index
    %67 = arith.index_cast %66 : i32 to index
    %c0_49 = arith.constant 0 : index
    %c0_50 = arith.constant 0 : index
    %68 = vector.load %arg3[%c0_48, %67, %c0_49, %c0_50] : memref<1x5x8x128xbf16, #tpu.memory_space<vmem>>, vector<1x4x8x128xbf16>
    %69 = vector.shape_cast %68 : vector<1x4x8x128xbf16> to vector<4x8x128xbf16>
    %70 = vector.shape_cast %69 : vector<4x8x128xbf16> to vector<32x128xbf16>
    %c7 = arith.constant 7 : index
    %c0_51 = arith.constant 0 : index
    %c0_52 = arith.constant 0 : index
    %71 = vector.load %arg6[%c7, %c0_51, %c0_52] : memref<9x128x128xbf16, #tpu.memory_space<vmem>>, vector<1x128x128xbf16>
    %72 = vector.shape_cast %71 : vector<1x128x128xbf16> to vector<128x128xbf16>
    %cst_53 = arith.constant dense<0.000000e+00> : vector<32x128xf32>
    %73 = tpu.matmul %70, %72, %cst_53 {dimension_numbers = #tpu.dot_dimension_numbers<[1], [0], [0], [1], [0, 0, 1, 1], [], []>} : vector<32x128xbf16>, vector<128x128xbf16>, vector<32x128xf32> -> vector<32x128xf32>
    %74 = arith.addf %65, %73 : vector<32x128xf32>
    %c1_i32_54 = arith.constant 1 : i32
    %75 = arith.addi %1, %c1_i32_54 : i32
    %c0_55 = arith.constant 0 : index
    %76 = arith.index_cast %75 : i32 to index
    %c1_56 = arith.constant 1 : index
    %c0_57 = arith.constant 0 : index
    %77 = vector.load %arg2[%c0_55, %76, %c1_56, %c0_57] : memref<1x5x9x128xbf16, #tpu.memory_space<vmem>>, vector<1x4x8x128xbf16>
    %78 = vector.shape_cast %77 : vector<1x4x8x128xbf16> to vector<4x8x128xbf16>
    %79 = vector.shape_cast %78 : vector<4x8x128xbf16> to vector<32x128xbf16>
    %c8 = arith.constant 8 : index
    %c0_58 = arith.constant 0 : index
    %c0_59 = arith.constant 0 : index
    %80 = vector.load %arg6[%c8, %c0_58, %c0_59] : memref<9x128x128xbf16, #tpu.memory_space<vmem>>, vector<1x128x128xbf16>
    %81 = vector.shape_cast %80 : vector<1x128x128xbf16> to vector<128x128xbf16>
    %cst_60 = arith.constant dense<0.000000e+00> : vector<32x128xf32>
    %82 = tpu.matmul %79, %81, %cst_60 {dimension_numbers = #tpu.dot_dimension_numbers<[1], [0], [0], [1], [0, 0, 1, 1], [], []>} : vector<32x128xbf16>, vector<128x128xbf16>, vector<32x128xf32> -> vector<32x128xf32>
    %83 = arith.addf %74, %82 : vector<32x128xf32>
    %c0_61 = arith.constant 0 : index
    %c0_62 = arith.constant 0 : index
    %84 = vector.load %arg7[%c0_61, %c0_62] : memref<1x128xf32, #tpu.memory_space<vmem>>, vector<1x128xf32>
    %85 = vector.broadcast %84 : vector<1x128xf32> to vector<32x128xf32>
    %86 = arith.addf %83, %85 : vector<32x128xf32>
    %cst_63 = arith.constant 0.000000e+00 : f32
    %87 = vector.broadcast %cst_63 : f32 to vector<32x128xf32>
    %88 = arith.cmpf oge, %86, %87 : vector<32x128xf32>
    %cst_64 = arith.constant 2.000000e-01 : f32
    %89 = vector.broadcast %cst_64 : f32 to vector<32x128xf32>
    %90 = arith.mulf %89, %86 : vector<32x128xf32>
    %91 = arith.select %88, %86, %90 : vector<32x128xi1>, vector<32x128xf32>
    %c0_65 = arith.constant 0 : index
    %c0_66 = arith.constant 0 : index
    %92 = vector.load %arg8[%c0_65, %c0_66] : memref<1x128xf32, #tpu.memory_space<vmem>>, vector<1x128xf32>
    %93 = vector.broadcast %92 : vector<1x128xf32> to vector<32x128xf32>
    %94 = arith.mulf %91, %93 : vector<32x128xf32>
    %c0_67 = arith.constant 0 : index
    %c0_68 = arith.constant 0 : index
    %95 = vector.load %arg9[%c0_67, %c0_68] : memref<1x128xf32, #tpu.memory_space<vmem>>, vector<1x128xf32>
    %96 = vector.broadcast %95 : vector<1x128xf32> to vector<32x128xf32>
    %97 = arith.addf %94, %96 : vector<32x128xf32>
    %c0_69 = arith.constant 0 : index
    %c0_70 = arith.constant 0 : index
    %c0_71 = arith.constant 0 : index
    %98 = vector.load %arg10[%c0_69, %c0_70, %c0_71] : memref<1x32x128xf32, #tpu.memory_space<vmem>>, vector<1x32x128xf32>
    %99 = vector.shape_cast %98 : vector<1x32x128xf32> to vector<32x128xf32>
    %100 = vector.shape_cast %97 : vector<32x128xf32> to vector<1x32x128xf32>
    tpu.vector_store %arg10[%c0_69, %c0_70, %c0_71], %100 {strides = array<i32>} : memref<1x32x128xf32, #tpu.memory_space<vmem>>, vector<1x32x128xf32>,
    return
  }
  func.func @transform_0(%arg0: i32, %arg1: i32) -> (i32, i32, i32, i32) {
    %c0_i32 = arith.constant 0 : i32
    %c0_i32_0 = arith.constant 0 : i32
    %c0_i32_1 = arith.constant 0 : i32
    %c0_i32_2 = arith.constant 0 : i32
    return %arg0, %c0_i32, %c0_i32_0, %c0_i32_1 : i32, i32, i32, i32
  }
  func.func @transform_1(%arg0: i32, %arg1: i32) -> (i32, i32, i32, i32) {
    %c0_i32 = arith.constant 0 : i32
    %c0_i32_0 = arith.constant 0 : i32
    %c0_i32_1 = arith.constant 0 : i32
    %c0_i32_2 = arith.constant 0 : i32
    return %arg0, %c0_i32, %c0_i32_0, %c0_i32_1 : i32, i32, i32, i32
  }
  func.func @transform_2(%arg0: i32, %arg1: i32) -> (i32, i32, i32, i32) {
    %c0_i32 = arith.constant 0 : i32
    %c0_i32_0 = arith.constant 0 : i32
    %c0_i32_1 = arith.constant 0 : i32
    %c0_i32_2 = arith.constant 0 : i32
    return %arg0, %c0_i32, %c0_i32_0, %c0_i32_1 : i32, i32, i32, i32
  }
  func.func @transform_3(%arg0: i32, %arg1: i32) -> (i32, i32, i32, i32) {
    %c0_i32 = arith.constant 0 : i32
    %c0_i32_0 = arith.constant 0 : i32
    %c0_i32_1 = arith.constant 0 : i32
    %c0_i32_2 = arith.constant 0 : i32
    return %arg0, %c0_i32, %c0_i32_0, %c0_i32_1 : i32, i32, i32, i32
  }
  func.func @transform_4(%arg0: i32, %arg1: i32) -> (i32, i32, i32) {
    %c0_i32 = arith.constant 0 : i32
    %c0_i32_0 = arith.constant 0 : i32
    %c0_i32_1 = arith.constant 0 : i32
    %c0_i32_2 = arith.constant 0 : i32
    return %c0_i32, %c0_i32_0, %c0_i32_1 : i32, i32, i32
  }
  func.func @transform_5(%arg0: i32, %arg1: i32) -> (i32, i32) {
    %c0_i32 = arith.constant 0 : i32
    %c0_i32_0 = arith.constant 0 : i32
    %c0_i32_1 = arith.constant 0 : i32
    return %c0_i32, %c0_i32_0 : i32, i32
  }
  func.func @transform_6(%arg0: i32, %arg1: i32) -> (i32, i32) {
    %c0_i32 = arith.constant 0 : i32
    %c0_i32_0 = arith.constant 0 : i32
    %c0_i32_1 = arith.constant 0 : i32
    return %c0_i32, %c0_i32_0 : i32, i32
  }
  func.func @transform_7(%arg0: i32, %arg1: i32) -> (i32, i32) {
    %c0_i32 = arith.constant 0 : i32
    %c0_i32_0 = arith.constant 0 : i32
    %c0_i32_1 = arith.constant 0 : i32
    return %c0_i32, %c0_i32_0 : i32, i32
  }
  func.func @transform_8(%arg0: i32, %arg1: i32) -> (i32, i32, i32) {
    %c0_i32 = arith.constant 0 : i32
    %c0_i32_0 = arith.constant 0 : i32
    return %arg0, %arg1, %c0_i32 : i32, i32, i32
  }
}

module attributes {stable_mosaic.version = 11 : i64} {
  func.func @_conv_block_kernel(%arg0: i32, %arg1: i32, %arg2: memref<1x3x9x128xbf16, #tpu.memory_space<vmem>>, %arg3: memref<1x3x8x128xbf16, #tpu.memory_space<vmem>>, %arg4: memref<1x2x9x128xbf16, #tpu.memory_space<vmem>>, %arg5: memref<1x2x8x128xbf16, #tpu.memory_space<vmem>>, %arg6: memref<9x128x128xbf16, #tpu.memory_space<vmem>>, %arg7: memref<1x128xf32, #tpu.memory_space<vmem>>, %arg8: memref<1x128xf32, #tpu.memory_space<vmem>>, %arg9: memref<1x128xf32, #tpu.memory_space<vmem>>, %arg10: memref<1x16x128xf32, #tpu.memory_space<vmem>>) attributes {dimension_semantics = [#tpu.dimension_semantics<parallel>, #tpu.dimension_semantics<parallel>], iteration_bounds = array<i64: 2, 1>, scalar_prefetch = 0 : i64, scratch_operands = 0 : i64, tpu.core_type = #tpu.core_type<tc>, window_params = [{transform_indices = @transform_0, window_bounds = array<i64: 1, 3, 9, 128>}, {transform_indices = @transform_1, window_bounds = array<i64: 1, 3, 8, 128>}, {transform_indices = @transform_2, window_bounds = array<i64: 1, 2, 9, 128>}, {transform_indices = @transform_3, window_bounds = array<i64: 1, 2, 8, 128>}, {pipeline_mode = #tpu.pipeline_mode<synchronous>, transform_indices = @transform_4, window_bounds = array<i64: 9, 128, 128>}, {pipeline_mode = #tpu.pipeline_mode<synchronous>, transform_indices = @transform_5, window_bounds = array<i64: 1, 128>}, {pipeline_mode = #tpu.pipeline_mode<synchronous>, transform_indices = @transform_6, window_bounds = array<i64: 1, 128>}, {pipeline_mode = #tpu.pipeline_mode<synchronous>, transform_indices = @transform_7, window_bounds = array<i64: 1, 128>}, {transform_indices = @transform_8, window_bounds = array<i64: 1, 16, 128>}]} {
    %c2_i32 = arith.constant 2 : i32
    %0 = arith.muli %arg1, %c2_i32 : i32
    %1 = tpu.assume_multiple %0, 2 : i32
    %cst = arith.constant 0.000000e+00 : f32
    %2 = vector.broadcast %cst : f32 to vector<16x128xf32>
    %c0_i32 = arith.constant 0 : i32
    %3 = arith.addi %1, %c0_i32 : i32
    %c0 = arith.constant 0 : index
    %4 = arith.index_cast %3 : i32 to index
    %c0_0 = arith.constant 0 : index
    %c0_1 = arith.constant 0 : index
    %5 = vector.load %arg2[%c0, %4, %c0_0, %c0_1] : memref<1x3x9x128xbf16, #tpu.memory_space<vmem>>, vector<1x2x8x128xbf16>
    %6 = vector.shape_cast %5 : vector<1x2x8x128xbf16> to vector<2x8x128xbf16>
    %7 = vector.shape_cast %6 : vector<2x8x128xbf16> to vector<16x128xbf16>
    %c0_2 = arith.constant 0 : index
    %c0_3 = arith.constant 0 : index
    %c0_4 = arith.constant 0 : index
    %8 = vector.load %arg6[%c0_2, %c0_3, %c0_4] : memref<9x128x128xbf16, #tpu.memory_space<vmem>>, vector<1x128x128xbf16>
    %9 = vector.shape_cast %8 : vector<1x128x128xbf16> to vector<128x128xbf16>
    %cst_5 = arith.constant dense<0.000000e+00> : vector<16x128xf32>
    %10 = tpu.matmul %7, %9, %cst_5 {dimension_numbers = #tpu.dot_dimension_numbers<[1], [0], [0], [1], [0, 0, 1, 1], [], []>} : vector<16x128xbf16>, vector<128x128xbf16>, vector<16x128xf32> -> vector<16x128xf32>
    %11 = arith.addf %2, %10 : vector<16x128xf32>
    %c0_i32_6 = arith.constant 0 : i32
    %12 = arith.addi %1, %c0_i32_6 : i32
    %c0_7 = arith.constant 0 : index
    %13 = arith.index_cast %12 : i32 to index
    %c0_8 = arith.constant 0 : index
    %c0_9 = arith.constant 0 : index
    %14 = vector.load %arg3[%c0_7, %13, %c0_8, %c0_9] : memref<1x3x8x128xbf16, #tpu.memory_space<vmem>>, vector<1x2x8x128xbf16>
    %15 = vector.shape_cast %14 : vector<1x2x8x128xbf16> to vector<2x8x128xbf16>
    %16 = vector.shape_cast %15 : vector<2x8x128xbf16> to vector<16x128xbf16>
    %c1 = arith.constant 1 : index
    %c0_10 = arith.constant 0 : index
    %c0_11 = arith.constant 0 : index
    %17 = vector.load %arg6[%c1, %c0_10, %c0_11] : memref<9x128x128xbf16, #tpu.memory_space<vmem>>, vector<1x128x128xbf16>
    %18 = vector.shape_cast %17 : vector<1x128x128xbf16> to vector<128x128xbf16>
    %cst_12 = arith.constant dense<0.000000e+00> : vector<16x128xf32>
    %19 = tpu.matmul %16, %18, %cst_12 {dimension_numbers = #tpu.dot_dimension_numbers<[1], [0], [0], [1], [0, 0, 1, 1], [], []>} : vector<16x128xbf16>, vector<128x128xbf16>, vector<16x128xf32> -> vector<16x128xf32>
    %20 = arith.addf %11, %19 : vector<16x128xf32>
    %c0_i32_13 = arith.constant 0 : i32
    %21 = arith.addi %1, %c0_i32_13 : i32
    %c0_14 = arith.constant 0 : index
    %22 = arith.index_cast %21 : i32 to index
    %c1_15 = arith.constant 1 : index
    %c0_16 = arith.constant 0 : index
    %23 = vector.load %arg2[%c0_14, %22, %c1_15, %c0_16] : memref<1x3x9x128xbf16, #tpu.memory_space<vmem>>, vector<1x2x8x128xbf16>
    %24 = vector.shape_cast %23 : vector<1x2x8x128xbf16> to vector<2x8x128xbf16>
    %25 = vector.shape_cast %24 : vector<2x8x128xbf16> to vector<16x128xbf16>
    %c2 = arith.constant 2 : index
    %c0_17 = arith.constant 0 : index
    %c0_18 = arith.constant 0 : index
    %26 = vector.load %arg6[%c2, %c0_17, %c0_18] : memref<9x128x128xbf16, #tpu.memory_space<vmem>>, vector<1x128x128xbf16>
    %27 = vector.shape_cast %26 : vector<1x128x128xbf16> to vector<128x128xbf16>
    %cst_19 = arith.constant dense<0.000000e+00> : vector<16x128xf32>
    %28 = tpu.matmul %25, %27, %cst_19 {dimension_numbers = #tpu.dot_dimension_numbers<[1], [0], [0], [1], [0, 0, 1, 1], [], []>} : vector<16x128xbf16>, vector<128x128xbf16>, vector<16x128xf32> -> vector<16x128xf32>
    %29 = arith.addf %20, %28 : vector<16x128xf32>
    %c0_i32_20 = arith.constant 0 : i32
    %30 = arith.addi %1, %c0_i32_20 : i32
    %c0_21 = arith.constant 0 : index
    %31 = arith.index_cast %30 : i32 to index
    %c0_22 = arith.constant 0 : index
    %c0_23 = arith.constant 0 : index
    %32 = vector.load %arg4[%c0_21, %31, %c0_22, %c0_23] : memref<1x2x9x128xbf16, #tpu.memory_space<vmem>>, vector<1x2x8x128xbf16>
    %33 = vector.shape_cast %32 : vector<1x2x8x128xbf16> to vector<2x8x128xbf16>
    %34 = vector.shape_cast %33 : vector<2x8x128xbf16> to vector<16x128xbf16>
    %c3 = arith.constant 3 : index
    %c0_24 = arith.constant 0 : index
    %c0_25 = arith.constant 0 : index
    %35 = vector.load %arg6[%c3, %c0_24, %c0_25] : memref<9x128x128xbf16, #tpu.memory_space<vmem>>, vector<1x128x128xbf16>
    %36 = vector.shape_cast %35 : vector<1x128x128xbf16> to vector<128x128xbf16>
    %cst_26 = arith.constant dense<0.000000e+00> : vector<16x128xf32>
    %37 = tpu.matmul %34, %36, %cst_26 {dimension_numbers = #tpu.dot_dimension_numbers<[1], [0], [0], [1], [0, 0, 1, 1], [], []>} : vector<16x128xbf16>, vector<128x128xbf16>, vector<16x128xf32> -> vector<16x128xf32>
    %38 = arith.addf %29, %37 : vector<16x128xf32>
    %c0_i32_27 = arith.constant 0 : i32
    %39 = arith.addi %1, %c0_i32_27 : i32
    %c0_28 = arith.constant 0 : index
    %40 = arith.index_cast %39 : i32 to index
    %c0_29 = arith.constant 0 : index
    %c0_30 = arith.constant 0 : index
    %41 = vector.load %arg5[%c0_28, %40, %c0_29, %c0_30] : memref<1x2x8x128xbf16, #tpu.memory_space<vmem>>, vector<1x2x8x128xbf16>
    %42 = vector.shape_cast %41 : vector<1x2x8x128xbf16> to vector<2x8x128xbf16>
    %43 = vector.shape_cast %42 : vector<2x8x128xbf16> to vector<16x128xbf16>
    %c4 = arith.constant 4 : index
    %c0_31 = arith.constant 0 : index
    %c0_32 = arith.constant 0 : index
    %44 = vector.load %arg6[%c4, %c0_31, %c0_32] : memref<9x128x128xbf16, #tpu.memory_space<vmem>>, vector<1x128x128xbf16>
    %45 = vector.shape_cast %44 : vector<1x128x128xbf16> to vector<128x128xbf16>
    %cst_33 = arith.constant dense<0.000000e+00> : vector<16x128xf32>
    %46 = tpu.matmul %43, %45, %cst_33 {dimension_numbers = #tpu.dot_dimension_numbers<[1], [0], [0], [1], [0, 0, 1, 1], [], []>} : vector<16x128xbf16>, vector<128x128xbf16>, vector<16x128xf32> -> vector<16x128xf32>
    %47 = arith.addf %38, %46 : vector<16x128xf32>
    %c0_i32_34 = arith.constant 0 : i32
    %48 = arith.addi %1, %c0_i32_34 : i32
    %c0_35 = arith.constant 0 : index
    %49 = arith.index_cast %48 : i32 to index
    %c1_36 = arith.constant 1 : index
    %c0_37 = arith.constant 0 : index
    %50 = vector.load %arg4[%c0_35, %49, %c1_36, %c0_37] : memref<1x2x9x128xbf16, #tpu.memory_space<vmem>>, vector<1x2x8x128xbf16>
    %51 = vector.shape_cast %50 : vector<1x2x8x128xbf16> to vector<2x8x128xbf16>
    %52 = vector.shape_cast %51 : vector<2x8x128xbf16> to vector<16x128xbf16>
    %c5 = arith.constant 5 : index
    %c0_38 = arith.constant 0 : index
    %c0_39 = arith.constant 0 : index
    %53 = vector.load %arg6[%c5, %c0_38, %c0_39] : memref<9x128x128xbf16, #tpu.memory_space<vmem>>, vector<1x128x128xbf16>
    %54 = vector.shape_cast %53 : vector<1x128x128xbf16> to vector<128x128xbf16>
    %cst_40 = arith.constant dense<0.000000e+00> : vector<16x128xf32>
    %55 = tpu.matmul %52, %54, %cst_40 {dimension_numbers = #tpu.dot_dimension_numbers<[1], [0], [0], [1], [0, 0, 1, 1], [], []>} : vector<16x128xbf16>, vector<128x128xbf16>, vector<16x128xf32> -> vector<16x128xf32>
    %56 = arith.addf %47, %55 : vector<16x128xf32>
    %c1_i32 = arith.constant 1 : i32
    %57 = arith.addi %1, %c1_i32 : i32
    %c0_41 = arith.constant 0 : index
    %58 = arith.index_cast %57 : i32 to index
    %c0_42 = arith.constant 0 : index
    %c0_43 = arith.constant 0 : index
    %59 = vector.load %arg2[%c0_41, %58, %c0_42, %c0_43] : memref<1x3x9x128xbf16, #tpu.memory_space<vmem>>, vector<1x2x8x128xbf16>
    %60 = vector.shape_cast %59 : vector<1x2x8x128xbf16> to vector<2x8x128xbf16>
    %61 = vector.shape_cast %60 : vector<2x8x128xbf16> to vector<16x128xbf16>
    %c6 = arith.constant 6 : index
    %c0_44 = arith.constant 0 : index
    %c0_45 = arith.constant 0 : index
    %62 = vector.load %arg6[%c6, %c0_44, %c0_45] : memref<9x128x128xbf16, #tpu.memory_space<vmem>>, vector<1x128x128xbf16>
    %63 = vector.shape_cast %62 : vector<1x128x128xbf16> to vector<128x128xbf16>
    %cst_46 = arith.constant dense<0.000000e+00> : vector<16x128xf32>
    %64 = tpu.matmul %61, %63, %cst_46 {dimension_numbers = #tpu.dot_dimension_numbers<[1], [0], [0], [1], [0, 0, 1, 1], [], []>} : vector<16x128xbf16>, vector<128x128xbf16>, vector<16x128xf32> -> vector<16x128xf32>
    %65 = arith.addf %56, %64 : vector<16x128xf32>
    %c1_i32_47 = arith.constant 1 : i32
    %66 = arith.addi %1, %c1_i32_47 : i32
    %c0_48 = arith.constant 0 : index
    %67 = arith.index_cast %66 : i32 to index
    %c0_49 = arith.constant 0 : index
    %c0_50 = arith.constant 0 : index
    %68 = vector.load %arg3[%c0_48, %67, %c0_49, %c0_50] : memref<1x3x8x128xbf16, #tpu.memory_space<vmem>>, vector<1x2x8x128xbf16>
    %69 = vector.shape_cast %68 : vector<1x2x8x128xbf16> to vector<2x8x128xbf16>
    %70 = vector.shape_cast %69 : vector<2x8x128xbf16> to vector<16x128xbf16>
    %c7 = arith.constant 7 : index
    %c0_51 = arith.constant 0 : index
    %c0_52 = arith.constant 0 : index
    %71 = vector.load %arg6[%c7, %c0_51, %c0_52] : memref<9x128x128xbf16, #tpu.memory_space<vmem>>, vector<1x128x128xbf16>
    %72 = vector.shape_cast %71 : vector<1x128x128xbf16> to vector<128x128xbf16>
    %cst_53 = arith.constant dense<0.000000e+00> : vector<16x128xf32>
    %73 = tpu.matmul %70, %72, %cst_53 {dimension_numbers = #tpu.dot_dimension_numbers<[1], [0], [0], [1], [0, 0, 1, 1], [], []>} : vector<16x128xbf16>, vector<128x128xbf16>, vector<16x128xf32> -> vector<16x128xf32>
    %74 = arith.addf %65, %73 : vector<16x128xf32>
    %c1_i32_54 = arith.constant 1 : i32
    %75 = arith.addi %1, %c1_i32_54 : i32
    %c0_55 = arith.constant 0 : index
    %76 = arith.index_cast %75 : i32 to index
    %c1_56 = arith.constant 1 : index
    %c0_57 = arith.constant 0 : index
    %77 = vector.load %arg2[%c0_55, %76, %c1_56, %c0_57] : memref<1x3x9x128xbf16, #tpu.memory_space<vmem>>, vector<1x2x8x128xbf16>
    %78 = vector.shape_cast %77 : vector<1x2x8x128xbf16> to vector<2x8x128xbf16>
    %79 = vector.shape_cast %78 : vector<2x8x128xbf16> to vector<16x128xbf16>
    %c8 = arith.constant 8 : index
    %c0_58 = arith.constant 0 : index
    %c0_59 = arith.constant 0 : index
    %80 = vector.load %arg6[%c8, %c0_58, %c0_59] : memref<9x128x128xbf16, #tpu.memory_space<vmem>>, vector<1x128x128xbf16>
    %81 = vector.shape_cast %80 : vector<1x128x128xbf16> to vector<128x128xbf16>
    %cst_60 = arith.constant dense<0.000000e+00> : vector<16x128xf32>
    %82 = tpu.matmul %79, %81, %cst_60 {dimension_numbers = #tpu.dot_dimension_numbers<[1], [0], [0], [1], [0, 0, 1, 1], [], []>} : vector<16x128xbf16>, vector<128x128xbf16>, vector<16x128xf32> -> vector<16x128xf32>
    %83 = arith.addf %74, %82 : vector<16x128xf32>
    %c0_61 = arith.constant 0 : index
    %c0_62 = arith.constant 0 : index
    %84 = vector.load %arg7[%c0_61, %c0_62] : memref<1x128xf32, #tpu.memory_space<vmem>>, vector<1x128xf32>
    %85 = vector.broadcast %84 : vector<1x128xf32> to vector<16x128xf32>
    %86 = arith.addf %83, %85 : vector<16x128xf32>
    %cst_63 = arith.constant 0.000000e+00 : f32
    %87 = vector.broadcast %cst_63 : f32 to vector<16x128xf32>
    %88 = arith.cmpf oge, %86, %87 : vector<16x128xf32>
    %cst_64 = arith.constant 2.000000e-01 : f32
    %89 = vector.broadcast %cst_64 : f32 to vector<16x128xf32>
    %90 = arith.mulf %89, %86 : vector<16x128xf32>
    %91 = arith.select %88, %86, %90 : vector<16x128xi1>, vector<16x128xf32>
    %c0_65 = arith.constant 0 : index
    %c0_66 = arith.constant 0 : index
    %92 = vector.load %arg8[%c0_65, %c0_66] : memref<1x128xf32, #tpu.memory_space<vmem>>, vector<1x128xf32>
    %93 = vector.broadcast %92 : vector<1x128xf32> to vector<16x128xf32>
    %94 = arith.mulf %91, %93 : vector<16x128xf32>
    %c0_67 = arith.constant 0 : index
    %c0_68 = arith.constant 0 : index
    %95 = vector.load %arg9[%c0_67, %c0_68] : memref<1x128xf32, #tpu.memory_space<vmem>>, vector<1x128xf32>
    %96 = vector.broadcast %95 : vector<1x128xf32> to vector<16x128xf32>
    %97 = arith.addf %94, %96 : vector<16x128xf32>
    %c0_69 = arith.constant 0 : index
    %c0_70 = arith.constant 0 : index
    %c0_71 = arith.constant 0 : index
    %98 = vector.load %arg10[%c0_69, %c0_70, %c0_71] : memref<1x16x128xf32, #tpu.memory_space<vmem>>, vector<1x16x128xf32>
    %99 = vector.shape_cast %98 : vector<1x16x128xf32> to vector<16x128xf32>
    %100 = vector.shape_cast %97 : vector<16x128xf32> to vector<1x16x128xf32>
    tpu.vector_store %arg10[%c0_69, %c0_70, %c0_71], %100 {strides = array<i32>} : memref<1x16x128xf32, #tpu.memory_space<vmem>>, vector<1x16x128xf32>,
    return
  }
  func.func @transform_0(%arg0: i32, %arg1: i32) -> (i32, i32, i32, i32) {
    %c0_i32 = arith.constant 0 : i32
    %c0_i32_0 = arith.constant 0 : i32
    %c0_i32_1 = arith.constant 0 : i32
    %c0_i32_2 = arith.constant 0 : i32
    return %arg0, %c0_i32, %c0_i32_0, %c0_i32_1 : i32, i32, i32, i32
  }
  func.func @transform_1(%arg0: i32, %arg1: i32) -> (i32, i32, i32, i32) {
    %c0_i32 = arith.constant 0 : i32
    %c0_i32_0 = arith.constant 0 : i32
    %c0_i32_1 = arith.constant 0 : i32
    %c0_i32_2 = arith.constant 0 : i32
    return %arg0, %c0_i32, %c0_i32_0, %c0_i32_1 : i32, i32, i32, i32
  }
  func.func @transform_2(%arg0: i32, %arg1: i32) -> (i32, i32, i32, i32) {
    %c0_i32 = arith.constant 0 : i32
    %c0_i32_0 = arith.constant 0 : i32
    %c0_i32_1 = arith.constant 0 : i32
    %c0_i32_2 = arith.constant 0 : i32
    return %arg0, %c0_i32, %c0_i32_0, %c0_i32_1 : i32, i32, i32, i32
  }
  func.func @transform_3(%arg0: i32, %arg1: i32) -> (i32, i32, i32, i32) {
    %c0_i32 = arith.constant 0 : i32
    %c0_i32_0 = arith.constant 0 : i32
    %c0_i32_1 = arith.constant 0 : i32
    %c0_i32_2 = arith.constant 0 : i32
    return %arg0, %c0_i32, %c0_i32_0, %c0_i32_1 : i32, i32, i32, i32
  }
  func.func @transform_4(%arg0: i32, %arg1: i32) -> (i32, i32, i32) {
    %c0_i32 = arith.constant 0 : i32
    %c0_i32_0 = arith.constant 0 : i32
    %c0_i32_1 = arith.constant 0 : i32
    %c0_i32_2 = arith.constant 0 : i32
    return %c0_i32, %c0_i32_0, %c0_i32_1 : i32, i32, i32
  }
  func.func @transform_5(%arg0: i32, %arg1: i32) -> (i32, i32) {
    %c0_i32 = arith.constant 0 : i32
    %c0_i32_0 = arith.constant 0 : i32
    %c0_i32_1 = arith.constant 0 : i32
    return %c0_i32, %c0_i32_0 : i32, i32
  }
  func.func @transform_6(%arg0: i32, %arg1: i32) -> (i32, i32) {
    %c0_i32 = arith.constant 0 : i32
    %c0_i32_0 = arith.constant 0 : i32
    %c0_i32_1 = arith.constant 0 : i32
    return %c0_i32, %c0_i32_0 : i32, i32
  }
  func.func @transform_7(%arg0: i32, %arg1: i32) -> (i32, i32) {
    %c0_i32 = arith.constant 0 : i32
    %c0_i32_0 = arith.constant 0 : i32
    %c0_i32_1 = arith.constant 0 : i32
    return %c0_i32, %c0_i32_0 : i32, i32
  }
  func.func @transform_8(%arg0: i32, %arg1: i32) -> (i32, i32, i32) {
    %c0_i32 = arith.constant 0 : i32
    %c0_i32_0 = arith.constant 0 : i32
    return %arg0, %arg1, %c0_i32 : i32, i32, i32
  }
}

module attributes {stable_mosaic.version = 11 : i64} {
  func.func @_adv_head_kernel(%arg0: i32, %arg1: memref<2x4x128xf32, #tpu.memory_space<vmem>>, %arg2: memref<1x4x128xf32, #tpu.memory_space<vmem>>, %arg3: memref<1x1xf32, #tpu.memory_space<vmem>>, %arg4: memref<2x1xf32, #tpu.memory_space<vmem>>) attributes {dimension_semantics = [#tpu.dimension_semantics<arbitrary>], iteration_bounds = array<i64: 1>, scalar_prefetch = 0 : i64, scratch_operands = 0 : i64, tpu.core_type = #tpu.core_type<tc>, window_params = [{pipeline_mode = #tpu.pipeline_mode<synchronous>, transform_indices = @transform_0, window_bounds = array<i64: 2, 4, 128>}, {pipeline_mode = #tpu.pipeline_mode<synchronous>, transform_indices = @transform_1, window_bounds = array<i64: 1, 4, 128>}, {pipeline_mode = #tpu.pipeline_mode<synchronous>, transform_indices = @transform_2, window_bounds = array<i64: 1, 1>}, {pipeline_mode = #tpu.pipeline_mode<synchronous>, transform_indices = @transform_3, window_bounds = array<i64: 2, 1>}]} {
    %c0 = arith.constant 0 : index
    %c0_0 = arith.constant 0 : index
    %c0_1 = arith.constant 0 : index
    %0 = vector.load %arg1[%c0, %c0_0, %c0_1] : memref<2x4x128xf32, #tpu.memory_space<vmem>>, vector<2x4x128xf32>
    %c0_2 = arith.constant 0 : index
    %c0_3 = arith.constant 0 : index
    %c0_4 = arith.constant 0 : index
    %1 = vector.load %arg2[%c0_2, %c0_3, %c0_4] : memref<1x4x128xf32, #tpu.memory_space<vmem>>, vector<1x4x128xf32>
    %2 = vector.broadcast %1 : vector<1x4x128xf32> to vector<2x4x128xf32>
    %3 = arith.mulf %0, %2 : vector<2x4x128xf32>
    %cst = arith.constant dense<0.000000e+00> : vector<2x4xf32>
    %4 = vector.multi_reduction <add>, %3, %cst [2] : vector<2x4x128xf32> to vector<2x4xf32>
    %cst_5 = arith.constant dense<0.000000e+00> : vector<2xf32>
    %5 = vector.multi_reduction <add>, %4, %cst_5 [1] : vector<2x4xf32> to vector<2xf32>
    %6 = vector.shape_cast %5 : vector<2xf32> to vector<2x1xf32>
    %c0_6 = arith.constant 0 : index
    %c0_7 = arith.constant 0 : index
    %7 = vector.load %arg3[%c0_6, %c0_7] : memref<1x1xf32, #tpu.memory_space<vmem>>, vector<1x1xf32>
    %8 = vector.broadcast %7 : vector<1x1xf32> to vector<2x1xf32>
    %9 = arith.addf %6, %8 : vector<2x1xf32>
    %c0_8 = arith.constant 0 : index
    %c0_9 = arith.constant 0 : index
    %10 = vector.load %arg4[%c0_8, %c0_9] : memref<2x1xf32, #tpu.memory_space<vmem>>, vector<2x1xf32>
    tpu.vector_store %arg4[%c0_8, %c0_9], %9 {strides = array<i32>} : memref<2x1xf32, #tpu.memory_space<vmem>>, vector<2x1xf32>,
    return
  }
  func.func @transform_0(%arg0: i32) -> (i32, i32, i32) {
    %c0_i32 = arith.constant 0 : i32
    %c0_i32_0 = arith.constant 0 : i32
    %c0_i32_1 = arith.constant 0 : i32
    %c0_i32_2 = arith.constant 0 : i32
    return %c0_i32, %c0_i32_0, %c0_i32_1 : i32, i32, i32
  }
  func.func @transform_1(%arg0: i32) -> (i32, i32, i32) {
    %c0_i32 = arith.constant 0 : i32
    %c0_i32_0 = arith.constant 0 : i32
    %c0_i32_1 = arith.constant 0 : i32
    %c0_i32_2 = arith.constant 0 : i32
    return %c0_i32, %c0_i32_0, %c0_i32_1 : i32, i32, i32
  }
  func.func @transform_2(%arg0: i32) -> (i32, i32) {
    %c0_i32 = arith.constant 0 : i32
    %c0_i32_0 = arith.constant 0 : i32
    %c0_i32_1 = arith.constant 0 : i32
    return %c0_i32, %c0_i32_0 : i32, i32
  }
  func.func @transform_3(%arg0: i32) -> (i32, i32) {
    %c0_i32 = arith.constant 0 : i32
    %c0_i32_0 = arith.constant 0 : i32
    %c0_i32_1 = arith.constant 0 : i32
    return %c0_i32, %c0_i32_0 : i32, i32
  }
}

</mosaic_0001>

<bundles_post_ra>
// kernel: disc2d_forward.7
= control target key start
LH: loop header
LB: loop body
LE: loop exit
PB: predicated region body
PF: predicated region fallthrough
CT: control target
= control target key end

     0   :  { %vm21_vm0 = vcmask 1043456   ;;  %v30_v8 = vlaneseq  ;;  %vm40_vm1 = vcmask 1041409   ;;  %vm43_vm2 = vcmask 25600   ;;  %s97_s0 = inlined_call_operand.vmem [shape: f32[2,4,128], index: 0, kind: input, shape index: {}]   ;;  %s98_s1 = inlined_call_operand.vmem [shape: f32[1,4,128], index: 1, kind: input, shape index: {}]   ;;  %s99_s2 = inlined_call_operand.<no memory space> [shape: f32[1,1], index: 2, kind: input, shape index: {}]   ;;  %s100_s3 = inlined_call_operand.vmem [shape: f32[2,1], index: 3, kind: output, shape index: {}]  }
   0x1   :  { %v16_v0 = vld [vmem:[%s97_s0] sm:$0xf]  ;;  %v17_v2 = vld [vmem:[%s97_s0 + $0x4] sm:$0xf]  ;;  %v8_v7 = vstv %s99_s2  ;;  %vm55_vm3 = vcmask 1024  }
   0x2   :  { %v18_v1 = vld [vmem:[%s98_s1] sm:$0xf]  ;;  %9 = vst [vmem:[#allocation2] sm:$0x1] %v8_v7  ;;  %v31_v9 = vand.u32 127, %v30_v8  ;;  %v33_v10 = vshrl.u32 %v30_v8, 7 }
   0x3   :  { %v19_v3 = vmul.f32 %v18_v1, %v16_v0  ;;  %v20_v4 = vmul.f32 %v18_v1, %v17_v2 }
   0x4   :  { %v34_v12 = vsub.s32 %v31_v9, %v33_v10 }
   0x5   :  { %v22_v5 = vsel %vm21_vm0, %v19_v3, 0.0  ;;  %v25_v6 = vsel %vm21_vm0, %v20_v4, 0.0 }
   0x6   :  { %23 = vadd.xlane.f32.xlu0 %v22_v5 }
   0x9   :  { %v61_v18 = vld [vmem:[#allocation2] ss:$0 sm:$0xff] }
   0xa   :  { %26 = vadd.xlane.f32.xlu0 %v25_v6 }
  0x93   :  { %v24_v11 = vpop.xlane.xlu0 %23 }
  0x94   :  { %v35_v14 = vrot.slane %v24_v11, %v34_v12 }
  0x97   :  { %v27_v13 = vpop.xlane.xlu0 %26 }
  0x98   :  { %v39_v15 = vrot.slane %v27_v13, %v34_v12 }
  0x9a   :  { %v41_v16 = vsel %vm40_vm1, %v39_v15, %v35_v14 }
  0x9b   :  { %v44_v17 = vsel %vm43_vm2, %v41_v16, 0.0 }
  0x9c   :  { %45 = vadd.xlane.f32.xlu1 %v44_v17 }
 0x129   :  { %v46_v19 = vpop.xlane.xlu1 %45 }
 0x12a   :  { %v54_v20 = vadd.f32 %v61_v18, %v46_v19 }
 0x12c   :  { %56 = vst.msk [vmem:[%s100_s3] sm:$0x3] %vm55_vm3, %v54_v20 }

// kernel: disc2d_forward.4
= control target key start
LH: loop header
LB: loop body
LE: loop exit
PB: predicated region body
PF: predicated region fallthrough
CT: control target
= control target key end

     0   :  { %s2465_s27 = smov 0   ;;  %s2467_s28 = smov 0   ;;  %s2769_s0 = inlined_call_operand.vmem [shape: bf16[2,9,9,8], index: 0, kind: input, shape index: {}]   ;;  %s2770_s1 = inlined_call_operand.vmem [shape: bf16[2,9,8,8], index: 1, kind: input, shape index: {}]   ;;  %s2771_s2 = inlined_call_operand.vmem [shape: bf16[2,8,9,8], index: 2, kind: input, shape index: {}]   ;;  %s2772_s3 = inlined_call_operand.vmem [shape: bf16[2,8,8,8], index: 3, kind: input, shape index: {}]   ;;  %s2773_s4 = inlined_call_operand.vmem [shape: bf16[9,8,128], index: 4, kind: input, shape index: {}]   ;;  %s2774_s5 = inlined_call_operand.vmem [shape: f32[1,128], index: 5, kind: input, shape index: {}]   ;;  %s2775_s6 = inlined_call_operand.vmem [shape: f32[1,128], index: 6, kind: input, shape index: {}]   ;;  %s2776_s7 = inlined_call_operand.vmem [shape: f32[1,128], index: 7, kind: input, shape index: {}]   ;;  %s2777_s8 = inlined_call_operand.vmem [shape: f32[2,64,128], index: 8, kind: output, shape index: {}]  }
   0x1   :  { %s2469_s29 = smov 0  }
   0x2 LB: > { %s30_s30 = sadd.s32 1, %s2414_s28  ;;  %p2006_p0 = scmp.ge.s32.totalorder %s2418_s29, 1  ;;  %s2418_s29 = sphi %s2469_s29, %s18_s29   ;;  %s2414_s28 = sphi %s2467_s28, %s2781_s28   ;;  %s2410_s27 = sphi %s2465_s27, %s2780_s27  }
   0x3   : > { %p32_p1 = scmp.ge.s32.totalorder %s30_s30, 2  ;;  %p306_p2 = scmp.lt.s32.totalorder %s2418_s29, 3 }
   0x5   : > { %s2783_s30 = smov (%p32_p1, %s30_s30), 0  ;;  %p307_p3 = pnand %p2006_p0, %p306_p2 }
   0x6   : > { %v2015_v0 = vld [vmem:[%s2773_s4 + $0x4] sm:$0xf] (!%p307_p3)  ;;  %vm448_vm0 = vcmask (!%p307_p3), 1043456   ;;  %v2489_v1 = vld [vmem:[%s2773_s4 + $0x10] sm:$0xf] (!%p307_p3)  ;;  %p359_p4 = scmp.lt.s32.totalorder (!%p307_p3), %s2410_s27, 1 }
   0x7   : > { %310 = sbr.rel (%p307_p3) target bundleno = 320 (0x140), region = 52  ;;  %2336 = vmatprep.subr.msk.bf16.mxu1 (!%p307_p3), %vm448_vm0, %v2015_v0  ;;  %2340 = vmatprep.subr.msk.bf16.mxu0 (!%p307_p3), %vm448_vm0, %v2489_v1  ;;  %v450_v2 = vsel (!%p307_p3), %vm448_vm0, %v2015_v0, 0  ;;  %v2497_v3 = vsel (!%p307_p3), %vm448_vm0, %v2489_v1, 0  ;;  %v402_v4 = vld [vmem:[%s2773_s4] sm:$0xf] (!%p307_p3)  ;;  %vm435_vm1 = vcmask (!%p307_p3), 64512  }
   0x8   : > { %2181 = vmatpush3.bf16.msra.mxu1 (!%p307_p3), %v450_v2  ;;  %2221 = vmatpush3.bf16.msra.mxu0 (!%p307_p3), %v2497_v3  ;;  %v2059_v5 = vld [vmem:[%s2773_s4 + $0x14] sm:$0xf] (!%p307_p3)  ;;  %v550_v6 = vsel (!%p307_p3), %vm448_vm0, %v402_v4, 0  ;;  %vm633_vm2 = vsmask.f32 (!%p307_p3), 3328 }
   0x9   : > { %2337 = vmatprep.subr.msk.bf16.mxu1 (!%p307_p3), %vm448_vm0, %v402_v4  ;;  %2342 = vmatprep.subr.msk.bf16.mxu0 (!%p307_p3), %vm448_vm0, %v2059_v5  ;;  %v1245_v7 = vsel (!%p307_p3), %vm448_vm0, %v2059_v5, 0  ;;  %vm634_vm3 = vsmask.f32 (!%p307_p3), 7440  ;;  %v2076_v20 = vld [vmem:[%s2773_s4 + $0x18] sm:$0xf] (!%p307_p3) }
   0xa   : > { %v2032_v21 = vld [vmem:[%s2773_s4 + $0x8] sm:$0xf] (!%p307_p3)  ;;  %vm2565_vm4 = vmor (!%p307_p3), %vm633_vm2, %vm634_vm3  ;;  %v1367_v55 = vsel (!%p307_p3), %vm448_vm0, %v2076_v20, 0 }
   0xb   : > { %v775_v59 = vsel (!%p307_p3), %vm448_vm0, %v2032_v21, 0 }
   0xe   : > { %s2785_s27 = smov (!%p359_p4, %s2410_s27), 1 }
   0xf   : > { %s2132_s17 = sshll.u32 %s2785_s27, 6  ;;  %s2347_s18 = smul.u32 36, %s2785_s27 }
  0x10   : > { %s2517_s21 = scalar_lea.vmem %s2771_s2, %s2132_s17  ;;  %s2133_s22 = sshll.u32 %s2785_s27, 5 }
  0x11   : > { %v1090_v8 = vld [vmem:[%s2517_s21] sm:$0xf]  ;;  %v1091_v9 = vld [vmem:[%s2517_s21 + $0x4] sm:$0x1]  ;;  %s2527_s25 = scalar_lea.vmem %s2770_s1, %s2347_s18  ;;  %s2532_s10 = scalar_lea.vmem %s2772_s3, %s2133_s22  ;;  %v1092_v10 = vld [vmem:[%s2517_s21 + $0x8] sm:$0xf] }
  0x12   : > { %v1107_v11 = vshrl.u32 %v1090_v8, 16  ;;  %v1110_v12 = vshll.u32 %v1090_v8, 16  ;;  %v2372_v13 = vld [vmem:[%s2532_s10] sm:$0xff]   ;;  %v1116_v14 = vshll.u32 %v1091_v9, 16  ;;  %v1093_v16 = vld [vmem:[%s2517_s21 + $0xc] sm:$0x1]  ;;  %s2750_s16 = scalar_lea.vmem %s2777_s8, %s2132_s17 }
  0x13   : > { %v2373_v15 = vld [vmem:[%s2527_s25] sm:$0xff]   ;;  %2222 = vmatprep.mubr.msk.bf16.mxu0 %vm435_vm1, %v2372_v13  ;;  %v2374_v18 = vld [vmem:[%s2532_s10 + $0x8] sm:$0xff]   ;;  %s2346_s15 = smul.u32 72, %s2785_s27  ;;  %v2376_v23 = vld [vmem:[%s2527_s25 + $0x10] sm:$0xff]   ;;  %v1121_v25 = vshrl.u32 %v1092_v10, 16  ;;  %v1124_v26 = vshll.u32 %v1092_v10, 16 }
  0x14   : > { %v1109_v17 = vrot.slane %v1107_v11, 4  ;;  %v1112_v19 = vrot.slane %v1110_v12, 5  ;;  %2182 = vmatprep.mubr.msk.bf16.mxu1 %vm435_vm1, %v2373_v15  ;;  %v2375_v22 = vld [vmem:[%s2527_s25 + $0x8] sm:$0xff]   ;;  %2223 = vmatmul.mubr.msk.bf16.vlgmr.msra.gmra.mrb[0].mxu0 %vm435_vm1, %v2374_v18  ;;  %v1118_v28 = vrot.slane %v1116_v14, 5  ;;  %v1130_v30 = vshll.u32 %v1093_v16, 16  ;;  %v2377_v41 = vld [vmem:[%s2527_s25 + $0x18] sm:$0xff]  }
  0x15   : > { %2183 = vmatmul.mubr.msk.bf16.vlgmr.msra.gmra.mrb[0].mxu1 %vm435_vm1, %v2375_v22  ;;  %2231 = vmatpush3.bf16.msra.mxu0 %v1245_v7  ;;  %v1123_v29 = vrot.slane %v1121_v25, 4  ;;  %v1094_v31 = vld [vmem:[%s2517_s21 + $0x10] sm:$0xf]  ;;  %v1126_v32 = vrot.slane %v1124_v26, 5  ;;  %v1095_v33 = vld [vmem:[%s2517_s21 + $0x14] sm:$0x1]  ;;  %s2561_s19 = scalar_lea.vmem %s2769_s0, %s2346_s15 }
  0x16   : > { %v1113_v24 = vor.u32 %v1112_v19, %v1109_v17  ;;  %2191 = vmatpush3.bf16.msra.mxu1 %v550_v6  ;;  %2186 = vmatprep.mubr.msk.bf16.mxu1 %vm435_vm1, %v2376_v23  ;;  %v1096_v34 = vld [vmem:[%s2517_s21 + $0x18] sm:$0xf]  ;;  %v1135_v35 = vshrl.u32 %v1094_v31, 16  ;;  %v1132_v37 = vrot.slane %v1130_v30, 5  ;;  %v1097_v38 = vld [vmem:[%s2517_s21 + $0x1c] sm:$0x1] }
  0x17   : > { %2343 = vmatprep.subr.msk.bf16.mxu0 %vm448_vm0, %v2076_v20  ;;  %2338 = vmatprep.subr.msk.bf16.mxu1 %vm448_vm0, %v2032_v21  ;;  %v1138_v39 = vshll.u32 %v1094_v31, 16  ;;  %v1144_v40 = vshll.u32 %v1095_v33, 16  ;;  %v1127_v42 = vor.u32 %v1126_v32, %v1123_v29  ;;  %v1149_v44 = vshrl.u32 %v1096_v34, 16  ;;  %v2378_v52 = vld [vmem:[%s2561_s19] ss:$8 sps:$4 sm:$0xff]  }
  0x18   : > { %v1114_v27 = vrot.slane %v1113_v24, 4  ;;  %v1137_v43 = vrot.slane %v1135_v35, 4  ;;  %v1152_v45 = vshll.u32 %v1096_v34, 16  ;;  %v1158_v47 = vshll.u32 %v1097_v38, 16  ;;  %v1098_v60 = vld [vmem:[%s2517_s21 + $0x20] sm:$0xf] }
  0x19   : > { %v1140_v46 = vrot.slane %v1138_v39, 5  ;;  %v1128_v49 = vrot.slane %v1127_v42, 4  ;;  %v1151_v50 = vrot.slane %v1149_v44, 4  ;;  %v1146_v54 = vrot.slane %v1144_v40, 5  ;;  %v1099_v61 = vld [vmem:[%s2517_s21 + $0x24] sm:$0x1] }
  0x1a   : > { %v1119_v48 = vsel %vm2565_vm4, %v1114_v27, %v1118_v28  ;;  %v1154_v51 = vrot.slane %v1152_v45, 5  ;;  %v1160_v58 = vrot.slane %v1158_v47, 5  ;;  %v1100_v0 = vld [vmem:[%s2517_s21 + $0x28] sm:$0xf]  ;;  %v1101_v2 = vld [vmem:[%s2517_s21 + $0x2c] sm:$0x1] }
  0x1b   : > { %v1141_v53 = vor.u32 %v1140_v46, %v1137_v43  ;;  %v1133_v56 = vsel %vm2565_vm4, %v1128_v49, %v1132_v37  ;;  %v1163_v4 = vshrl.u32 %v1098_v60, 16  ;;  %v2379_v6 = vld [vmem:[%s2561_s19 + $0x10] ss:$8 sps:$4 sm:$0xff]   ;;  %v1166_v7 = vshll.u32 %v1098_v60, 16  ;;  %v1103_v15 = vld [vmem:[%s2517_s21 + $0x34] sm:$0x1] }
  0x1c   : > { %v1155_v57 = vor.u32 %v1154_v51, %v1151_v50  ;;  %v2060_v62 = vcombine.low %v1119_v48, %v1133_v56  ;;  %v1172_v8 = vshll.u32 %v1099_v61, 16  ;;  %v1177_v9 = vshrl.u32 %v1100_v0, 16  ;;  %v1102_v10 = vld [vmem:[%s2517_s21 + $0x30] sm:$0xf]  ;;  %v1104_v20 = vld [vmem:[%s2517_s21 + $0x38] sm:$0xf] }
  0x1d   : > { %2187 = vmatmul.mubr.msk.bf16.gmra.mrb[4].mxu1 %vm435_vm1, %v2377_v41  ;;  %v1142_v63 = vrot.slane %v1141_v53, 4  ;;  %v1165_v12 = vrot.slane %v1163_v4, 4  ;;  %v1180_v13 = vshll.u32 %v1100_v0, 16  ;;  %v1186_v14 = vshll.u32 %v1101_v2, 16  ;;  %v2596_v21 = vld [vmem:[%s2773_s4 + $0x1c] sm:$0xf] }
  0x1e   : > { %2192 = vmatprep.mubr.msk.bf16.mxu1 %vm435_vm1, %v2378_v52  ;;  %v1156_v5 = vrot.slane %v1155_v57, 4  ;;  %2232 = vmatprep.mubr.msk.bf16.mxu0 %vm435_vm1, %v2060_v62  ;;  %v1168_v17 = vrot.slane %v1166_v7, 5  ;;  %v1174_v18 = vrot.slane %v1172_v8, 5  ;;  %v1179_v19 = vrot.slane %v1177_v9, 4  ;;  %v1105_v25 = vld [vmem:[%s2517_s21 + $0x3c] sm:$0x1] }
  0x1f   : > { %v1147_v11 = vsel %vm2565_vm4, %v1142_v63, %v1146_v54  ;;  %v1182_v23 = vrot.slane %v1180_v13, 5  ;;  %v1188_v24 = vrot.slane %v1186_v14, 5  ;;  %v1191_v26 = vshrl.u32 %v1102_v10, 16  ;;  %v2602_v27 = vld [vmem:[%s2773_s4 + $0xc] sm:$0xf] }
  0x20   : > { %v1161_v16 = vsel %vm2565_vm4, %v1156_v5, %v1160_v58  ;;  %v1169_v28 = vor.u32 %v1168_v17, %v1165_v12  ;;  %v1194_v29 = vshll.u32 %v1102_v10, 16  ;;  %v1200_v30 = vshll.u32 %v1103_v15, 16  ;;  %v2380_v40 = vld [vmem:[%s2561_s19 + $0x20] ss:$8 sps:$4 sm:$0xff]   ;;  %v2381_v51 = vld [vmem:[%s2561_s19 + $0x30] ss:$8 sps:$4 sm:$0xff]  }
  0x21   : > { %v2061_v22 = vcombine.low %v1147_v11, %v1161_v16  ;;  %v1205_v31 = vshrl.u32 %v1104_v20, 16  ;;  %v1183_v32 = vor.u32 %v1182_v23, %v1179_v19  ;;  %v1193_v33 = vrot.slane %v1191_v26, 4  ;;  %v2382_v53 = vld [vmem:[%s2561_s19 + $0x8] ss:$8 sps:$4 sm:$0xff]   ;;  %v617_v54 = vld [vmem:[%s2561_s19] sm:$0xf] }
  0x22   : > { %v1208_v34 = vshll.u32 %v1104_v20, 16  ;;  %v1214_v35 = vshll.u32 %v1105_v25, 16  ;;  %v1170_v37 = vrot.slane %v1169_v28, 4  ;;  %v1196_v38 = vrot.slane %v1194_v29, 5  ;;  %v619_v57 = vld [vmem:[%s2561_s19 + $0x8] sm:$0xf] }
  0x23   : > { %2233 = vmatmul.mubr.msk.bf16.vlgmr.msra.gmra.mrb[0].mxu0 %vm435_vm1, %v2061_v22  ;;  %v1207_v39 = vrot.slane %v1205_v31, 4  ;;  %v1184_v41 = vrot.slane %v1183_v32, 4  ;;  %v1202_v45 = vrot.slane %v1200_v30, 5  ;;  %v620_v58 = vld [vmem:[%s2561_s19 + $0xc] sm:$0x1]  ;;  %v640_v60 = vshll.u32 %v617_v54, 16 }
  0x24   : > { %2241 = vmatpush3.bf16.msra.mxu0 %v1367_v55  ;;  %v1210_v42 = vrot.slane %v1208_v34, 5  ;;  %v1175_v43 = vsel %vm2565_vm4, %v1170_v37, %v1174_v18  ;;  %v1197_v44 = vor.u32 %v1196_v38, %v1193_v33  ;;  %v1216_v48 = vrot.slane %v1214_v35, 5  ;;  %v618_v55 = vld [vmem:[%s2561_s19 + $0x4] sm:$0x1]  ;;  %v621_v2 = vld [vmem:[%s2561_s19 + $0x10] sm:$0xf] }
  0x25   : > { %2193 = vmatmul.mubr.msk.bf16.vlgmr.msra.gmra.mrb[0].mxu1 %vm435_vm1, %v2379_v6  ;;  %2344 = vmatprep.subr.msk.bf16.mxu0 %vm448_vm0, %v2596_v21  ;;  %v1189_v46 = vsel %vm2565_vm4, %v1184_v41, %v1188_v24  ;;  %v646_v62 = vshll.u32 %v618_v55, 16  ;;  %v651_v63 = vshrl.u32 %v619_v57, 16  ;;  %v654_v0 = vshll.u32 %v619_v57, 16  ;;  %v622_v8 = vld [vmem:[%s2561_s19 + $0x14] sm:$0x1] }
  0x26   : > { %2201 = vmatpush3.bf16.msra.mxu1 %v775_v59  ;;  %2196 = vmatprep.mubr.msk.bf16.mxu1 %vm435_vm1, %v2380_v40  ;;  %v1211_v47 = vor.u32 %v1210_v42, %v1207_v39  ;;  %v2062_v49 = vcombine.low %v1175_v43, %v1189_v46  ;;  %v1198_v50 = vrot.slane %v1197_v44, 4  ;;  %v637_v59 = vshrl.u32 %v617_v54, 16  ;;  %v623_v12 = vld [vmem:[%s2561_s19 + $0x18] sm:$0xf]  ;;  %v624_v16 = vld [vmem:[%s2561_s19 + $0x1c] sm:$0x1] }
  0x27   : > { %2339 = vmatprep.subr.msk.bf16.mxu1 %vm448_vm0, %v2602_v27  ;;  %v642_v6 = vrot.slane %v640_v60, 5  ;;  %v660_v7 = vshll.u32 %v620_v58, 16  ;;  %v648_v9 = vrot.slane %v646_v62, 5  ;;  %v653_v10 = vrot.slane %v651_v63, 4  ;;  %v2383_v29 = vld [vmem:[%s2561_s19 + $0x18] ss:$8 sps:$4 sm:$0xff]  }
  0x28   : > { %v1212_v52 = vrot.slane %v1211_v47, 4  ;;  %2236 = vmatprep.mubr.msk.bf16.mxu0 %vm435_vm1, %v2062_v49  ;;  %v1203_v56 = vsel %vm2565_vm4, %v1198_v50, %v1202_v45  ;;  %v639_v5 = vrot.slane %v637_v59, 4  ;;  %v656_v11 = vrot.slane %v654_v0, 5  ;;  %v2384_v37 = vld [vmem:[%s2561_s19 + $0x28] ss:$8 sps:$4 sm:$0xff]  }
  0x29   : > { %v665_v13 = vshrl.u32 %v621_v2, 16  ;;  %v662_v15 = vrot.slane %v660_v7, 5  ;;  %v668_v17 = vshll.u32 %v621_v2, 16  ;;  %v674_v18 = vshll.u32 %v622_v8, 16  ;;  %v625_v41 = vld [vmem:[%s2561_s19 + $0x20] sm:$0xf] }
  0x2a   : > { %v1217_v61 = vsel %vm2565_vm4, %v1212_v52, %v1216_v48  ;;  %v643_v14 = vor.u32 %v642_v6, %v639_v5  ;;  %v657_v19 = vor.u32 %v656_v11, %v653_v10  ;;  %v679_v22 = vshrl.u32 %v623_v12, 16  ;;  %v626_v42 = vld [vmem:[%s2561_s19 + $0x24] sm:$0x1]  ;;  %v627_v45 = vld [vmem:[%s2561_s19 + $0x28] sm:$0xf] }
  0x2b   : > { %v2063_v4 = vcombine.low %v1203_v56, %v1217_v61  ;;  %v667_v20 = vrot.slane %v665_v13, 4  ;;  %v682_v23 = vshll.u32 %v623_v12, 16  ;;  %v1487_v24 = vsel %vm448_vm0, %v2596_v21, 0  ;;  %v628_v46 = vld [vmem:[%s2561_s19 + $0x2c] sm:$0x1] }
  0x2c   : > { %v644_v25 = vrot.slane %v643_v14, 4  ;;  %v670_v26 = vrot.slane %v668_v17, 5  ;;  %v688_v28 = vshll.u32 %v624_v16, 16  ;;  %v658_v30 = vrot.slane %v657_v19, 4  ;;  %v629_v52 = vld [vmem:[%s2561_s19 + $0x30] sm:$0xf] }
  0x2d   : > { %2197 = vmatmul.mubr.msk.bf16.gmra.mrb[4].mxu1 %vm435_vm1, %v2381_v51  ;;  %2237 = vmatmul.mubr.msk.bf16.gmra.mrb[4].mxu0 %vm435_vm1, %v2063_v4  ;;  %v676_v31 = vrot.slane %v674_v18, 5  ;;  %v681_v32 = vrot.slane %v679_v22, 4  ;;  %v684_v33 = vrot.slane %v682_v23, 5  ;;  %v895_v40 = vsel %vm448_vm0, %v2602_v27, 0  ;;  %v630_v56 = vld [vmem:[%s2561_s19 + $0x34] sm:$0x1] }
  0x2e   : > { %2242 = vmatprep.mubr.msk.bf16.mxu0 %vm435_vm1, %v2382_v53  ;;  %v649_v34 = vsel %vm2565_vm4, %v644_v25, %v648_v9  ;;  %v671_v35 = vor.u32 %v670_v26, %v667_v20  ;;  %v663_v21 = vsel %vm2565_vm4, %v658_v30, %v662_v15  ;;  %v690_v39 = vrot.slane %v688_v28, 5  ;;  %v631_v61 = vld [vmem:[%s2561_s19 + $0x38] sm:$0xf]  ;;  %v632_v4 = vld [vmem:[%s2561_s19 + $0x3c] sm:$0x1]  ;;  %v2386_v17 = vld [vmem:[%s2527_s25 + $0x4] sm:$0xff]  }
  0x2f   : > { %v685_v38 = vor.u32 %v684_v33, %v681_v32  ;;  %v2033_v43 = vcombine.low %v649_v34, %v663_v21  ;;  %v693_v47 = vshrl.u32 %v625_v41, 16  ;;  %v696_v49 = vshll.u32 %v625_v41, 16  ;;  %v2385_v63 = vld [vmem:[%s2561_s19 + $0x38] ss:$8 sps:$4 sm:$0xff]   ;;  %v2105_v41 = vld [vmem:[%s2561_s19 + $0x14] sm:$0x1] }
  0x30   : > { %v672_v44 = vrot.slane %v671_v35, 4  ;;  %v702_v50 = vshll.u32 %v626_v42, 16  ;;  %v707_v51 = vshrl.u32 %v627_v45, 16  ;;  %v710_v54 = vshll.u32 %v627_v45, 16  ;;  %v2388_v34 = vld [vmem:[%s2517_s21] ss:$8 sps:$4 sm:$0xff]  }
  0x31   : > { %v686_v48 = vrot.slane %v685_v38, 4  ;;  %2202 = vmatprep.mubr.msk.bf16.mxu1 %vm435_vm1, %v2033_v43  ;;  %v695_v53 = vrot.slane %v693_v47, 4  ;;  %v716_v55 = vshll.u32 %v628_v46, 16  ;;  %v698_v58 = vrot.slane %v696_v49, 5  ;;  %v2390_v21 = vld [vmem:[%s2527_s25 + $0x14] sm:$0xff]  }
  0x32   : > { %v677_v27 = vsel %vm2565_vm4, %v672_v44, %v676_v31  ;;  %v704_v59 = vrot.slane %v702_v50, 5  ;;  %v709_v60 = vrot.slane %v707_v51, 4  ;;  %v712_v0 = vrot.slane %v710_v54, 5  ;;  %v2387_v31 = vld [vmem:[%s2527_s25 + $0xc] sm:$0xff]   ;;  %v2102_v38 = vld [vmem:[%s2561_s19 + $0x8] sm:$0xf] }
  0x33   : > { %v691_v57 = vsel %vm2565_vm4, %v686_v48, %v690_v39  ;;  %v718_v2 = vrot.slane %v716_v55, 5  ;;  %v721_v5 = vshrl.u32 %v629_v52, 16  ;;  %v699_v6 = vor.u32 %v698_v58, %v695_v53  ;;  %v2103_v39 = vld [vmem:[%s2561_s19 + $0xc] sm:$0x1]  ;;  %v2106_v46 = vld [vmem:[%s2561_s19 + $0x18] sm:$0xf] }
  0x34   : > { %v2034_v62 = vcombine.low %v677_v27, %v691_v57  ;;  %v724_v7 = vshll.u32 %v629_v52, 16  ;;  %v730_v8 = vshll.u32 %v630_v56, 16  ;;  %v735_v9 = vshrl.u32 %v631_v61, 16  ;;  %v2107_v49 = vld [vmem:[%s2561_s19 + $0x1c] sm:$0x1] }
  0x35   : > { %2243 = vmatmul.mubr.msk.bf16.vlgmr.msra.gmra.mrb[0].mxu0 %vm435_vm1, %v2383_v29  ;;  %v713_v10 = vor.u32 %v712_v0, %v709_v60  ;;  %v723_v11 = vrot.slane %v721_v5, 4  ;;  %v738_v12 = vshll.u32 %v631_v61, 16  ;;  %v744_v13 = vshll.u32 %v632_v4, 16  ;;  %v2108_v50 = vld [vmem:[%s2561_s19 + $0x20] sm:$0xf] }
  0x36   : > { %2251 = vmatpush3.bf16.msra.mxu0 %v1487_v24  ;;  %2246 = vmatprep.mubr.msk.bf16.mxu0 %vm435_vm1, %v2384_v37  ;;  %v700_v14 = vrot.slane %v699_v6, 4  ;;  %v726_v15 = vrot.slane %v724_v7, 5  ;;  %v737_v16 = vrot.slane %v735_v9, 4  ;;  %v732_v19 = vrot.slane %v730_v8, 5  ;;  %v2118_v24 = vld [vmem:[%s2773_s4 + $0x20] sm:$0xf] }
  0x37   : > { %2203 = vmatmul.mubr.msk.bf16.vlgmr.msra.gmra.mrb[0].mxu1 %vm435_vm1, %v2034_v62  ;;  %v714_v18 = vrot.slane %v713_v10, 4  ;;  %v740_v20 = vrot.slane %v738_v12, 5  ;;  %v746_v28 = vrot.slane %v744_v13, 5  ;;  %2345 = vmatprep.subr.msk.bf16.mxu0 %vm448_vm0, %v2118_v24  ;;  %v1717_v37 = vsel %vm448_vm0, %v2118_v24, 0  ;;  %v2109_v54 = vld [vmem:[%s2561_s19 + $0x24] sm:$0x1] }
  0x38   : > { %2211 = vmatpush3.bf16.msra.mxu1 %v895_v40  ;;  %v705_v22 = vsel %vm2565_vm4, %v700_v14, %v704_v59  ;;  %v727_v23 = vor.u32 %v726_v15, %v723_v11  ;;  %v2104_v40 = vld [vmem:[%s2561_s19 + $0x10] sm:$0xf]  ;;  %v1579_v42 = vshrl.u32 %v2102_v38, 16  ;;  %v1582_v43 = vshll.u32 %v2102_v38, 16  ;;  %v2392_v60 = vld [vmem:[%s2517_s21 + $0x20] ss:$8 sps:$4 sm:$0xff]  }
  0x39   : > { %2341 = vmatprep.subr.msk.bf16.mxu1 %vm448_vm0, %v2489_v1  ;;  %v719_v25 = vsel %vm2565_vm4, %v714_v18, %v718_v2  ;;  %v741_v26 = vor.u32 %v740_v20, %v737_v16  ;;  %v1588_v44 = vshll.u32 %v2103_v39, 16  ;;  %v1593_v45 = vshrl.u32 %v2104_v40, 16  ;;  %v2389_v55 = vld [vmem:[%s2517_s21 + $0x10] ss:$8 sps:$4 sm:$0xff]   ;;  %v2110_v2 = vld [vmem:[%s2561_s19 + $0x28] sm:$0xf] }
  0x3a   : > { %v2035_v1 = vcombine.low %v705_v22, %v719_v25  ;;  %v728_v29 = vrot.slane %v727_v23, 4  ;;  %v1596_v47 = vshll.u32 %v2104_v40, 16  ;;  %v1602_v48 = vshll.u32 %v2105_v41, 16  ;;  %v2391_v4 = vld [vmem:[%s2527_s25 + $0x1c] sm:$0xff]   ;;  %v2111_v9 = vld [vmem:[%s2561_s19 + $0x2c] sm:$0x1] }
  0x3b   : > { %v742_v30 = vrot.slane %v741_v26, 4  ;;  %v1581_v51 = vrot.slane %v1579_v42, 4  ;;  %v1584_v52 = vrot.slane %v1582_v43, 5  ;;  %v1590_v27 = vrot.slane %v1588_v44, 5  ;;  %v2112_v14 = vld [vmem:[%s2561_s19 + $0x30] sm:$0xf] }
  0x3c   : > { %2206 = vmatprep.mubr.msk.bf16.mxu1 %vm435_vm1, %v2035_v1  ;;  %v733_v32 = vsel %vm2565_vm4, %v728_v29, %v732_v19  ;;  %v1595_v53 = vrot.slane %v1593_v45, 4  ;;  %v1598_v56 = vrot.slane %v1596_v47, 5  ;;  %v1604_v57 = vrot.slane %v1602_v48, 5  ;;  %v2113_v22 = vld [vmem:[%s2561_s19 + $0x34] sm:$0x1] }
  0x3d   : > { %2247 = vmatmul.mubr.msk.bf16.gmra.mrb[4].mxu0 %vm435_vm1, %v2385_v63  ;;  %v747_v33 = vsel %vm2565_vm4, %v742_v30, %v746_v28  ;;  %v1607_v58 = vshrl.u32 %v2106_v46, 16  ;;  %v1610_v59 = vshll.u32 %v2106_v46, 16  ;;  %v1585_v61 = vor.u32 %v1584_v52, %v1581_v51  ;;  %v2114_v29 = vld [vmem:[%s2561_s19 + $0x38] sm:$0xf]  ;;  %v2117_v39 = vld [vmem:[%s2561_s19 + $0x44] sm:$0x1] }
  0x3e   : > { %2252 = vmatprep.mubr.msk.bf16.mxu0 %vm435_vm1, %v2386_v17  ;;  %v2036_v35 = vcombine.low %v733_v32, %v747_v33  ;;  %v1616_v62 = vshll.u32 %v2107_v49, 16  ;;  %v1621_v63 = vshrl.u32 %v2108_v50, 16  ;;  %v1624_v0 = vshll.u32 %v2108_v50, 16  ;;  %v2393_v30 = vld [vmem:[%s2517_s21 + $0x30] ss:$8 sps:$4 sm:$0xff]  }
  0x3f   : > { %v1599_v5 = vor.u32 %v1598_v56, %v1595_v53  ;;  %v1609_v6 = vrot.slane %v1607_v58, 4  ;;  %v1612_v7 = vrot.slane %v1610_v59, 5  ;;  %v1630_v8 = vshll.u32 %v2109_v54, 16  ;;  %v2394_v47 = vld [vmem:[%s2532_s10 + $0x10] sm:$0xff]  }
  0x40   : > { %2207 = vmatmul.mubr.msk.bf16.gmra.mrb[4].mxu1 %vm435_vm1, %v2036_v35  ;;  %v1586_v10 = vrot.slane %v1585_v61, 4  ;;  %v1618_v11 = vrot.slane %v1616_v62, 5  ;;  %v1623_v12 = vrot.slane %v1621_v63, 4  ;;  %v1626_v13 = vrot.slane %v1624_v0, 5  ;;  %v2116_v35 = vld [vmem:[%s2561_s19 + $0x40] sm:$0xf] }
  0x41   : > { %2212 = vmatprep.mubr.msk.bf16.mxu1 %vm435_vm1, %v2388_v34  ;;  %v1600_v15 = vrot.slane %v1599_v5, 4  ;;  %v1613_v16 = vor.u32 %v1612_v7, %v1609_v6  ;;  %v1632_v17 = vrot.slane %v1630_v8, 5  ;;  %v1635_v18 = vshrl.u32 %v2110_v2, 16  ;;  %v2115_v34 = vld [vmem:[%s2561_s19 + $0x3c] sm:$0x1] }
  0x42   : > { %v1591_v19 = vsel %vm2565_vm4, %v1586_v10, %v1590_v27  ;;  %v1627_v20 = vor.u32 %v1626_v13, %v1623_v12  ;;  %v1638_v23 = vshll.u32 %v2110_v2, 16  ;;  %v1644_v24 = vshll.u32 %v2111_v9, 16  ;;  %v2395_v9 = vld [vmem:[%s2532_s10 + $0x18] sm:$0xff]  }
  0x43   : > { %v1605_v25 = vsel %vm2565_vm4, %v1600_v15, %v1604_v57  ;;  %v1614_v26 = vrot.slane %v1613_v16, 4  ;;  %v1637_v28 = vrot.slane %v1635_v18, 4  ;;  %v1649_v1 = vshrl.u32 %v2112_v14, 16  ;;  %v2127_v15 = vld [vmem:[%s2774_s5] ss:$0 sm:$0xff] }
  0x44   : > { %v1628_v32 = vrot.slane %v1627_v20, 4  ;;  %v1640_v33 = vrot.slane %v1638_v23, 5  ;;  %v1658_v38 = vshll.u32 %v2113_v22, 16  ;;  %v1663_v42 = vshrl.u32 %v2114_v29, 16 }
  0x45   : > { %2253 = vmatmul.mubr.msk.bf16.vlgmr.msra.gmra.mrb[0].mxu0 %vm435_vm1, %v2387_v31  ;;  %v2119_v31 = vcombine.low %v1591_v19, %v1605_v25  ;;  %v1666_v43 = vshll.u32 %v2114_v29, 16  ;;  %v1646_v45 = vrot.slane %v1644_v24, 5  ;;  %v1672_v48 = vshll.u32 %v2115_v34, 16 }
  0x46   : > { %2261 = vmatpush3.bf16.msra.mxu0 %v1717_v37  ;;  %2256 = vmatprep.mubr.msk.bf16.mxu0 %vm435_vm1, %v2390_v21  ;;  %v1651_v37 = vrot.slane %v1649_v1, 4  ;;  %v1652_v21 = vshll.u32 %v2112_v14, 16  ;;  %v1633_v40 = vsel %vm2565_vm4, %v1628_v32, %v1632_v17  ;;  %v1641_v41 = vor.u32 %v1640_v33, %v1637_v28 }
  0x47   : > { %v1665_v50 = vrot.slane %v1663_v42, 4  ;;  %v1668_v51 = vrot.slane %v1666_v43, 5  ;;  %v1677_v52 = vshrl.u32 %v2116_v35, 16  ;;  %v1660_v53 = vrot.slane %v1658_v38, 5 }
  0x48   : > { %2213 = vmatmul.mubr.msk.bf16.vlgmr.msra.gmra.mrb[0].mxu1 %vm435_vm1, %v2389_v55  ;;  %v1654_v46 = vrot.slane %v1652_v21, 5  ;;  %v1642_v49 = vrot.slane %v1641_v41, 4  ;;  %v1680_v54 = vshll.u32 %v2116_v35, 16  ;;  %v1686_v55 = vshll.u32 %v2117_v39, 16 }
  0x49   : > { %2271 = vmatpush3.bf16.msra.mxu1 %v2497_v3  ;;  %2216 = vmatprep.mubr.msk.bf16.mxu1 %vm435_vm1, %v2392_v60  ;;  %v1619_v3 = vsel %vm2565_vm4, %v1614_v26, %v1618_v11  ;;  %v1669_v56 = vor.u32 %v1668_v51, %v1665_v50  ;;  %v1679_v57 = vrot.slane %v1677_v52, 4  ;;  %v1674_v60 = vrot.slane %v1672_v48, 5  ;;  %v2128_v26 = vld [vmem:[%s2775_s6] ss:$0 sm:$0xff] }
  0x4a   : > { %v2120_v44 = vcombine.low %v1619_v3, %v1633_v40  ;;  %v1655_v27 = vor.u32 %v1654_v46, %v1651_v37  ;;  %v1647_v58 = vsel %vm2565_vm4, %v1642_v49, %v1646_v45  ;;  %v1682_v61 = vrot.slane %v1680_v54, 5 }
  0x4b   : > { %v1670_v62 = vrot.slane %v1669_v56, 4  ;;  %v1688_v2 = vrot.slane %v1686_v55, 5 }
  0x4c   : > { %v1656_v59 = vrot.slane %v1655_v27, 4  ;;  %v1683_v0 = vor.u32 %v1682_v61, %v1679_v57 }
  0x4d   : > { %2257 = vmatmul.mubr.msk.bf16.gmra.mrb[4].mxu0 %vm435_vm1, %v2391_v4  ;;  %v1675_v5 = vsel %vm2565_vm4, %v1670_v62, %v1674_v60 }
  0x4e   : > { %2262 = vmatprep.mubr.msk.bf16.mxu0 %vm435_vm1, %v2119_v31  ;;  %v1661_v63 = vsel %vm2565_vm4, %v1656_v59, %v1660_v53  ;;  %v1684_v6 = vrot.slane %v1683_v0, 4  ;;  %v2129_v31 = vld [vmem:[%s2776_s7] ss:$0 sm:$0xff] }
  0x4f   : > { %v2121_v4 = vcombine.low %v1647_v58, %v1661_v63 }
  0x50   : > { %2217 = vmatmul.mubr.msk.bf16.gmra.mrb[4].mxu1 %vm435_vm1, %v2393_v30  ;;  %v1689_v7 = vsel %vm2565_vm4, %v1684_v6, %v1688_v2 }
  0x51   : > { %2226 = vmatprep.mubr.msk.bf16.mxu1 %vm435_vm1, %v2394_v47  ;;  %v2122_v8 = vcombine.low %v1675_v5, %v1689_v7 }
  0x55   : > { %2263 = vmatmul.mubr.msk.bf16.vlgmr.msra.gmra.mrb[0].mxu0 %vm435_vm1, %v2120_v44 }
  0x56   : > { %2266 = vmatprep.mubr.msk.bf16.mxu0 %vm435_vm1, %v2121_v4 }
  0x5c   : > { %2227 = vmatmul.mubr.msk.bf16.vlgmr.msra.gmra.mrb[4].mxu1 %vm435_vm1, %v2395_v9 }
  0x5d   : > { %2267 = vmatmul.mubr.msk.bf16.gmra.mrb[4].mxu0 %vm435_vm1, %v2122_v8 }
 0x11b   : > { %v2214_v10 = vpop.f32.mrb[0].mxu1 }
 0x11c   : > { %v931_v11 = vpop.f32.mrb[1].mxu1 }
 0x11d   : > { %v2215_v12 = vpop.f32.mrb[2].mxu1 }
 0x11e   : > { %v934_v13 = vpop.f32.mrb[3].mxu1 }
 0x128   : > { %v2264_v14 = vpop.f32.mrb[0].mxu0 }
 0x129   : > { %v2272_v16 = vadd.f32 %v2264_v14, %v2214_v10  ;;  %v1753_v17 = vpop.f32.mrb[1].mxu0 }
 0x12a   : > { %v2273_v18 = vadd.f32 %v1753_v17, %v931_v11  ;;  %v2265_v36 = vpop.f32.mrb[2].mxu0 }
 0x12b   : > { %v1801_v19 = vadd.f32 %v2272_v16, %v2127_v15  ;;  %v2274_v20 = vadd.f32 %v2265_v36, %v2215_v12  ;;  %v1756_v22 = vpop.f32.mrb[3].mxu0 }
 0x12c   : > { %v1799_v23 = vadd.f32 %v2273_v18, %v2127_v15  ;;  %v2275_v24 = vadd.f32 %v1756_v22, %v934_v13 }
 0x12d   : > { %vm1809_vm5 = vcmp.ge.f32.partialorder %v1801_v19, 0.0  ;;  %v1817_v25 = vmul.f32 0.2, %v1801_v19  ;;  %v1802_v28 = vadd.f32 %v2274_v20, %v2127_v15 }
 0x12e   : > { %vm1807_vm6 = vcmp.ge.f32.partialorder %v1799_v23, 0.0  ;;  %v1815_v1 = vmul.f32 0.2, %v1799_v23  ;;  %v1800_v29 = vadd.f32 %v2275_v24, %v2127_v15 }
 0x12f   : > { %v1825_v30 = vsel %vm1809_vm5, %v1801_v19, %v1817_v25  ;;  %vm1810_vm7 = vcmp.ge.f32.partialorder %v1802_v28, 0.0  ;;  %v1818_v32 = vmul.f32 0.2, %v1802_v28  ;;  %v2228_v44 = vpop.f32.mrb[4].mxu1 }
 0x130   : > { %v1840_v33 = vmul.f32 %v2128_v26, %v1825_v30  ;;  %v1823_v34 = vsel %vm1807_vm6, %v1799_v23, %v1815_v1  ;;  %vm1808_vm8 = vcmp.ge.f32.partialorder %v1800_v29, 0.0  ;;  %v1816_v35 = vmul.f32 0.2, %v1800_v29  ;;  %v2268_v21 = vpop.f32.mrb[4].mxu0  ;;  %v1067_v48 = vpop.f32.mrb[5].mxu1 }
 0x131   : > { %v1838_v3 = vmul.f32 %v2128_v26, %v1823_v34  ;;  %v1826_v37 = vsel %vm1810_vm7, %v1802_v28, %v1818_v32  ;;  %v1769_v41 = vpop.f32.mrb[5].mxu0  ;;  %v2276_v47 = vadd.f32 %v2268_v21, %v2228_v44  ;;  %v2229_v52 = vpop.f32.mrb[6].mxu1 }
 0x132   : > { %v1855_v38 = vadd.f32 %v2129_v31, %v1840_v33  ;;  %v1841_v39 = vmul.f32 %v2128_v26, %v1826_v37  ;;  %v1824_v40 = vsel %vm1808_vm8, %v1800_v29, %v1816_v35  ;;  %v2269_v45 = vpop.f32.mrb[6].mxu0  ;;  %v2277_v51 = vadd.f32 %v1769_v41, %v1067_v48  ;;  %v1070_v54 = vpop.f32.mrb[7].mxu1 }
 0x133   : > { %v1853_v42 = vadd.f32 %v2129_v31, %v1838_v3  ;;  %v1839_v43 = vmul.f32 %v2128_v26, %v1824_v40  ;;  %v1772_v49 = vpop.f32.mrb[7].mxu0  ;;  %v1805_v27 = vadd.f32 %v2276_v47, %v2127_v15  ;;  %v2278_v53 = vadd.f32 %v2269_v45, %v2229_v52 }
 0x134   : > { %1863 = vst [vmem:[%s2750_s16 + $0x10] sm:$0xff] %v1855_v38  ;;  %v1856_v46 = vadd.f32 %v2129_v31, %v1841_v39  ;;  %v1803_v55 = vadd.f32 %v2277_v51, %v2127_v15  ;;  %v2279_v56 = vadd.f32 %v1772_v49, %v1070_v54 }
 0x135   : > { %1861 = vst [vmem:[%s2750_s16] sm:$0xff] %v1853_v42  ;;  %v1854_v50 = vadd.f32 %v2129_v31, %v1839_v43  ;;  %vm1813_vm9 = vcmp.ge.f32.partialorder %v1805_v27, 0.0  ;;  %v1821_v57 = vmul.f32 0.2, %v1805_v27  ;;  %v1806_v58 = vadd.f32 %v2278_v53, %v2127_v15 }
 0x136   : > { %1864 = vst [vmem:[%s2750_s16 + $0x18] sm:$0xff] %v1856_v46  ;;  %vm1811_vm10 = vcmp.ge.f32.partialorder %v1803_v55, 0.0  ;;  %v1819_v59 = vmul.f32 0.2, %v1803_v55  ;;  %v1804_v60 = vadd.f32 %v2279_v56, %v2127_v15 }
 0x137   : > { %1862 = vst [vmem:[%s2750_s16 + $0x8] sm:$0xff] %v1854_v50  ;;  %v1829_v61 = vsel %vm1813_vm9, %v1805_v27, %v1821_v57  ;;  %vm1814_vm11 = vcmp.ge.f32.partialorder %v1806_v58, 0.0  ;;  %v1822_v62 = vmul.f32 0.2, %v1806_v58 }
 0x138   : > { %v1844_v63 = vmul.f32 %v2128_v26, %v1829_v61  ;;  %v1827_v0 = vsel %vm1811_vm10, %v1803_v55, %v1819_v59  ;;  %vm1812_vm12 = vcmp.ge.f32.partialorder %v1804_v60, 0.0  ;;  %v1820_v2 = vmul.f32 0.2, %v1804_v60 }
 0x139   : > { %v1842_v4 = vmul.f32 %v2128_v26, %v1827_v0  ;;  %v1830_v5 = vsel %vm1814_vm11, %v1806_v58, %v1822_v62 }
 0x13a   : > { %v1859_v6 = vadd.f32 %v2129_v31, %v1844_v63  ;;  %v1845_v7 = vmul.f32 %v2128_v26, %v1830_v5  ;;  %v1828_v8 = vsel %vm1812_vm12, %v1804_v60, %v1820_v2 }
 0x13b   : > { %v1857_v9 = vadd.f32 %v2129_v31, %v1842_v4  ;;  %v1843_v10 = vmul.f32 %v2128_v26, %v1828_v8 }
 0x13c   : > { %1867 = vst [vmem:[%s2750_s16 + $0x30] sm:$0xff] %v1859_v6  ;;  %v1860_v11 = vadd.f32 %v2129_v31, %v1845_v7 }
 0x13d   : > { %1865 = vst [vmem:[%s2750_s16 + $0x20] sm:$0xff] %v1857_v9  ;;  %v1858_v12 = vadd.f32 %v2129_v31, %v1843_v10 }
 0x13e   : > { %1868 = vst [vmem:[%s2750_s16 + $0x38] sm:$0xff] %v1860_v11 }
 0x13f   : > { %1866 = vst [vmem:[%s2750_s16 + $0x28] sm:$0xff] %v1858_v12 }
 0x140 PF: > { %s18_s29 = sadd.s32 1, %s2418_s29   ;;  %s2780_s27 = smov %s2414_s28 }
 0x141   : > { %p15_p5 = scmp.ge.s32.totalorder %s18_s29, 4   ;;  %s2781_s28 = smov %s2783_s30 }
 0x143   :  { %17 = sbr.rel (!%p15_p5) target bundleno = 2 (0x2), region = 105 }

// kernel: disc2d_forward.5
= control target key start
LH: loop header
LB: loop body
LE: loop exit
PB: predicated region body
PF: predicated region fallthrough
CT: control target
= control target key end

     0   :  { %s2692_s27 = smov 0   ;;  %s2694_s28 = smov 0   ;;  %s3039_s0 = inlined_call_operand.vmem [shape: bf16[2,5,9,128], index: 0, kind: input, shape index: {}]   ;;  %s3040_s1 = inlined_call_operand.vmem [shape: bf16[2,5,8,128], index: 1, kind: input, shape index: {}]   ;;  %s3041_s2 = inlined_call_operand.vmem [shape: bf16[2,4,9,128], index: 2, kind: input, shape index: {}]   ;;  %s3042_s3 = inlined_call_operand.vmem [shape: bf16[2,4,8,128], index: 3, kind: input, shape index: {}]   ;;  %s3043_s4 = inlined_call_operand.vmem [shape: bf16[9,128,128], index: 4, kind: input, shape index: {}]   ;;  %s3044_s5 = inlined_call_operand.vmem [shape: f32[1,128], index: 5, kind: input, shape index: {}]   ;;  %s3045_s6 = inlined_call_operand.vmem [shape: f32[1,128], index: 6, kind: input, shape index: {}]   ;;  %s3046_s7 = inlined_call_operand.vmem [shape: f32[1,128], index: 7, kind: input, shape index: {}]   ;;  %s3047_s8 = inlined_call_operand.vmem [shape: f32[2,32,128], index: 8, kind: output, shape index: {}]  }
   0x1   :  { %s2696_s29 = smov 0  }
   0x2 LB: > { %s30_s30 = sadd.s32 1, %s2641_s28  ;;  %p1960_p0 = scmp.ge.s32.totalorder %s2645_s29, 1  ;;  %s2645_s29 = sphi %s2696_s29, %s18_s29   ;;  %s2641_s28 = sphi %s2694_s28, %s3051_s28   ;;  %s2637_s27 = sphi %s2692_s27, %s3050_s27  }
   0x3   : > { %p32_p1 = scmp.ge.s32.totalorder %s30_s30, 2  ;;  %p306_p2 = scmp.lt.s32.totalorder %s2645_s29, 3 }
   0x5   : > { %s3053_s30 = smov (%p32_p1, %s30_s30), 0  ;;  %p307_p3 = pnand %p1960_p0, %p306_p2 }
   0x6   : > { %v2539_v0 = vld [vmem:[%s3043_s4 + $0x40] sm:$0xff] (!%p307_p3)   ;;  %p359_p4 = scmp.lt.s32.totalorder (!%p307_p3), %s2637_s27, 1  ;;  %v2541_v2 = vld [vmem:[%s3043_s4 + $0x48] sm:$0xff] (!%p307_p3)   ;;  %v2543_v4 = vld [vmem:[%s3043_s4 + $0x50] sm:$0xff] (!%p307_p3)   ;;  %vm663_vm0 = vsmask.f32 (!%p307_p3), 3328 }
   0x7   : > { %310 = sbr.rel (%p307_p3) target bundleno = 395 (0x18b), region = 52  ;;  %v2540_v1 = vld [vmem:[%s3043_s4 + $0x100] sm:$0xff] (!%p307_p3)   ;;  %2301 = vmatprep.subr.bf16.mxu1 (!%p307_p3), %v2539_v0  ;;  %v2542_v3 = vld [vmem:[%s3043_s4 + $0x108] sm:$0xff] (!%p307_p3)   ;;  %v2544_v5 = vld [vmem:[%s3043_s4 + $0x110] sm:$0xff] (!%p307_p3)   ;;  %vm664_vm1 = vsmask.f32 (!%p307_p3), 7440 }
   0x8   : > { %2381 = vmatprep.subr.bf16.mxu0 (!%p307_p3), %v2540_v1  ;;  %2302 = vmatpush3.bf16.msra.mxu1 (!%p307_p3), %v2539_v0  ;;  %v2545_v6 = vld [vmem:[%s3043_s4 + $0x58] sm:$0xff] (!%p307_p3)   ;;  %v2547_v8 = vld [vmem:[%s3043_s4 + $0x60] sm:$0xff] (!%p307_p3)   ;;  %v2549_v10 = vld [vmem:[%s3043_s4 + $0x68] sm:$0xff] (!%p307_p3)  }
   0x9   : > { %2382 = vmatpush3.bf16.msra.mxu0 (!%p307_p3), %v2540_v1  ;;  %2303 = vmatprep.subr.bf16.mxu1 (!%p307_p3), %v2541_v2  ;;  %v2546_v7 = vld [vmem:[%s3043_s4 + $0x118] sm:$0xff] (!%p307_p3)   ;;  %v2548_v9 = vld [vmem:[%s3043_s4 + $0x120] sm:$0xff] (!%p307_p3)   ;;  %v2550_v12 = vld [vmem:[%s3043_s4 + $0x128] sm:$0xff] (!%p307_p3)  }
   0xa   : > { %2383 = vmatprep.subr.bf16.mxu0 (!%p307_p3), %v2542_v3  ;;  %v2551_v14 = vld [vmem:[%s3043_s4 + $0x70] sm:$0xff] (!%p307_p3)   ;;  %v2553_v16 = vld [vmem:[%s3043_s4 + $0x78] sm:$0xff] (!%p307_p3)   ;;  %v2556_v18 = vld [vmem:[%s3043_s4] sm:$0xff] (!%p307_p3)  }
   0xb   : > { %v2552_v15 = vld [vmem:[%s3043_s4 + $0x130] sm:$0xff] (!%p307_p3)   ;;  %v2554_v17 = vld [vmem:[%s3043_s4 + $0x138] sm:$0xff] (!%p307_p3)   ;;  %v2558_v19 = vld [vmem:[%s3043_s4 + $0x140] sm:$0xff] (!%p307_p3)  }
   0xc   : > { %2304 = vmatpush3.bf16.msra.mxu1 (!%p307_p3), %v2541_v2  ;;  %v2561_v22 = vld [vmem:[%s3043_s4 + $0x8] sm:$0xff] (!%p307_p3)   ;;  %v2563_v24 = vld [vmem:[%s3043_s4 + $0x10] sm:$0xff] (!%p307_p3)   ;;  %v2565_v32 = vld [vmem:[%s3043_s4 + $0x18] sm:$0xff] (!%p307_p3)  }
   0xd   : > { %2384 = vmatpush3.bf16.msra.mxu0 (!%p307_p3), %v2542_v3  ;;  %2305 = vmatprep.subr.bf16.mxu1 (!%p307_p3), %v2543_v4  ;;  %v2562_v23 = vld [vmem:[%s3043_s4 + $0x148] sm:$0xff] (!%p307_p3)   ;;  %v2564_v26 = vld [vmem:[%s3043_s4 + $0x150] sm:$0xff] (!%p307_p3)   ;;  %v2566_v37 = vld [vmem:[%s3043_s4 + $0x158] sm:$0xff] (!%p307_p3)  }
   0xe   : > { %s3055_s27 = smov (!%p359_p4, %s2637_s27), 1  ;;  %2385 = vmatprep.subr.bf16.mxu0 %v2544_v5  ;;  %v2567_v41 = vld [vmem:[%s3043_s4 + $0x20] sm:$0xff]   ;;  %vm2823_vm2 = vmor %vm663_vm0, %vm664_vm1  ;;  %v2569_v59 = vld [vmem:[%s3043_s4 + $0x28] sm:$0xff]  }
   0xf   : > { %s2514_s25 = smul.u32 20, %s3055_s27  ;;  %s2209_s10 = sshll.u32 %s3055_s27, 4  ;;  %v2568_v44 = vld [vmem:[%s3043_s4 + $0x160] sm:$0xff]   ;;  %v2570_v63 = vld [vmem:[%s3043_s4 + $0x168] sm:$0xff]  }
  0x10   : > { %2306 = vmatpush3.bf16.msra.mxu1 %v2543_v4  ;;  %s378_s20 = scalar_lea.vmem %s3042_s3, %s2209_s10  ;;  %s2513_s16 = smul.u32 40, %s3055_s27 }
  0x11   : > { %2386 = vmatpush3.bf16.msra.mxu0 %v2544_v5  ;;  %2307 = vmatprep.subr.bf16.mxu1 %v2545_v6  ;;  %s2747_s15 = scalar_lea.vmem %s3040_s1, %s2514_s25  ;;  %v2557_v13 = vld [vmem:[%s378_s20] sm:$0xff]   ;;  %v2560_v21 = vld [vmem:[%s378_s20 + $0x8] sm:$0xff]   ;;  %s2208_s19 = sshll.u32 %s3055_s27, 5 }
  0x12   : > { %2387 = vmatprep.subr.bf16.mxu0 %v2546_v7  ;;  %v2555_v11 = vld [vmem:[%s2747_s15] sm:$0xff]   ;;  %2397 = vmatprep.mubr.bf16.mxu0 %v2557_v13  ;;  %v2559_v20 = vld [vmem:[%s2747_s15 + $0x8] sm:$0xff]   ;;  %s2786_s25 = scalar_lea.vmem %s3039_s0, %s2513_s16  ;;  %s2796_s11 = scalar_lea.vmem %s3041_s2, %s2208_s19 }
  0x13   : > { %2317 = vmatprep.mubr.bf16.mxu1 %v2555_v11  ;;  %v2575_v25 = vld [vmem:[%s2786_s25] ss:$8 sps:$4 sm:$0xff]   ;;  %v1121_v28 = vld [vmem:[%s2796_s11 + $0x4] sm:$0x1]  ;;  %v1123_v33 = vld [vmem:[%s2796_s11 + $0xc] sm:$0x1] }
  0x14   : > { %2308 = vmatpush3.bf16.msra.mxu1 %v2545_v6  ;;  %v1120_v27 = vld [vmem:[%s2796_s11] sm:$0xf]  ;;  %v1122_v29 = vld [vmem:[%s2796_s11 + $0x8] sm:$0xf]  ;;  %v1138_v34 = vshll.u32 %v1121_v28, 16  ;;  %v1152_v40 = vshll.u32 %v1123_v33, 16 }
  0x15   : > { %2388 = vmatpush3.bf16.msra.mxu0 %v2546_v7  ;;  %2309 = vmatprep.subr.bf16.mxu1 %v2547_v8  ;;  %v1129_v30 = vshrl.u32 %v1120_v27, 16  ;;  %v1132_v31 = vshll.u32 %v1120_v27, 16  ;;  %v1143_v35 = vshrl.u32 %v1122_v29, 16  ;;  %v1146_v36 = vshll.u32 %v1122_v29, 16  ;;  %v1124_v50 = vld [vmem:[%s2796_s11 + $0x10] sm:$0xf] }
  0x16   : > { %2389 = vmatprep.subr.bf16.mxu0 %v2548_v9  ;;  %v1140_v46 = vrot.slane %v1138_v34, 5  ;;  %v1154_v49 = vrot.slane %v1152_v40, 5  ;;  %v1125_v51 = vld [vmem:[%s2796_s11 + $0x14] sm:$0x1]  ;;  %v1126_v53 = vld [vmem:[%s2796_s11 + $0x18] sm:$0xf] }
  0x17   : > { %v1131_v38 = vrot.slane %v1129_v30, 4  ;;  %v1134_v39 = vrot.slane %v1132_v31, 5  ;;  %v1145_v42 = vrot.slane %v1143_v35, 4  ;;  %v1148_v43 = vrot.slane %v1146_v36, 5  ;;  %v1127_v54 = vld [vmem:[%s2796_s11 + $0x1c] sm:$0x1] }
  0x18   : > { %2310 = vmatpush3.bf16.msra.mxu1 %v2547_v8  ;;  %v1157_v55 = vshrl.u32 %v1124_v50, 16  ;;  %v1160_v57 = vshll.u32 %v1124_v50, 16  ;;  %v1171_v58 = vshrl.u32 %v1126_v53, 16  ;;  %v1166_v61 = vshll.u32 %v1125_v51, 16  ;;  %v2571_v7 = vld [vmem:[%s3043_s4 + $0x30] sm:$0xff]   ;;  %v2573_v11 = vld [vmem:[%s3043_s4 + $0x38] sm:$0xff]  }
  0x19   : > { %2390 = vmatpush3.bf16.msra.mxu0 %v2548_v9  ;;  %2311 = vmatprep.subr.bf16.mxu1 %v2549_v10  ;;  %v1135_v45 = vor.u32 %v1134_v39, %v1131_v38  ;;  %v1149_v48 = vor.u32 %v1148_v43, %v1145_v42  ;;  %v1174_v62 = vshll.u32 %v1126_v53, 16  ;;  %v1180_v6 = vshll.u32 %v1127_v54, 16  ;;  %v2579_v33 = vld [vmem:[%s3043_s4 + $0x88] sm:$0xff]   ;;  %v661_v53 = vld [vmem:[%s2786_s25 + $0x18] sm:$0xf] }
  0x1a   : > { %2391 = vmatprep.subr.bf16.mxu0 %v2550_v12  ;;  %v1159_v1 = vrot.slane %v1157_v55, 4  ;;  %v1162_v2 = vrot.slane %v1160_v57, 5  ;;  %v1173_v3 = vrot.slane %v1171_v58, 4  ;;  %v2594_v39 = vld [vmem:[%s2786_s25 + $0x8] ss:$8 sps:$4 sm:$0xff]   ;;  %v2584_v55 = vld [vmem:[%s3043_s4 + $0x198] sm:$0xff]  }
  0x1b   : > { %v1136_v52 = vrot.slane %v1135_v45, 4  ;;  %v1150_v56 = vrot.slane %v1149_v48, 4  ;;  %v1176_v5 = vrot.slane %v1174_v62, 5  ;;  %v1182_v13 = vrot.slane %v1180_v6, 5  ;;  %v660_v62 = vld [vmem:[%s2786_s25 + $0x14] sm:$0x1] }
  0x1c   : > { %2312 = vmatpush3.bf16.msra.mxu1 %v2549_v10  ;;  %v1163_v8 = vor.u32 %v1162_v2, %v1159_v1  ;;  %v2572_v10 = vld [vmem:[%s3043_s4 + $0x170] sm:$0xff]   ;;  %v704_v6 = vshll.u32 %v660_v62, 16 }
  0x1d   : > { %2392 = vmatpush3.bf16.msra.mxu0 %v2550_v12  ;;  %2313 = vmatprep.subr.bf16.mxu1 %v2551_v14  ;;  %v1141_v60 = vsel %vm2823_vm2, %v1136_v52, %v1140_v46  ;;  %v1155_v0 = vsel %vm2823_vm2, %v1150_v56, %v1154_v49  ;;  %v1177_v9 = vor.u32 %v1176_v5, %v1173_v3  ;;  %v1168_v12 = vrot.slane %v1166_v61, 5  ;;  %v2582_v46 = vld [vmem:[%s3043_s4 + $0x190] sm:$0xff]   ;;  %v2583_v49 = vld [vmem:[%s3043_s4 + $0x98] sm:$0xff]   ;;  %v2585_v56 = vld [vmem:[%s3043_s4 + $0xa0] sm:$0xff]  }
  0x1e   : > { %2393 = vmatprep.subr.bf16.mxu0 %v2552_v15  ;;  %v2099_v4 = vcombine.low %v1141_v60, %v1155_v0  ;;  %v659_v52 = vld [vmem:[%s2786_s25 + $0x10] sm:$0xf]  ;;  %v712_v60 = vshll.u32 %v661_v53, 16  ;;  %v2586_v61 = vld [vmem:[%s3043_s4 + $0x1a0] sm:$0xff]   ;;  %v2588_v5 = vld [vmem:[%s3043_s4 + $0x1a8] sm:$0xff]  }
  0x1f   : > { %v695_v57 = vshrl.u32 %v659_v52, 16  ;;  %v698_v58 = vshll.u32 %v659_v52, 16 }
  0x20   : > { %2314 = vmatpush3.bf16.msra.mxu1 %v2551_v14  ;;  %v1164_v14 = vrot.slane %v1163_v8, 4  ;;  %v714_v3 = vrot.slane %v712_v60, 5 }
  0x21   : > { %2394 = vmatpush3.bf16.msra.mxu0 %v2552_v15  ;;  %2315 = vmatprep.subr.bf16.mxu1 %v2553_v16  ;;  %v1178_v15 = vrot.slane %v1177_v9, 4  ;;  %v697_v0 = vrot.slane %v695_v57, 4  ;;  %v700_v1 = vrot.slane %v698_v58, 5 }
  0x22   : > { %2395 = vmatprep.subr.bf16.mxu0 %v2554_v17 }
  0x23   : > { %v701_v8 = vor.u32 %v700_v1, %v697_v0  ;;  %v2612_v0 = vld [vmem:[%s2796_s11 + $0x10] ss:$8 sps:$4 sm:$0xff]  }
  0x24   : > { %2316 = vmatpush3.bf16.msra.mxu1 %v2553_v16  ;;  %v2574_v16 = vld [vmem:[%s3043_s4 + $0x178] sm:$0xff]   ;;  %v2615_v1 = vld [vmem:[%s2747_s15 + $0xc] sm:$0xff]  }
  0x25   : > { %2396 = vmatpush3.bf16.msra.mxu0 %v2554_v17  ;;  %2321 = vmatprep.subr.bf16.mxu1 %v2556_v18  ;;  %v2576_v17 = vld [vmem:[%s3043_s4 + $0x80] sm:$0xff]  }
  0x26   : > { %2401 = vmatprep.subr.bf16.mxu0 %v2558_v19 }
  0x27   : > { %2318 = vmatmul.mubr.bf16.vlgmr.msra.gmra.mrb[0].mxu1 %v2559_v20  ;;  %v1169_v20 = vsel %vm2823_vm2, %v1164_v14, %v1168_v12  ;;  %v706_v12 = vrot.slane %v704_v6, 5  ;;  %v702_v14 = vrot.slane %v701_v8, 4  ;;  %v2173_v6 = vld [vmem:[%s2786_s25 + $0x18] sm:$0xf] }
  0x28   : > { %2322 = vmatpush3.bf16.msra.mxu1 %v2556_v18  ;;  %2398 = vmatmul.mubr.bf16.vlgmr.msra.gmra.mrb[0].mxu0 %v2560_v21  ;;  %v2577_v18 = vld [vmem:[%s3043_s4 + $0x180] sm:$0xff]   ;;  %v1183_v21 = vsel %vm2823_vm2, %v1178_v15, %v1182_v13  ;;  %v1621_v8 = vshrl.u32 %v2173_v6, 16 }
  0x29   : > { %2402 = vmatpush3.bf16.msra.mxu0 %v2558_v19  ;;  %2323 = vmatprep.subr.bf16.mxu1 %v2561_v22  ;;  %v2578_v19 = vld [vmem:[%s2786_s25 + $0x10] ss:$8 sps:$4 sm:$0xff]   ;;  %v2100_v30 = vcombine.low %v1169_v20, %v1183_v21  ;;  %v2593_v20 = vld [vmem:[%s3043_s4 + $0xc0] sm:$0xff]  }
  0x2a   : > { %2403 = vmatprep.subr.bf16.mxu0 %v2562_v23  ;;  %2337 = vmatprep.mubr.bf16.mxu1 %v2575_v25  ;;  %v658_v25 = vld [vmem:[%s2786_s25 + $0xc] sm:$0x1]  ;;  %v2595_v21 = vld [vmem:[%s3043_s4 + $0x1c0] sm:$0xff]  }
  0x2b   : > { %2417 = vmatprep.mubr.bf16.mxu0 %v2099_v4  ;;  %v2587_v4 = vld [vmem:[%s3043_s4 + $0xa8] sm:$0xff]  }
  0x2c   : > { %2324 = vmatpush3.bf16.msra.mxu1 %v2561_v22  ;;  %v655_v22 = vld [vmem:[%s2786_s25] sm:$0xf] }
  0x2d   : > { %2404 = vmatpush3.bf16.msra.mxu0 %v2562_v23  ;;  %2325 = vmatprep.subr.bf16.mxu1 %v2563_v24  ;;  %v656_v23 = vld [vmem:[%s2786_s25 + $0x4] sm:$0x1]  ;;  %v670_v27 = vshll.u32 %v655_v22, 16 }
  0x2e   : > { %2405 = vmatprep.subr.bf16.mxu0 %v2564_v26  ;;  %v676_v28 = vshll.u32 %v656_v23, 16  ;;  %v2596_v23 = vld [vmem:[%s2786_s25 + $0x18] ss:$8 sps:$4 sm:$0xff]  }
  0x2f   : > { %v672_v35 = vrot.slane %v670_v27, 5  ;;  %v2613_v27 = vld [vmem:[%s2747_s15 + $0x4] sm:$0xff]   ;;  %s387_s15 = scalar_lea.vmem %s3047_s8, %s2208_s19 }
  0x30   : > { %2326 = vmatpush3.bf16.msra.mxu1 %v2563_v24  ;;  %v657_v24 = vld [vmem:[%s2786_s25 + $0x8] sm:$0xf] }
  0x31   : > { %2406 = vmatpush3.bf16.msra.mxu0 %v2564_v26  ;;  %2327 = vmatprep.subr.bf16.mxu1 %v2565_v32  ;;  %v667_v26 = vshrl.u32 %v655_v22, 16  ;;  %v681_v29 = vshrl.u32 %v657_v24, 16  ;;  %v684_v31 = vshll.u32 %v657_v24, 16  ;;  %v2597_v24 = vld [vmem:[%s3043_s4 + $0xc8] sm:$0xff]  }
  0x32   : > { %2407 = vmatprep.subr.bf16.mxu0 %v2566_v37 }
  0x33   : > { %v669_v34 = vrot.slane %v667_v26, 4  ;;  %v683_v36 = vrot.slane %v681_v29, 4  ;;  %v686_v38 = vrot.slane %v684_v31, 5  ;;  %v2611_v26 = vld [vmem:[%s2796_s11] ss:$8 sps:$4 sm:$0xff]   ;;  %v2600_v29 = vld [vmem:[%s3043_s4 + $0x1d0] sm:$0xff]  }
  0x34   : > { %2328 = vmatpush3.bf16.msra.mxu1 %v2565_v32  ;;  %v690_v32 = vshll.u32 %v658_v25, 16  ;;  %v2598_v25 = vld [vmem:[%s3043_s4 + $0x1c8] sm:$0xff]   ;;  %v2602_v31 = vld [vmem:[%s3043_s4 + $0x1d8] sm:$0xff]  }
  0x35   : > { %2408 = vmatpush3.bf16.msra.mxu0 %v2566_v37  ;;  %2329 = vmatprep.subr.bf16.mxu1 %v2567_v41  ;;  %v2580_v37 = vld [vmem:[%s3043_s4 + $0x188] sm:$0xff]   ;;  %v673_v40 = vor.u32 %v672_v35, %v669_v34  ;;  %v687_v42 = vor.u32 %v686_v38, %v683_v36  ;;  %v2603_v34 = vld [vmem:[%s3043_s4 + $0xe0] sm:$0xff]  }
  0x36   : > { %2409 = vmatprep.subr.bf16.mxu0 %v2568_v44  ;;  %v692_v43 = vrot.slane %v690_v32, 5  ;;  %v2169_v32 = vld [vmem:[%s2786_s25 + $0x8] sm:$0xf]  ;;  %v2604_v35 = vld [vmem:[%s3043_s4 + $0x1e0] sm:$0xff]  }
  0x37   : > { %v674_v45 = vrot.slane %v673_v40, 4  ;;  %v688_v48 = vrot.slane %v687_v42, 4  ;;  %v1593_v36 = vshrl.u32 %v2169_v32, 16  ;;  %v2605_v40 = vld [vmem:[%s3043_s4 + $0xe8] sm:$0xff]  }
  0x38   : > { %2330 = vmatpush3.bf16.msra.mxu1 %v2567_v41  ;;  %v678_v41 = vrot.slane %v676_v28, 5  ;;  %v2599_v28 = vld [vmem:[%s3043_s4 + $0xd0] sm:$0xff]  }
  0x39   : > { %2410 = vmatpush3.bf16.msra.mxu0 %v2568_v44  ;;  %2331 = vmatprep.subr.bf16.mxu1 %v2569_v59  ;;  %v2581_v44 = vld [vmem:[%s3043_s4 + $0x90] sm:$0xff]   ;;  %v693_v51 = vsel %vm2823_vm2, %v688_v48, %v692_v43  ;;  %v1595_v42 = vrot.slane %v1593_v36, 4 }
  0x3a   : > { %2411 = vmatprep.subr.bf16.mxu0 %v2570_v63  ;;  %v679_v50 = vsel %vm2823_vm2, %v674_v45, %v678_v41  ;;  %v2606_v41 = vld [vmem:[%s3043_s4 + $0x1e8] sm:$0xff]   ;;  %v2172_v48 = vld [vmem:[%s2786_s25 + $0x14] sm:$0x1] }
  0x3b   : > { %v2021_v54 = vcombine.low %v679_v50, %v693_v51  ;;  %v2608_v50 = vld [vmem:[%s3043_s4 + $0x1f0] sm:$0xff]  }
  0x3c   : > { %2332 = vmatpush3.bf16.msra.mxu1 %v2569_v59  ;;  %v709_v59 = vshrl.u32 %v661_v53, 16 }
  0x3d   : > { %2412 = vmatpush3.bf16.msra.mxu0 %v2570_v63  ;;  %2333 = vmatprep.subr.bf16.mxu1 %v2571_v7  ;;  %v662_v63 = vld [vmem:[%s2786_s25 + $0x1c] sm:$0x1] }
  0x3e   : > { %2413 = vmatprep.subr.bf16.mxu0 %v2572_v10  ;;  %v711_v2 = vrot.slane %v709_v59, 4 }
  0x40   : > { %2334 = vmatpush3.bf16.msra.mxu1 %v2571_v7  ;;  %v718_v7 = vshll.u32 %v662_v63, 16  ;;  %v715_v9 = vor.u32 %v714_v3, %v711_v2  ;;  %v2616_v3 = vld [vmem:[%s3043_s4 + $0x208] sm:$0xff]  }
  0x41   : > { %2414 = vmatpush3.bf16.msra.mxu0 %v2572_v10  ;;  %2335 = vmatprep.subr.bf16.mxu1 %v2573_v11  ;;  %v2589_v10 = vld [vmem:[%s3043_s4 + $0xb0] sm:$0xff]  }
  0x42   : > { %2415 = vmatprep.subr.bf16.mxu0 %v2574_v16  ;;  %v720_v13 = vrot.slane %v718_v7, 5  ;;  %v716_v15 = vrot.slane %v715_v9, 4  ;;  %v2175_v7 = vld [vmem:[%s2786_s25 + $0x20] sm:$0xf]  ;;  %v1624_v9 = vshll.u32 %v2173_v6, 16 }
  0x44   : > { %2336 = vmatpush3.bf16.msra.mxu1 %v2573_v11  ;;  %v2590_v11 = vld [vmem:[%s3043_s4 + $0x1b0] sm:$0xff]  }
  0x45   : > { %2416 = vmatpush3.bf16.msra.mxu0 %v2574_v16  ;;  %2341 = vmatprep.subr.bf16.mxu1 %v2576_v17  ;;  %v2591_v16 = vld [vmem:[%s3043_s4 + $0xb8] sm:$0xff]  }
  0x46   : > { %2421 = vmatprep.subr.bf16.mxu0 %v2577_v18 }
  0x47   : > { %2338 = vmatmul.mubr.bf16.vlgmr.msra.gmra.mrb[0].mxu1 %v2578_v19  ;;  %v721_v19 = vsel %vm2823_vm2, %v716_v15, %v720_v13  ;;  %v1623_v13 = vrot.slane %v1621_v8, 4 }
  0x48   : > { %2342 = vmatpush3.bf16.msra.mxu1 %v2576_v17  ;;  %2418 = vmatmul.mubr.bf16.vlgmr.msra.gmra.mrb[0].mxu0 %v2100_v30  ;;  %v2592_v17 = vld [vmem:[%s3043_s4 + $0x1b8] sm:$0xff]  }
  0x49   : > { %2422 = vmatpush3.bf16.msra.mxu0 %v2577_v18  ;;  %2343 = vmatprep.subr.bf16.mxu1 %v2579_v33  ;;  %v707_v18 = vsel %vm2823_vm2, %v702_v14, %v706_v12  ;;  %v2601_v30 = vld [vmem:[%s3043_s4 + $0xd8] sm:$0xff]   ;;  %v2619_v12 = vld [vmem:[%s3043_s4 + $0x220] sm:$0xff]   ;;  %v1626_v14 = vrot.slane %v1624_v9, 5 }
  0x4a   : > { %2423 = vmatprep.subr.bf16.mxu0 %v2580_v37  ;;  %2437 = vmatprep.mubr.bf16.mxu0 %v2594_v39  ;;  %v2022_v22 = vcombine.low %v707_v18, %v721_v19  ;;  %v2174_v18 = vld [vmem:[%s2786_s25 + $0x1c] sm:$0x1]  ;;  %v2176_v19 = vld [vmem:[%s2786_s25 + $0x24] sm:$0x1] }
  0x4b   : > { %2357 = vmatprep.mubr.bf16.mxu1 %v2021_v54  ;;  %v1616_v54 = vshll.u32 %v2172_v48, 16 }
  0x4c   : > { %2344 = vmatpush3.bf16.msra.mxu1 %v2579_v33  ;;  %v2171_v33 = vld [vmem:[%s2786_s25 + $0x10] sm:$0xf] }
  0x4d   : > { %2424 = vmatpush3.bf16.msra.mxu0 %v2580_v37  ;;  %2345 = vmatprep.subr.bf16.mxu1 %v2581_v44  ;;  %v1596_v37 = vshll.u32 %v2169_v32, 16  ;;  %v1607_v38 = vshrl.u32 %v2171_v33, 16  ;;  %v1610_v39 = vshll.u32 %v2171_v33, 16  ;;  %v1618_v60 = vrot.slane %v1616_v54, 5  ;;  %v2205_v54 = vld [vmem:[%s3046_s7] ss:$0 sm:$0xff] }
  0x4e   : > { %2425 = vmatprep.subr.bf16.mxu0 %v2582_v46 }
  0x4f   : > { %v1598_v43 = vrot.slane %v1596_v37, 5  ;;  %v1612_v45 = vrot.slane %v1610_v39, 5 }
  0x50   : > { %2346 = vmatpush3.bf16.msra.mxu1 %v2581_v44  ;;  %v1609_v44 = vrot.slane %v1607_v38, 4  ;;  %v2203_v38 = vld [vmem:[%s3044_s5] ss:$0 sm:$0xff] }
  0x51   : > { %2426 = vmatpush3.bf16.msra.mxu0 %v2582_v46  ;;  %2347 = vmatprep.subr.bf16.mxu1 %v2583_v49  ;;  %v2170_v46 = vld [vmem:[%s2786_s25 + $0xc] sm:$0x1]  ;;  %v1599_v51 = vor.u32 %v1598_v43, %v1595_v42 }
  0x52   : > { %2427 = vmatprep.subr.bf16.mxu0 %v2584_v55  ;;  %v1602_v52 = vshll.u32 %v2170_v46, 16  ;;  %v1613_v53 = vor.u32 %v1612_v45, %v1609_v44 }
  0x53   : > { %v1600_v57 = vrot.slane %v1599_v51, 4 }
  0x54   : > { %2348 = vmatpush3.bf16.msra.mxu1 %v2583_v49  ;;  %v2607_v49 = vld [vmem:[%s3043_s4 + $0xf0] sm:$0xff]   ;;  %v1604_v58 = vrot.slane %v1602_v52, 5  ;;  %v1614_v59 = vrot.slane %v1613_v53, 4 }
  0x55   : > { %2428 = vmatpush3.bf16.msra.mxu0 %v2584_v55  ;;  %2349 = vmatprep.subr.bf16.mxu1 %v2585_v56  ;;  %v2609_v55 = vld [vmem:[%s3043_s4 + $0xf8] sm:$0xff]  }
  0x56   : > { %2429 = vmatprep.subr.bf16.mxu0 %v2586_v61  ;;  %v1605_v62 = vsel %vm2823_vm2, %v1600_v57, %v1604_v58  ;;  %v1619_v63 = vsel %vm2823_vm2, %v1614_v59, %v1618_v60 }
  0x57   : > { %v2193_v2 = vcombine.low %v1605_v62, %v1619_v63 }
  0x58   : > { %2350 = vmatpush3.bf16.msra.mxu1 %v2585_v56  ;;  %v2610_v56 = vld [vmem:[%s3043_s4 + $0x1f8] sm:$0xff]  }
  0x59   : > { %2430 = vmatpush3.bf16.msra.mxu0 %v2586_v61  ;;  %2351 = vmatprep.subr.bf16.mxu1 %v2587_v4  ;;  %v2614_v61 = vld [vmem:[%s3043_s4 + $0x200] sm:$0xff]  }
  0x5a   : > { %2431 = vmatprep.subr.bf16.mxu0 %v2588_v5 }
  0x5c   : > { %2352 = vmatpush3.bf16.msra.mxu1 %v2587_v4  ;;  %v2617_v4 = vld [vmem:[%s3043_s4 + $0x210] sm:$0xff]  }
  0x5d   : > { %2432 = vmatpush3.bf16.msra.mxu0 %v2588_v5  ;;  %2353 = vmatprep.subr.bf16.mxu1 %v2589_v10  ;;  %v2618_v5 = vld [vmem:[%s3043_s4 + $0x218] sm:$0xff]  }
  0x5e   : > { %2433 = vmatprep.subr.bf16.mxu0 %v2590_v11 }
  0x60   : > { %2354 = vmatpush3.bf16.msra.mxu1 %v2589_v10  ;;  %v1635_v10 = vshrl.u32 %v2175_v7, 16 }
  0x61   : > { %2434 = vmatpush3.bf16.msra.mxu0 %v2590_v11  ;;  %2355 = vmatprep.subr.bf16.mxu1 %v2591_v16  ;;  %v1638_v11 = vshll.u32 %v2175_v7, 16 }
  0x62   : > { %2435 = vmatprep.subr.bf16.mxu0 %v2592_v17  ;;  %v1637_v15 = vrot.slane %v1635_v10, 4 }
  0x64   : > { %2356 = vmatpush3.bf16.msra.mxu1 %v2591_v16  ;;  %v1640_v16 = vrot.slane %v1638_v11, 5 }
  0x65   : > { %2436 = vmatpush3.bf16.msra.mxu0 %v2592_v17  ;;  %2361 = vmatprep.subr.bf16.mxu1 %v2593_v20  ;;  %v2620_v17 = vld [vmem:[%s3043_s4 + $0x228] sm:$0xff]  }
  0x66   : > { %2441 = vmatprep.subr.bf16.mxu0 %v2595_v21 }
  0x67   : > { %2358 = vmatmul.mubr.bf16.vlgmr.msra.gmra.mrb[0].mxu1 %v2022_v22  ;;  %v1641_v22 = vor.u32 %v1640_v16, %v1637_v15 }
  0x68   : > { %2362 = vmatpush3.bf16.msra.mxu1 %v2593_v20  ;;  %2438 = vmatmul.mubr.bf16.vlgmr.msra.gmra.mrb[0].mxu0 %v2596_v23  ;;  %v1627_v20 = vor.u32 %v1626_v14, %v1623_v13  ;;  %v1644_v23 = vshll.u32 %v2176_v19, 16 }
  0x69   : > { %2442 = vmatpush3.bf16.msra.mxu0 %v2595_v21  ;;  %2363 = vmatprep.subr.bf16.mxu1 %v2597_v24  ;;  %v1630_v21 = vshll.u32 %v2174_v18, 16 }
  0x6a   : > { %2443 = vmatprep.subr.bf16.mxu0 %v2598_v25  ;;  %2377 = vmatprep.mubr.bf16.mxu1 %v2611_v26 }
  0x6b   : > { %2457 = vmatprep.mubr.bf16.mxu0 %v2613_v27  ;;  %v1632_v26 = vrot.slane %v1630_v21, 5  ;;  %v1642_v27 = vrot.slane %v1641_v22, 4 }
  0x6c   : > { %2364 = vmatpush3.bf16.msra.mxu1 %v2597_v24  ;;  %v2621_v24 = vld [vmem:[%s3043_s4 + $0x230] sm:$0xff]  }
  0x6d   : > { %2444 = vmatpush3.bf16.msra.mxu0 %v2598_v25  ;;  %2365 = vmatprep.subr.bf16.mxu1 %v2599_v28  ;;  %v1628_v25 = vrot.slane %v1627_v20, 4 }
  0x6e   : > { %2445 = vmatprep.subr.bf16.mxu0 %v2600_v29 }
  0x70   : > { %2366 = vmatpush3.bf16.msra.mxu1 %v2599_v28  ;;  %v1646_v28 = vrot.slane %v1644_v23, 5 }
  0x71   : > { %2446 = vmatpush3.bf16.msra.mxu0 %v2600_v29  ;;  %2367 = vmatprep.subr.bf16.mxu1 %v2601_v30  ;;  %v2622_v29 = vld [vmem:[%s3043_s4 + $0x238] sm:$0xff]  }
  0x72   : > { %2447 = vmatprep.subr.bf16.mxu0 %v2602_v31 }
  0x74   : > { %2368 = vmatpush3.bf16.msra.mxu1 %v2601_v30  ;;  %v1633_v30 = vsel %vm2823_vm2, %v1628_v25, %v1632_v26 }
  0x75   : > { %2448 = vmatpush3.bf16.msra.mxu0 %v2602_v31  ;;  %2369 = vmatprep.subr.bf16.mxu1 %v2603_v34  ;;  %v1647_v31 = vsel %vm2823_vm2, %v1642_v27, %v1646_v28 }
  0x76   : > { %2449 = vmatprep.subr.bf16.mxu0 %v2604_v35  ;;  %v2194_v32 = vcombine.low %v1633_v30, %v1647_v31 }
  0x78   : > { %2370 = vmatpush3.bf16.msra.mxu1 %v2603_v34 }
  0x79   : > { %2450 = vmatpush3.bf16.msra.mxu0 %v2604_v35  ;;  %2371 = vmatprep.subr.bf16.mxu1 %v2605_v40 }
  0x7a   : > { %2451 = vmatprep.subr.bf16.mxu0 %v2606_v41 }
  0x7c   : > { %2372 = vmatpush3.bf16.msra.mxu1 %v2605_v40 }
  0x7d   : > { %2452 = vmatpush3.bf16.msra.mxu0 %v2606_v41  ;;  %2373 = vmatprep.subr.bf16.mxu1 %v2607_v49 }
  0x7e   : > { %2453 = vmatprep.subr.bf16.mxu0 %v2608_v50 }
  0x80   : > { %2374 = vmatpush3.bf16.msra.mxu1 %v2607_v49  ;;  %v2204_v49 = vld [vmem:[%s3045_s6] ss:$0 sm:$0xff] }
  0x81   : > { %2454 = vmatpush3.bf16.msra.mxu0 %v2608_v50  ;;  %2375 = vmatprep.subr.bf16.mxu1 %v2609_v55 }
  0x82   : > { %2455 = vmatprep.subr.bf16.mxu0 %v2610_v56 }
  0x84   : > { %2376 = vmatpush3.bf16.msra.mxu1 %v2609_v55 }
  0x85   : > { %2456 = vmatpush3.bf16.msra.mxu0 %v2610_v56 }
  0x86   : > { %2461 = vmatprep.subr.bf16.mxu0 %v2614_v61 }
  0x87   : > { %2378 = vmatmul.mubr.bf16.vlgmr.msra.gmra.mrb[0].mxu1 %v2612_v0 }
  0x88   : > { %2458 = vmatmul.mubr.bf16.vlgmr.msra.gmra.mrb[0].mxu0 %v2615_v1 }
  0x89   : > { %2462 = vmatpush3.bf16.msra.mxu0 %v2614_v61  ;;  %2477 = vmatprep.mubr.bf16.mxu0 %v2193_v2 }
  0x8a   : > { %2463 = vmatprep.subr.bf16.mxu0 %v2616_v3 }
  0x8d   : > { %2464 = vmatpush3.bf16.msra.mxu0 %v2616_v3 }
  0x8e   : > { %2465 = vmatprep.subr.bf16.mxu0 %v2617_v4 }
  0x91   : > { %2466 = vmatpush3.bf16.msra.mxu0 %v2617_v4 }
  0x92   : > { %2467 = vmatprep.subr.bf16.mxu0 %v2618_v5 }
  0x95   : > { %2468 = vmatpush3.bf16.msra.mxu0 %v2618_v5 }
  0x96   : > { %2469 = vmatprep.subr.bf16.mxu0 %v2619_v12 }
  0x99   : > { %2470 = vmatpush3.bf16.msra.mxu0 %v2619_v12 }
  0x9a   : > { %2471 = vmatprep.subr.bf16.mxu0 %v2620_v17 }
  0x9d   : > { %2472 = vmatpush3.bf16.msra.mxu0 %v2620_v17 }
  0x9e   : > { %2473 = vmatprep.subr.bf16.mxu0 %v2621_v24 }
  0xa1   : > { %2474 = vmatpush3.bf16.msra.mxu0 %v2621_v24 }
  0xa2   : > { %2475 = vmatprep.subr.bf16.mxu0 %v2622_v29 }
  0xa5   : > { %2476 = vmatpush3.bf16.msra.mxu0 %v2622_v29 }
  0xa8   : > { %2478 = vmatmul.mubr.bf16.vlgmr.msra.gmra.mrb[0].mxu0 %v2194_v32 }
 0x15a   : > { %v2379_v33 = vpop.f32.mrb[0].mxu1 }
 0x15b   : > { %v965_v34 = vpop.f32.mrb[1].mxu1 }
 0x15c   : > { %v2380_v35 = vpop.f32.mrb[2].mxu1 }
 0x15d   : > { %v968_v36 = vpop.f32.mrb[3].mxu1 }
 0x17b   : > { %v2479_v37 = vpop.f32.mrb[0].mxu0 }
 0x17c   : > { %v2481_v39 = vadd.f32 %v2479_v37, %v2379_v33  ;;  %v1755_v40 = vpop.f32.mrb[1].mxu0 }
 0x17d   : > { %v2482_v41 = vadd.f32 %v1755_v40, %v965_v34  ;;  %v2480_v42 = vpop.f32.mrb[2].mxu0 }
 0x17e   : > { %v1783_v43 = vadd.f32 %v2481_v39, %v2203_v38  ;;  %v2483_v47 = vadd.f32 %v2480_v42, %v2380_v35  ;;  %v1758_v44 = vpop.f32.mrb[3].mxu0 }
 0x17f   : > { %v1781_v45 = vadd.f32 %v2482_v41, %v2203_v38  ;;  %v2484_v46 = vadd.f32 %v1758_v44, %v968_v36 }
 0x180   : > { %vm1787_vm3 = vcmp.ge.f32.partialorder %v1783_v43, 0.0  ;;  %v1791_v48 = vmul.f32 0.2, %v1783_v43  ;;  %v1784_v50 = vadd.f32 %v2483_v47, %v2203_v38 }
 0x181   : > { %vm1785_vm4 = vcmp.ge.f32.partialorder %v1781_v45, 0.0  ;;  %v1789_v51 = vmul.f32 0.2, %v1781_v45  ;;  %v1782_v52 = vadd.f32 %v2484_v46, %v2203_v38 }
 0x182   : > { %v1795_v53 = vsel %vm1787_vm3, %v1783_v43, %v1791_v48  ;;  %vm1788_vm5 = vcmp.ge.f32.partialorder %v1784_v50, 0.0  ;;  %v1792_v55 = vmul.f32 0.2, %v1784_v50 }
 0x183   : > { %v1806_v56 = vmul.f32 %v2204_v49, %v1795_v53  ;;  %v1793_v57 = vsel %vm1785_vm4, %v1781_v45, %v1789_v51  ;;  %vm1786_vm6 = vcmp.ge.f32.partialorder %v1782_v52, 0.0  ;;  %v1790_v58 = vmul.f32 0.2, %v1782_v52 }
 0x184   : > { %v1804_v59 = vmul.f32 %v2204_v49, %v1793_v57  ;;  %v1796_v60 = vsel %vm1788_vm5, %v1784_v50, %v1792_v55 }
 0x185   : > { %v1817_v61 = vadd.f32 %v2205_v54, %v1806_v56  ;;  %v1807_v62 = vmul.f32 %v2204_v49, %v1796_v60  ;;  %v1794_v63 = vsel %vm1786_vm6, %v1782_v52, %v1790_v58 }
 0x186   : > { %v1815_v0 = vadd.f32 %v2205_v54, %v1804_v59  ;;  %v1805_v1 = vmul.f32 %v2204_v49, %v1794_v63 }
 0x187   : > { %1821 = vst [vmem:[%s387_s15 + $0x10] sm:$0xff] %v1817_v61  ;;  %v1818_v2 = vadd.f32 %v2205_v54, %v1807_v62 }
 0x188   : > { %1819 = vst [vmem:[%s387_s15] sm:$0xff] %v1815_v0  ;;  %v1816_v3 = vadd.f32 %v2205_v54, %v1805_v1 }
 0x189   : > { %1822 = vst [vmem:[%s387_s15 + $0x18] sm:$0xff] %v1818_v2 }
 0x18a   : > { %1820 = vst [vmem:[%s387_s15 + $0x8] sm:$0xff] %v1816_v3 }
 0x18b PF: > { %s18_s29 = sadd.s32 1, %s2645_s29   ;;  %s3050_s27 = smov %s2641_s28 }
 0x18c   : > { %p15_p5 = scmp.ge.s32.totalorder %s18_s29, 4   ;;  %s3051_s28 = smov %s3053_s30 }
 0x18e   :  { %17 = sbr.rel (!%p15_p5) target bundleno = 2 (0x2), region = 105 }

// kernel: disc2d_forward.6
= control target key start
LH: loop header
LB: loop body
LE: loop exit
PB: predicated region body
PF: predicated region fallthrough
CT: control target
= control target key end

     0   :  { %s2376_s27 = smov 0   ;;  %s2378_s28 = smov 0   ;;  %s2789_s0 = inlined_call_operand.vmem [shape: bf16[2,3,9,128], index: 0, kind: input, shape index: {}]   ;;  %s2790_s1 = inlined_call_operand.vmem [shape: bf16[2,3,8,128], index: 1, kind: input, shape index: {}]   ;;  %s2791_s2 = inlined_call_operand.vmem [shape: bf16[2,2,9,128], index: 2, kind: input, shape index: {}]   ;;  %s2792_s3 = inlined_call_operand.vmem [shape: bf16[2,2,8,128], index: 3, kind: input, shape index: {}]   ;;  %s2793_s4 = inlined_call_operand.vmem [shape: bf16[9,128,128], index: 4, kind: input, shape index: {}]   ;;  %s2794_s5 = inlined_call_operand.vmem [shape: f32[1,128], index: 5, kind: input, shape index: {}]   ;;  %s2795_s6 = inlined_call_operand.vmem [shape: f32[1,128], index: 6, kind: input, shape index: {}]   ;;  %s2796_s7 = inlined_call_operand.vmem [shape: f32[1,128], index: 7, kind: input, shape index: {}]   ;;  %s2797_s8 = inlined_call_operand.vmem [shape: f32[2,16,128], index: 8, kind: output, shape index: {}]  }
   0x1   :  { %s2380_s29 = smov 0  }
   0x2 LB: > { %s30_s30 = sadd.s32 1, %s2323_s28  ;;  %p1704_p0 = scmp.ge.s32.totalorder %s2327_s29, 1  ;;  %s2327_s29 = sphi %s2380_s29, %s18_s29   ;;  %s2323_s28 = sphi %s2378_s28, %s2801_s28   ;;  %s2319_s27 = sphi %s2376_s27, %s2800_s27  }
   0x3   : > { %p32_p1 = scmp.ge.s32.totalorder %s30_s30, 2  ;;  %p306_p2 = scmp.lt.s32.totalorder %s2327_s29, 3 }
   0x5   : > { %s2803_s30 = smov (%p32_p1, %s30_s30), 0  ;;  %p307_p3 = pnand %p1704_p0, %p306_p2 }
   0x6   : > { %v2227_v0 = vld [vmem:[%s2793_s4 + $0x40] sm:$0xff] (!%p307_p3)   ;;  %v2329_v1 = vmov (!%p307_p3), 0.0   ;;  %v2229_v3 = vld [vmem:[%s2793_s4 + $0x48] sm:$0xff] (!%p307_p3)   ;;  %vm2330_vm0 = vmmov (!%p307_p3), 0   ;;  %p359_p4 = scmp.lt.s32.totalorder (!%p307_p3), %s2319_s27, 1  ;;  %v2231_v5 = vld [vmem:[%s2793_s4 + $0x50] sm:$0xff] (!%p307_p3)  }
   0x7   : > { %310 = sbr.rel (%p307_p3) target bundleno = 393 (0x189), region = 52  ;;  %2019 = vmatprep.subr.bf16.mxu0 (!%p307_p3), %v2329_v1  ;;  %2039 = vmatprep.subr.bf16.mxu1 (!%p307_p3), %v2329_v1  ;;  %v2228_v2 = vld [vmem:[%s2793_s4] sm:$0xff] (!%p307_p3)   ;;  %v2230_v4 = vld [vmem:[%s2793_s4 + $0x8] sm:$0xff] (!%p307_p3)   ;;  %v2232_v6 = vld [vmem:[%s2793_s4 + $0x10] sm:$0xff] (!%p307_p3)   ;;  %vm627_vm1 = vsmask.f32 (!%p307_p3), 3328 }
   0x8   : > { %2020 = vmatpush3.bf16.msra.mxu0 (!%p307_p3), %v2227_v0  ;;  %2035 = vmatprep.mubr.msk.bf16.mxu0 (!%p307_p3), %vm2330_vm0, %v2329_v1  ;;  %v2233_v7 = vld [vmem:[%s2793_s4 + $0x58] sm:$0xff] (!%p307_p3)   ;;  %v2235_v9 = vld [vmem:[%s2793_s4 + $0x60] sm:$0xff] (!%p307_p3)   ;;  %v2237_v11 = vld [vmem:[%s2793_s4 + $0x68] sm:$0xff] (!%p307_p3)   ;;  %vm628_vm2 = vsmask.f32 (!%p307_p3), 7440 }
   0x9   : > { %2040 = vmatpush3.bf16.msra.mxu1 (!%p307_p3), %v2228_v2  ;;  %2021 = vmatprep.subr.bf16.mxu0 (!%p307_p3), %v2329_v1  ;;  %v2234_v8 = vld [vmem:[%s2793_s4 + $0x18] sm:$0xff] (!%p307_p3)   ;;  %v2236_v10 = vld [vmem:[%s2793_s4 + $0x20] sm:$0xff] (!%p307_p3)   ;;  %v2238_v12 = vld [vmem:[%s2793_s4 + $0x28] sm:$0xff] (!%p307_p3)  }
   0xa   : > { %2041 = vmatprep.subr.bf16.mxu1 (!%p307_p3), %v2329_v1  ;;  %2055 = vmatprep.mubr.msk.bf16.mxu1 (!%p307_p3), %vm2330_vm0, %v2329_v1  ;;  %v2239_v13 = vld [vmem:[%s2793_s4 + $0x70] sm:$0xff] (!%p307_p3)   ;;  %v2241_v15 = vld [vmem:[%s2793_s4 + $0x78] sm:$0xff] (!%p307_p3)   ;;  %v2245_v19 = vld [vmem:[%s2793_s4 + $0x80] sm:$0xff] (!%p307_p3)  }
   0xb   : > { %v2240_v14 = vld [vmem:[%s2793_s4 + $0x30] sm:$0xff] (!%p307_p3)   ;;  %v2242_v16 = vld [vmem:[%s2793_s4 + $0x38] sm:$0xff] (!%p307_p3)   ;;  %v2246_v20 = vld [vmem:[%s2793_s4 + $0xc0] sm:$0xff] (!%p307_p3)  }
   0xc   : > { %2022 = vmatpush3.bf16.msra.mxu0 (!%p307_p3), %v2229_v3  ;;  %v2247_v21 = vld [vmem:[%s2793_s4 + $0x88] sm:$0xff] (!%p307_p3)   ;;  %v2249_v23 = vld [vmem:[%s2793_s4 + $0x90] sm:$0xff] (!%p307_p3)   ;;  %v2251_v27 = vld [vmem:[%s2793_s4 + $0x98] sm:$0xff] (!%p307_p3)  }
   0xd   : > { %2042 = vmatpush3.bf16.msra.mxu1 (!%p307_p3), %v2230_v4  ;;  %2023 = vmatprep.subr.bf16.mxu0 (!%p307_p3), %v2329_v1  ;;  %v2248_v22 = vld [vmem:[%s2793_s4 + $0xc8] sm:$0xff] (!%p307_p3)   ;;  %v2250_v25 = vld [vmem:[%s2793_s4 + $0xd0] sm:$0xff] (!%p307_p3)   ;;  %v2252_v32 = vld [vmem:[%s2793_s4 + $0xd8] sm:$0xff] (!%p307_p3)  }
   0xe   : > { %s2805_s27 = smov (!%p359_p4, %s2319_s27), 1  ;;  %2043 = vmatprep.subr.bf16.mxu1 %v2329_v1  ;;  %v2253_v33 = vld [vmem:[%s2793_s4 + $0xa0] sm:$0xff]   ;;  %v2255_v41 = vld [vmem:[%s2793_s4 + $0xa8] sm:$0xff]   ;;  %v2257_v47 = vld [vmem:[%s2793_s4 + $0xb0] sm:$0xff]  }
   0xf   : > { %s2200_s25 = smul.u32 12, %s2805_s27  ;;  %s1935_s21 = sshll.u32 %s2805_s27, 4  ;;  %v2254_v40 = vld [vmem:[%s2793_s4 + $0xe0] sm:$0xff]   ;;  %v2256_v44 = vld [vmem:[%s2793_s4 + $0xe8] sm:$0xff]   ;;  %v2258_v48 = vld [vmem:[%s2793_s4 + $0xf0] sm:$0xff]  }
  0x10   : > { %2024 = vmatpush3.bf16.msra.mxu0 %v2231_v5  ;;  %s2199_s26 = smul.u32 24, %s2805_s27  ;;  %s1936_s11 = sshll.u32 %s2805_s27, 3  ;;  %vm2559_vm3 = vmor %vm627_vm1, %vm628_vm2  ;;  %v2259_v54 = vld [vmem:[%s2793_s4 + $0xb8] sm:$0xff]   ;;  %v2261_v59 = vld [vmem:[%s2793_s4 + $0x100] sm:$0xff]  }
  0x11   : > { %2044 = vmatpush3.bf16.msra.mxu1 %v2232_v6  ;;  %2025 = vmatprep.subr.bf16.mxu0 %v2329_v1  ;;  %s2448_s15 = scalar_lea.vmem %s2790_s1, %s2200_s25  ;;  %s2556_s20 = scalar_lea.vmem %s2792_s3, %s1936_s11  ;;  %v2260_v57 = vld [vmem:[%s2793_s4 + $0xf8] sm:$0xff]   ;;  %v2263_v61 = vld [vmem:[%s2793_s4 + $0x140] sm:$0xff]   ;;  %v2264_v62 = vld [vmem:[%s2793_s4 + $0x108] sm:$0xff]  }
  0x12   : > { %2045 = vmatprep.subr.bf16.mxu1 %v2329_v1  ;;  %s2454_s18 = scalar_lea.vmem %s2789_s0, %s2199_s26  ;;  %v2243_v17 = vld [vmem:[%s2448_s15] sm:$0xff]   ;;  %s2508_s26 = scalar_lea.vmem %s2791_s2, %s1935_s21  ;;  %v2265_v63 = vld [vmem:[%s2793_s4 + $0x148] sm:$0xff]   ;;  %v2266_v0 = vld [vmem:[%s2793_s4 + $0x110] sm:$0xff]  }
  0x13   : > { %v2244_v18 = vld [vmem:[%s2454_s18] ss:$8 sps:$4 sm:$0xff]   ;;  %v624_v34 = vld [vmem:[%s2454_s18 + $0x4] sm:$0x1]  ;;  %v626_v35 = vld [vmem:[%s2454_s18 + $0xc] sm:$0x1]  ;;  %s387_s24 = scalar_lea.vmem %s2797_s8, %s1935_s21 }
  0x14   : > { %2026 = vmatpush3.bf16.msra.mxu0 %v2233_v7  ;;  %v623_v24 = vld [vmem:[%s2454_s18] sm:$0xf]  ;;  %v625_v26 = vld [vmem:[%s2454_s18 + $0x8] sm:$0xf]  ;;  %v640_v42 = vshll.u32 %v624_v34, 16  ;;  %v654_v43 = vshll.u32 %v626_v35, 16 }
  0x15   : > { %2046 = vmatpush3.bf16.msra.mxu1 %v2234_v8  ;;  %2027 = vmatprep.subr.bf16.mxu0 %v2329_v1  ;;  %v631_v28 = vshrl.u32 %v623_v24, 16  ;;  %v634_v29 = vshll.u32 %v623_v24, 16  ;;  %v645_v30 = vshrl.u32 %v625_v26, 16  ;;  %v648_v31 = vshll.u32 %v625_v26, 16  ;;  %v2262_v60 = vld [vmem:[%s2508_s26] ss:$8 sps:$4 sm:$0xff]  }
  0x16   : > { %2047 = vmatprep.subr.bf16.mxu1 %v2329_v1  ;;  %v642_v49 = vrot.slane %v640_v42, 5  ;;  %v656_v50 = vrot.slane %v654_v43, 5  ;;  %v2267_v2 = vld [vmem:[%s2793_s4 + $0x150] sm:$0xff]   ;;  %v1006_v3 = vld [vmem:[%s2508_s26] sm:$0xf]  ;;  %v2268_v4 = vld [vmem:[%s2793_s4 + $0x118] sm:$0xff]  }
  0x17   : > { %v633_v36 = vrot.slane %v631_v28, 4  ;;  %v636_v37 = vrot.slane %v634_v29, 5  ;;  %v647_v38 = vrot.slane %v645_v30, 4  ;;  %v650_v39 = vrot.slane %v648_v31, 5  ;;  %v1008_v5 = vld [vmem:[%s2508_s26 + $0x8] sm:$0xf] }
  0x18   : > { %2028 = vmatpush3.bf16.msra.mxu0 %v2235_v9  ;;  %v2269_v6 = vld [vmem:[%s2793_s4 + $0x158] sm:$0xff]   ;;  %v1011_v7 = vshrl.u32 %v1006_v3, 16  ;;  %v1014_v8 = vshll.u32 %v1006_v3, 16  ;;  %v1025_v9 = vshrl.u32 %v1008_v5, 16  ;;  %v2275_v26 = vld [vmem:[%s2793_s4 + $0x170] sm:$0xff]   ;;  %v2278_v35 = vld [vmem:[%s2556_s20] sm:$0xff]  }
  0x19   : > { %2048 = vmatpush3.bf16.msra.mxu1 %v2236_v10  ;;  %2029 = vmatprep.subr.bf16.mxu0 %v2329_v1  ;;  %v637_v45 = vor.u32 %v636_v37, %v633_v36  ;;  %v651_v46 = vor.u32 %v650_v39, %v647_v38  ;;  %v1028_v10 = vshll.u32 %v1008_v5, 16  ;;  %v2276_v31 = vld [vmem:[%s2793_s4 + $0x138] sm:$0xff]   ;;  %v2279_v36 = vld [vmem:[%s2793_s4 + $0x180] sm:$0xff]   ;;  %v2281_v39 = vld [vmem:[%s2793_s4 + $0x188] sm:$0xff]  }
  0x1a   : > { %2049 = vmatprep.subr.bf16.mxu1 %v2329_v1  ;;  %v2280_v38 = vld [vmem:[%s2793_s4 + $0x1c0] sm:$0xff]   ;;  %v2284_v42 = vld [vmem:[%s2793_s4 + $0x1d0] sm:$0xff]   ;;  %v2285_v43 = vld [vmem:[%s2793_s4 + $0x198] sm:$0xff]  }
  0x1b   : > { %v638_v51 = vrot.slane %v637_v45, 4  ;;  %v652_v52 = vrot.slane %v651_v46, 4  ;;  %v2287_v45 = vld [vmem:[%s2793_s4 + $0x1a0] sm:$0xff]  }
  0x1c   : > { %2030 = vmatpush3.bf16.msra.mxu0 %v2237_v11  ;;  %v2270_v11 = vld [vmem:[%s2793_s4 + $0x120] sm:$0xff]  }
  0x1d   : > { %2050 = vmatpush3.bf16.msra.mxu1 %v2238_v12  ;;  %2031 = vmatprep.subr.bf16.mxu0 %v2329_v1  ;;  %v643_v55 = vsel %vm2559_vm3, %v638_v51, %v642_v49  ;;  %v657_v56 = vsel %vm2559_vm3, %v652_v52, %v656_v50  ;;  %v2271_v12 = vld [vmem:[%s2793_s4 + $0x160] sm:$0xff]   ;;  %v2291_v49 = vld [vmem:[%s2793_s4 + $0x1b0] sm:$0xff]   ;;  %v2293_v51 = vld [vmem:[%s2793_s4 + $0x1b8] sm:$0xff]  }
  0x1e   : > { %2051 = vmatprep.subr.bf16.mxu1 %v2329_v1  ;;  %v1763_v58 = vcombine.low %v643_v55, %v657_v56  ;;  %v2288_v46 = vld [vmem:[%s2793_s4 + $0x1e0] sm:$0xff]   ;;  %v2292_v50 = vld [vmem:[%s2793_s4 + $0x1f0] sm:$0xff]   ;;  %v2294_v52 = vld [vmem:[%s2793_s4 + $0x1f8] sm:$0xff]  }
  0x1f   : > { %v2296_v55 = vld [vmem:[%s2793_s4 + $0x200] sm:$0xff]  }
  0x20   : > { %2032 = vmatpush3.bf16.msra.mxu0 %v2239_v13  ;;  %v1007_v13 = vld [vmem:[%s2508_s26 + $0x4] sm:$0x1] }
  0x21   : > { %2052 = vmatpush3.bf16.msra.mxu1 %v2240_v14  ;;  %2033 = vmatprep.subr.bf16.mxu0 %v2329_v1  ;;  %v1013_v14 = vrot.slane %v1011_v7, 4  ;;  %v2297_v56 = vld [vmem:[%s2448_s15 + $0x4] sm:$0xff]  }
  0x22   : > { %2053 = vmatprep.subr.bf16.mxu1 %v2329_v1  ;;  %v2301_v3 = vld [vmem:[%s2793_s4 + $0x220] sm:$0xff]  }
  0x24   : > { %2034 = vmatpush3.bf16.msra.mxu0 %v2241_v15  ;;  %v1016_v15 = vrot.slane %v1014_v8, 5  ;;  %v1902_v8 = vld [vmem:[%s2454_s18 + $0xc] sm:$0x1] }
  0x25   : > { %2054 = vmatpush3.bf16.msra.mxu1 %v2242_v16  ;;  %2059 = vmatprep.subr.bf16.mxu0 %v2329_v1  ;;  %v1027_v16 = vrot.slane %v1025_v9, 4  ;;  %v1904_v9 = vld [vmem:[%s2454_s18 + $0x14] sm:$0x1] }
  0x26   : > { %2079 = vmatprep.subr.bf16.mxu1 %v2329_v1 }
  0x27   : > { %2036 = vmatmul.mubr.bf16.vlgmr.msra.gmra.mrb[0].mxu0 %v2243_v17  ;;  %v1030_v17 = vrot.slane %v1028_v10, 5  ;;  %v2302_v10 = vld [vmem:[%s2793_s4 + $0x228] sm:$0xff]  }
  0x28   : > { %2056 = vmatmul.mubr.bf16.vlgmr.msra.gmra.mrb[0].mxu1 %v2244_v18  ;;  %2060 = vmatpush3.bf16.msra.mxu0 %v2245_v19  ;;  %v1009_v18 = vld [vmem:[%s2508_s26 + $0xc] sm:$0x1] }
  0x29   : > { %2080 = vmatpush3.bf16.msra.mxu1 %v2246_v20  ;;  %2061 = vmatprep.subr.bf16.mxu0 %v2329_v1  ;;  %v2272_v19 = vld [vmem:[%s2793_s4 + $0x128] sm:$0xff]   ;;  %v1034_v24 = vshll.u32 %v1009_v18, 16 }
  0x2a   : > { %2081 = vmatprep.subr.bf16.mxu1 %v2329_v1  ;;  %2075 = vmatprep.mubr.msk.bf16.mxu0 %vm2330_vm0, %v2329_v1  ;;  %v2273_v20 = vld [vmem:[%s2793_s4 + $0x168] sm:$0xff]  }
  0x2b   : > { %2095 = vmatprep.mubr.msk.bf16.mxu1 %vm2330_vm0, %v2329_v1  ;;  %v1036_v30 = vrot.slane %v1034_v24, 5 }
  0x2c   : > { %2062 = vmatpush3.bf16.msra.mxu0 %v2247_v21  ;;  %v1017_v21 = vor.u32 %v1016_v15, %v1013_v14  ;;  %v1416_v14 = vshll.u32 %v1904_v9, 16  ;;  %v2303_v15 = vld [vmem:[%s2793_s4 + $0x230] sm:$0xff]  }
  0x2d   : > { %2082 = vmatpush3.bf16.msra.mxu1 %v2248_v22  ;;  %2063 = vmatprep.subr.bf16.mxu0 %v2329_v1  ;;  %v1020_v22 = vshll.u32 %v1007_v13, 16 }
  0x2e   : > { %2083 = vmatprep.subr.bf16.mxu1 %v2329_v1 }
  0x2f   : > { %v1022_v28 = vrot.slane %v1020_v22, 5 }
  0x30   : > { %2064 = vmatpush3.bf16.msra.mxu0 %v2249_v23  ;;  %v1031_v23 = vor.u32 %v1030_v17, %v1027_v16 }
  0x31   : > { %2084 = vmatpush3.bf16.msra.mxu1 %v2250_v25  ;;  %2065 = vmatprep.subr.bf16.mxu0 %v2329_v1  ;;  %v2274_v25 = vld [vmem:[%s2793_s4 + $0x130] sm:$0xff]  }
  0x32   : > { %2085 = vmatprep.subr.bf16.mxu1 %v2329_v1  ;;  %v1032_v29 = vrot.slane %v1031_v23, 4 }
  0x34   : > { %2066 = vmatpush3.bf16.msra.mxu0 %v2251_v27  ;;  %v1018_v27 = vrot.slane %v1017_v21, 4  ;;  %v1037_v34 = vsel %vm2559_vm3, %v1032_v29, %v1036_v30 }
  0x35   : > { %2086 = vmatpush3.bf16.msra.mxu1 %v2252_v32  ;;  %2067 = vmatprep.subr.bf16.mxu0 %v2329_v1  ;;  %v2277_v32 = vld [vmem:[%s2793_s4 + $0x178] sm:$0xff]  }
  0x36   : > { %2087 = vmatprep.subr.bf16.mxu1 %v2329_v1 }
  0x38   : > { %2068 = vmatpush3.bf16.msra.mxu0 %v2253_v33  ;;  %v1023_v33 = vsel %vm2559_vm3, %v1018_v27, %v1022_v28 }
  0x39   : > { %2088 = vmatpush3.bf16.msra.mxu1 %v2254_v40  ;;  %2069 = vmatprep.subr.bf16.mxu0 %v2329_v1  ;;  %v1838_v37 = vcombine.low %v1023_v33, %v1037_v34  ;;  %v2282_v40 = vld [vmem:[%s2793_s4 + $0x1c8] sm:$0xff]  }
  0x3a   : > { %2089 = vmatprep.subr.bf16.mxu1 %v2329_v1 }
  0x3c   : > { %2070 = vmatpush3.bf16.msra.mxu0 %v2255_v41  ;;  %v2283_v41 = vld [vmem:[%s2793_s4 + $0x190] sm:$0xff]  }
  0x3d   : > { %2090 = vmatpush3.bf16.msra.mxu1 %v2256_v44  ;;  %2071 = vmatprep.subr.bf16.mxu0 %v2329_v1  ;;  %v2286_v44 = vld [vmem:[%s2793_s4 + $0x1d8] sm:$0xff]  }
  0x3e   : > { %2091 = vmatprep.subr.bf16.mxu1 %v2329_v1 }
  0x40   : > { %2072 = vmatpush3.bf16.msra.mxu0 %v2257_v47  ;;  %v2289_v47 = vld [vmem:[%s2793_s4 + $0x1a8] sm:$0xff]  }
  0x41   : > { %2092 = vmatpush3.bf16.msra.mxu1 %v2258_v48  ;;  %2073 = vmatprep.subr.bf16.mxu0 %v2329_v1  ;;  %v2290_v48 = vld [vmem:[%s2793_s4 + $0x1e8] sm:$0xff]  }
  0x42   : > { %2093 = vmatprep.subr.bf16.mxu1 %v2329_v1 }
  0x44   : > { %2074 = vmatpush3.bf16.msra.mxu0 %v2259_v54  ;;  %v2295_v54 = vld [vmem:[%s2454_s18 + $0x8] ss:$8 sps:$4 sm:$0xff]  }
  0x45   : > { %2094 = vmatpush3.bf16.msra.mxu1 %v2260_v57  ;;  %2099 = vmatprep.subr.bf16.mxu0 %v2329_v1  ;;  %v2298_v57 = vld [vmem:[%s2793_s4 + $0x208] sm:$0xff]  }
  0x46   : > { %2119 = vmatprep.subr.bf16.mxu1 %v2329_v1 }
  0x47   : > { %2076 = vmatmul.mubr.bf16.vlgmr.msra.gmra.mrb[4].mxu0 %v1763_v58  ;;  %v2299_v58 = vld [vmem:[%s2793_s4 + $0x210] sm:$0xff]  }
  0x48   : > { %2100 = vmatpush3.bf16.msra.mxu0 %v2261_v59  ;;  %2096 = vmatmul.mubr.bf16.vlgmr.msra.gmra.mrb[4].mxu1 %v2262_v60  ;;  %v1901_v59 = vld [vmem:[%s2454_s18 + $0x8] sm:$0xf]  ;;  %v1903_v60 = vld [vmem:[%s2454_s18 + $0x10] sm:$0xf] }
  0x49   : > { %2120 = vmatpush3.bf16.msra.mxu1 %v2263_v61  ;;  %2101 = vmatprep.subr.bf16.mxu0 %v2329_v1  ;;  %v2300_v61 = vld [vmem:[%s2793_s4 + $0x218] sm:$0xff]  }
  0x4a   : > { %2121 = vmatprep.subr.bf16.mxu1 %v2329_v1  ;;  %2115 = vmatprep.mubr.msk.bf16.mxu0 %vm2330_vm0, %v2329_v1 }
  0x4b   : > { %2135 = vmatprep.mubr.msk.bf16.mxu1 %vm2330_vm0, %v2329_v1 }
  0x4c   : > { %2102 = vmatpush3.bf16.msra.mxu0 %v2264_v62  ;;  %v1393_v62 = vshrl.u32 %v1901_v59, 16 }
  0x4d   : > { %2122 = vmatpush3.bf16.msra.mxu1 %v2265_v63  ;;  %2103 = vmatprep.subr.bf16.mxu0 %v2329_v1  ;;  %v1396_v63 = vshll.u32 %v1901_v59, 16 }
  0x4e   : > { %2123 = vmatprep.subr.bf16.mxu1 %v2329_v1 }
  0x4f   : > { %v1398_v5 = vrot.slane %v1396_v63, 5 }
  0x50   : > { %2104 = vmatpush3.bf16.msra.mxu0 %v2266_v0  ;;  %v1407_v0 = vshrl.u32 %v1903_v60, 16 }
  0x51   : > { %2124 = vmatpush3.bf16.msra.mxu1 %v2267_v2  ;;  %2105 = vmatprep.subr.bf16.mxu0 %v2329_v1  ;;  %v1410_v2 = vshll.u32 %v1903_v60, 16 }
  0x52   : > { %2125 = vmatprep.subr.bf16.mxu1 %v2329_v1 }
  0x53   : > { %v1412_v7 = vrot.slane %v1410_v2, 5 }
  0x54   : > { %2106 = vmatpush3.bf16.msra.mxu0 %v2268_v4  ;;  %v1395_v4 = vrot.slane %v1393_v62, 4 }
  0x55   : > { %2126 = vmatpush3.bf16.msra.mxu1 %v2269_v6  ;;  %2107 = vmatprep.subr.bf16.mxu0 %v2329_v1  ;;  %v1409_v6 = vrot.slane %v1407_v0, 4 }
  0x56   : > { %2127 = vmatprep.subr.bf16.mxu1 %v2329_v1 }
  0x57   : > { %v1413_v13 = vor.u32 %v1412_v7, %v1409_v6  ;;  %v1930_v7 = vld [vmem:[%s2794_s5] ss:$0 sm:$0xff] }
  0x58   : > { %2108 = vmatpush3.bf16.msra.mxu0 %v2270_v11  ;;  %v1399_v11 = vor.u32 %v1398_v5, %v1395_v4 }
  0x59   : > { %2128 = vmatpush3.bf16.msra.mxu1 %v2271_v12  ;;  %2109 = vmatprep.subr.bf16.mxu0 %v2329_v1  ;;  %v1402_v12 = vshll.u32 %v1902_v8, 16  ;;  %v1414_v18 = vrot.slane %v1413_v13, 4 }
  0x5a   : > { %2129 = vmatprep.subr.bf16.mxu1 %v2329_v1  ;;  %v1400_v16 = vrot.slane %v1399_v11, 4 }
  0x5b   : > { %v1404_v17 = vrot.slane %v1402_v12, 5 }
  0x5c   : > { %2110 = vmatpush3.bf16.msra.mxu0 %v2272_v19  ;;  %v1418_v19 = vrot.slane %v1416_v14, 5 }
  0x5d   : > { %2130 = vmatpush3.bf16.msra.mxu1 %v2273_v20  ;;  %2111 = vmatprep.subr.bf16.mxu0 %v2329_v1  ;;  %v2304_v20 = vld [vmem:[%s2793_s4 + $0x238] sm:$0xff]   ;;  %v1405_v21 = vsel %vm2559_vm3, %v1400_v16, %v1404_v17 }
  0x5e   : > { %2131 = vmatprep.subr.bf16.mxu1 %v2329_v1  ;;  %v1419_v22 = vsel %vm2559_vm3, %v1414_v18, %v1418_v19  ;;  %v1932_v18 = vld [vmem:[%s2796_s7] ss:$0 sm:$0xff] }
  0x5f   : > { %v1921_v23 = vcombine.low %v1405_v21, %v1419_v22 }
  0x60   : > { %2112 = vmatpush3.bf16.msra.mxu0 %v2274_v25 }
  0x61   : > { %2132 = vmatpush3.bf16.msra.mxu1 %v2275_v26  ;;  %2113 = vmatprep.subr.bf16.mxu0 %v2329_v1 }
  0x62   : > { %2133 = vmatprep.subr.bf16.mxu1 %v2329_v1 }
  0x64   : > { %2114 = vmatpush3.bf16.msra.mxu0 %v2276_v31 }
  0x65   : > { %2134 = vmatpush3.bf16.msra.mxu1 %v2277_v32  ;;  %2139 = vmatprep.subr.bf16.mxu0 %v2329_v1 }
  0x66   : > { %2159 = vmatprep.subr.bf16.mxu1 %v2329_v1 }
  0x67   : > { %2116 = vmatmul.mubr.bf16.vlgmr.msra.gmra.mrb[8].mxu0 %v2278_v35 }
  0x68   : > { %2140 = vmatpush3.bf16.msra.mxu0 %v2279_v36  ;;  %2136 = vmatmul.mubr.bf16.vlgmr.msra.gmra.mrb[8].mxu1 %v1838_v37 }
  0x69   : > { %2160 = vmatpush3.bf16.msra.mxu1 %v2280_v38  ;;  %2141 = vmatprep.subr.bf16.mxu0 %v2329_v1 }
  0x6a   : > { %2161 = vmatprep.subr.bf16.mxu1 %v2329_v1  ;;  %2155 = vmatprep.mubr.msk.bf16.mxu0 %vm2330_vm0, %v2329_v1 }
  0x6b   : > { %2175 = vmatprep.mubr.msk.bf16.mxu1 %vm2330_vm0, %v2329_v1 }
  0x6c   : > { %2142 = vmatpush3.bf16.msra.mxu0 %v2281_v39 }
  0x6d   : > { %2162 = vmatpush3.bf16.msra.mxu1 %v2282_v40  ;;  %2143 = vmatprep.subr.bf16.mxu0 %v2329_v1 }
  0x6e   : > { %2163 = vmatprep.subr.bf16.mxu1 %v2329_v1 }
  0x70   : > { %2144 = vmatpush3.bf16.msra.mxu0 %v2283_v41 }
  0x71   : > { %2164 = vmatpush3.bf16.msra.mxu1 %v2284_v42  ;;  %2145 = vmatprep.subr.bf16.mxu0 %v2329_v1 }
  0x72   : > { %2165 = vmatprep.subr.bf16.mxu1 %v2329_v1 }
  0x74   : > { %2146 = vmatpush3.bf16.msra.mxu0 %v2285_v43 }
  0x75   : > { %2166 = vmatpush3.bf16.msra.mxu1 %v2286_v44  ;;  %2147 = vmatprep.subr.bf16.mxu0 %v2329_v1 }
  0x76   : > { %2167 = vmatprep.subr.bf16.mxu1 %v2329_v1 }
  0x78   : > { %2148 = vmatpush3.bf16.msra.mxu0 %v2287_v45 }
  0x79   : > { %2168 = vmatpush3.bf16.msra.mxu1 %v2288_v46  ;;  %2149 = vmatprep.subr.bf16.mxu0 %v2329_v1 }
  0x7a   : > { %2169 = vmatprep.subr.bf16.mxu1 %v2329_v1 }
  0x7c   : > { %2150 = vmatpush3.bf16.msra.mxu0 %v2289_v47 }
  0x7d   : > { %2170 = vmatpush3.bf16.msra.mxu1 %v2290_v48  ;;  %2151 = vmatprep.subr.bf16.mxu0 %v2329_v1 }
  0x7e   : > { %2171 = vmatprep.subr.bf16.mxu1 %v2329_v1 }
  0x80   : > { %2152 = vmatpush3.bf16.msra.mxu0 %v2291_v49 }
  0x81   : > { %2172 = vmatpush3.bf16.msra.mxu1 %v2292_v50  ;;  %2153 = vmatprep.subr.bf16.mxu0 %v2329_v1 }
  0x82   : > { %2173 = vmatprep.subr.bf16.mxu1 %v2329_v1 }
  0x84   : > { %2154 = vmatpush3.bf16.msra.mxu0 %v2293_v51 }
  0x85   : > { %2174 = vmatpush3.bf16.msra.mxu1 %v2294_v52  ;;  %2179 = vmatprep.subr.bf16.mxu0 %v2329_v1 }
  0x87   : > { %2156 = vmatmul.mubr.bf16.vlgmr.msra.gmra.mrb[12].mxu0 %v2295_v54 }
  0x88   : > { %2180 = vmatpush3.bf16.msra.mxu0 %v2296_v55  ;;  %2176 = vmatmul.mubr.bf16.vlgmr.msra.gmra.mrb[12].mxu1 %v2297_v56 }
  0x89   : > { %2181 = vmatprep.subr.bf16.mxu0 %v2329_v1  ;;  %2195 = vmatprep.mubr.msk.bf16.mxu0 %vm2330_vm0, %v2329_v1 }
  0x8c   : > { %2182 = vmatpush3.bf16.msra.mxu0 %v2298_v57 }
  0x8d   : > { %2183 = vmatprep.subr.bf16.mxu0 %v2329_v1 }
  0x90   : > { %2184 = vmatpush3.bf16.msra.mxu0 %v2299_v58 }
  0x91   : > { %2185 = vmatprep.subr.bf16.mxu0 %v2329_v1 }
  0x94   : > { %2186 = vmatpush3.bf16.msra.mxu0 %v2300_v61 }
  0x95   : > { %2187 = vmatprep.subr.bf16.mxu0 %v2329_v1 }
  0x98   : > { %2188 = vmatpush3.bf16.msra.mxu0 %v2301_v3 }
  0x99   : > { %2189 = vmatprep.subr.bf16.mxu0 %v2329_v1 }
  0x9c   : > { %2190 = vmatpush3.bf16.msra.mxu0 %v2302_v10 }
  0x9d   : > { %2191 = vmatprep.subr.bf16.mxu0 %v2329_v1 }
  0xa0   : > { %2192 = vmatpush3.bf16.msra.mxu0 %v2303_v15  ;;  %v1931_v15 = vld [vmem:[%s2795_s6] ss:$0 sm:$0xff] }
  0xa1   : > { %2193 = vmatprep.subr.bf16.mxu0 %v2329_v1 }
  0xa4   : > { %2194 = vmatpush3.bf16.msra.mxu0 %v2304_v20 }
  0xa7   : > { %2196 = vmatmul.mubr.bf16.vlgmr.msra.gmra.mrb[16].mxu0 %v1921_v23 }
  0xfa   : > { %v521_v24 = vpop.f32.mrb[0].mxu0 }
  0xfb   : > { %v616_v25 = vpop.f32.mrb[0].mxu1  ;;  %v2037_v26 = vpop.f32.mrb[1].mxu0 }
  0xfc   : > { %v617_v27 = vadd.f32 %v616_v25, %v521_v24  ;;  %v2057_v28 = vpop.f32.mrb[1].mxu1  ;;  %v524_v29 = vpop.f32.mrb[2].mxu0 }
  0xfd   : > { %v619_v30 = vpop.f32.mrb[2].mxu1  ;;  %v2038_v31 = vpop.f32.mrb[3].mxu0 }
  0xfe   : > { %v620_v32 = vadd.f32 %v619_v30, %v524_v29  ;;  %v2058_v33 = vpop.f32.mrb[3].mxu1 }
 0x11a   : > { %v761_v34 = vpop.f32.mrb[4].mxu0 }
 0x11b   : > { %v768_v35 = vadd.f32 %v761_v34, %v617_v27  ;;  %v2077_v36 = vpop.f32.mrb[5].mxu0  ;;  %v879_v53 = vpop.f32.mrb[4].mxu1 }
 0x11c   : > { %v764_v37 = vpop.f32.mrb[6].mxu0  ;;  %v2097_v38 = vpop.f32.mrb[5].mxu1 }
 0x11d   : > { %v769_v1 = vadd.f32 %v764_v37, %v620_v32  ;;  %v886_v39 = vadd.f32 %v879_v53, %v768_v35  ;;  %v2078_v40 = vpop.f32.mrb[7].mxu0  ;;  %v882_v41 = vpop.f32.mrb[6].mxu1 }
 0x11e   : > { %v2098_v42 = vpop.f32.mrb[7].mxu1 }
 0x11f   : > { %v887_v43 = vadd.f32 %v882_v41, %v769_v1 }
 0x13a   : > { %v997_v44 = vpop.f32.mrb[8].mxu0 }
 0x13b   : > { %v1004_v45 = vadd.f32 %v997_v44, %v886_v39  ;;  %v2117_v46 = vpop.f32.mrb[9].mxu0  ;;  %v1141_v47 = vpop.f32.mrb[8].mxu1 }
 0x13c   : > { %v1000_v48 = vpop.f32.mrb[10].mxu0  ;;  %v2137_v49 = vpop.f32.mrb[9].mxu1 }
 0x13d   : > { %v1005_v50 = vadd.f32 %v1000_v48, %v887_v43  ;;  %v1148_v51 = vadd.f32 %v1141_v47, %v1004_v45  ;;  %v2118_v52 = vpop.f32.mrb[11].mxu0  ;;  %v1144_v54 = vpop.f32.mrb[10].mxu1 }
 0x13e   : > { %v2138_v55 = vpop.f32.mrb[11].mxu1 }
 0x13f   : > { %v1149_v56 = vadd.f32 %v1144_v54, %v1005_v50 }
 0x15a   : > { %v1261_v57 = vpop.f32.mrb[12].mxu0 }
 0x15b   : > { %v1268_v58 = vadd.f32 %v1261_v57, %v1148_v51  ;;  %v2157_v59 = vpop.f32.mrb[13].mxu0  ;;  %v1379_v60 = vpop.f32.mrb[12].mxu1 }
 0x15c   : > { %v1264_v61 = vpop.f32.mrb[14].mxu0  ;;  %v2177_v62 = vpop.f32.mrb[13].mxu1 }
 0x15d   : > { %v1269_v63 = vadd.f32 %v1264_v61, %v1149_v56  ;;  %v1386_v0 = vadd.f32 %v1379_v60, %v1268_v58  ;;  %v2158_v2 = vpop.f32.mrb[15].mxu0  ;;  %v1382_v3 = vpop.f32.mrb[14].mxu1 }
 0x15e   : > { %v2178_v4 = vpop.f32.mrb[15].mxu1 }
 0x15f   : > { %v1387_v5 = vadd.f32 %v1382_v3, %v1269_v63 }
 0x17a   : > { %v1523_v6 = vpop.f32.mrb[16].mxu0 }
 0x17b   : > { %v1530_v8 = vadd.f32 %v1523_v6, %v1386_v0  ;;  %v2197_v9 = vpop.f32.mrb[17].mxu0 }
 0x17c   : > { %v1526_v10 = vpop.f32.mrb[18].mxu0 }
 0x17d   : > { %v1539_v11 = vadd.f32 %v1930_v7, %v1530_v8  ;;  %v1531_v12 = vadd.f32 %v1526_v10, %v1387_v5  ;;  %v2198_v13 = vpop.f32.mrb[19].mxu0 }
 0x17f   : > { %vm1541_vm4 = vcmp.ge.f32.partialorder %v1539_v11, 0.0  ;;  %v1543_v14 = vmul.f32 0.2, %v1539_v11  ;;  %v1540_v16 = vadd.f32 %v1930_v7, %v1531_v12 }
 0x181   : > { %v1545_v17 = vsel %vm1541_vm4, %v1539_v11, %v1543_v14  ;;  %vm1542_vm5 = vcmp.ge.f32.partialorder %v1540_v16, 0.0  ;;  %v1544_v19 = vmul.f32 0.2, %v1540_v16 }
 0x182   : > { %v1554_v20 = vmul.f32 %v1931_v15, %v1545_v17 }
 0x183   : > { %v1546_v21 = vsel %vm1542_vm5, %v1540_v16, %v1544_v19 }
 0x184   : > { %v1563_v22 = vadd.f32 %v1932_v18, %v1554_v20  ;;  %v1555_v23 = vmul.f32 %v1931_v15, %v1546_v21 }
 0x186   : > { %1565 = vst [vmem:[%s387_s24] sm:$0xff] %v1563_v22  ;;  %v1564_v24 = vadd.f32 %v1932_v18, %v1555_v23 }
 0x188   : > { %1566 = vst [vmem:[%s387_s24 + $0x8] sm:$0xff] %v1564_v24 }
 0x189 PF: > { %s18_s29 = sadd.s32 1, %s2327_s29   ;;  %s2800_s27 = smov %s2323_s28 }
 0x18a   : > { %p15_p5 = scmp.ge.s32.totalorder %s18_s29, 4   ;;  %s2801_s28 = smov %s2803_s30 }
 0x18c   :  { %17 = sbr.rel (!%p15_p5) target bundleno = 2 (0x2), region = 105 }

</bundles_post_ra>
